<compile_context>
chip_gen: v7x
topology: tpu7x:2x2x1
jax: 0.10.0
libtpu: 0.0.40
codegen_flags: <defaults>
</compile_context>

<pallas_src>
import jax
import jax.numpy as jnp
from jax.experimental import pallas as pl
from jax.experimental.pallas import tpu as pltpu


# ---------------------------------------------------------------------------
# tiling helpers
# ---------------------------------------------------------------------------

def _pick_b_tile(B, H, W):
    """Smallest batch tile whose flattened pixel count is lane-dense (%128 == 0)."""
    HW = H * W
    for bt in range(1, B + 1):
        if B % bt == 0 and (bt * HW) % 128 == 0:
            return bt
    # TODO(synk): pad H*W to a lane multiple instead of falling back to the full
    # batch (this fallback leaves the second v7x TensorCore idle when hit).
    return B


def _vmem_budget():
    try:
        cap = int(pltpu.get_tpu_info().vmem_capacity_bytes)
    except Exception:
        cap = 64 * 1024 * 1024          # conservative: v7x physical VMEM per TC
    return int(0.70 * cap)


def _pick_t_blk(S, per_step_bytes, fixed_bytes, budget, cap=16):
    best = 0
    for cand in range(1, min(S, cap) + 1):
        if S % cand == 0 and fixed_bytes + cand * per_step_bytes <= budget:
            best = cand
    if best == 0:
        raise ValueError("even a single timestep does not fit the VMEM budget; "
                         "reduce the batch tile / spatial size")
    return best


# ---------------------------------------------------------------------------
# kernel
# ---------------------------------------------------------------------------

def _make_cell_kernel(F, K, W, NPIX, T_BLK):
    KK = K * K
    p = K // 2
    # Tap (kh,kw) at flattened pixel i reads h[i + dh*W + dw] (dh=kh-p, dw=kw-p).
    # pltpu.roll follows jnp.roll semantics (out[i] = in[i - shift]), so
    # shift = -(dh*W + dw); kept non-negative modulo the rolled axis length.
    shifts = []
    for kh in range(K):
        for kw in range(K):
            delta = (kh - p) * W + (kw - p)
            shifts.append((-delta) % NPIX)

    def kernel(gx_ref, wh_ref, m_ref, h_out_ref, c_out_ref, htaps_st, c_st):
        # Recurrent state is carried in per-core VMEM scratch across the
        # innermost (time) grid axis and reset when a new batch tile starts.
        @pl.when(pl.program_id(1) == 0)
        def _():
            htaps_st[...] = jnp.zeros_like(htaps_st)
            c_st[...] = jnp.zeros_like(c_st)

        wh = wh_ref[...]                                  # (4F, K*K*F) bf16

        def step(t, carry):
            # gates_x (x-projection + bias) was precomputed outside the kernel.
            # One MXU matmul per step: (4F, KKF) @ (KKF, NPIX) -> (4F, NPIX).
            gates = gx_ref[t] + jnp.dot(
                wh, htaps_st[...], preferred_element_type=jnp.float32)

            # Full-width transcendental passes; every gate is an aligned
            # 8-sublane x NPIX-lane block.
            sig = jax.nn.sigmoid(gates)                   # (4F, NPIX) f32
            g_g = jnp.tanh(gates[2 * F:3 * F, :])
            c_new = sig[F:2 * F, :] * c_st[...] + sig[0:F, :] * g_g
            h_new = sig[3 * F:4 * F, :] * jnp.tanh(c_new)

            c_st[...] = c_new
            h_out_ref[t] = h_new                          # lane-dense stores
            c_out_ref[t] = c_new

            # Rebuild the lane-dense h-tap matrix for the next timestep with
            # XLU lane rolls + multiplicative border masks (zero 'SAME' padding).
            parts = []
            for k in range(KK):
                rolled = pltpu.roll(h_new, shifts[k], axis=1)
                parts.append(rolled * m_ref[k])
            htaps_st[...] = jnp.concatenate(parts, axis=0).astype(jnp.bfloat16)
            return carry

        jax.lax.fori_loop(0, T_BLK, step, None, unroll=True)

    return kernel


# ---------------------------------------------------------------------------
# one ConvLSTM layer
# ---------------------------------------------------------------------------

def _convlstm_layer(x_seq, w, b, F):
    """x_seq: (S,B,H,W,Cin) f32; w: (K,K,Cin+F,4F) HWIO; b: (4F,).
    Returns h_seq, c_seq each (S,B,H,W,F) f32."""
    S, B, H, W, Cin = x_seq.shape
    K = w.shape[0]
    p = K // 2
    KK = K * K
    KKF = KK * F
    G = 4 * F

    B_TILE = _pick_b_tile(B, H, W)
    NB = B // B_TILE
    NPIX = B_TILE * H * W

    # ---- wrapper-side precompute (plain-JAX glue) --------------------------
    # Input projection + bias hoisted out of the recurrence entirely.
    wx = w[:, :, :Cin, :]
    gx = jax.lax.conv_general_dilated(
        x_seq.reshape(S * B, H, W, Cin), wx, (1, 1), "SAME",
        dimension_numbers=("NHWC", "HWIO", "NHWC"),
        precision=jax.lax.Precision.HIGHEST)
    gx = gx + b.reshape(1, 1, 1, G)
    # Lane-dense (S, 4F, B*H*W): flattened pixel index on the 128-lane axis.
    gx = (gx.reshape(S, B, H, W, G).transpose(0, 4, 1, 2, 3)
            .reshape(S, G, B * H * W).astype(jnp.float32))

    # Recurrent weight pre-transposed for the (4F, KKF) @ (KKF, NPIX) matmul.
    wh_t = jnp.transpose(w[:, :, Cin:, :].reshape(KKF, G)).astype(jnp.bfloat16)

    # Border-validity masks for the rolled h taps (same per sample / channel).
    hh = jnp.arange(H).reshape(H, 1)
    ww = jnp.arange(W).reshape(1, W)
    m_list = []
    for kh in range(K):
        for kw in range(K):
            dh, dw = kh - p, kw - p
            m_list.append((hh + dh >= 0) & (hh + dh < H)
                          & (ww + dw >= 0) & (ww + dw < W))
    masks = jnp.stack(m_list).astype(jnp.float32).reshape(KK, H * W)
    masks = jnp.tile(masks, (1, B_TILE))                         # (KK, NPIX)
    masks = jnp.broadcast_to(masks[:, None, :], (KK, F, NPIX))

    # ---- time blocking from a generation-aware VMEM budget -----------------
    budget = _vmem_budget()
    per_step = 2 * (G * NPIX * 4) + 2 * 2 * (F * NPIX * 4)   # dbl-buffered io
    fixed = (G * KKF * 2 * 2 + KK * F * NPIX * 4 * 2         # weights + masks
             + KKF * NPIX * 2 + F * NPIX * 4                 # scratch
             + 2 * 1024 * 1024)                              # headroom
    T_BLK = _pick_t_blk(S, per_step, fixed, budget)
    NT = S // T_BLK

    kernel = _make_cell_kernel(F, K, W, NPIX, T_BLK)

    grid_spec = pltpu.PrefetchScalarGridSpec(
        num_scalar_prefetch=0,
        grid=(NB, NT),                       # time innermost: state is carried
        in_specs=[
            pl.BlockSpec((T_BLK, G, NPIX), lambda bb, tt: (tt, 0, bb)),
            pl.BlockSpec((G, KKF), lambda bb, tt: (0, 0)),
            pl.BlockSpec((KK, F, NPIX), lambda bb, tt: (0, 0, 0)),
        ],
        out_specs=[
            pl.BlockSpec((T_BLK, F, NPIX), lambda bb, tt: (tt, 0, bb)),
            pl.BlockSpec((T_BLK, F, NPIX), lambda bb, tt: (tt, 0, bb)),
        ],
        scratch_shapes=[
            pltpu.VMEM((KKF, NPIX), jnp.bfloat16),   # recurrent h-tap matrix
            pltpu.VMEM((F, NPIX), jnp.float32),      # recurrent c state
        ],
    )

    flops = 2 * S * (B * H * W) * KKF * G + 10 * S * B * H * W * F
    transcendentals = 6 * S * B * H * W * F
    bytes_accessed = (gx.size * 4 + 2 * S * B * H * W * F * 4
                      + wh_t.size * 2 + masks.size * 4)

    h_flat, c_flat = pl.pallas_call(
        kernel,
        out_shape=(jax.ShapeDtypeStruct((S, F, B * H * W), jnp.float32),
                   jax.ShapeDtypeStruct((S, F, B * H * W), jnp.float32)),
        grid_spec=grid_spec,
        compiler_params=pltpu.CompilerParams(
            dimension_semantics=("parallel", "arbitrary"),
            vmem_limit_bytes=budget),
        cost_estimate=pl.CostEstimate(flops=flops,
                                      transcendentals=transcendentals,
                                      bytes_accessed=bytes_accessed),
    )(gx, wh_t, masks)

    h_seq = h_flat.reshape(S, F, B, H, W).transpose(0, 2, 3, 4, 1)
    c_seq = c_flat.reshape(S, F, B, H, W).transpose(0, 2, 3, 4, 1)
    return h_seq, c_seq


# ---------------------------------------------------------------------------
# full module forward
# ---------------------------------------------------------------------------

def convlstm2d_forward(x, weights, biases, out_channels, return_sequences=True):
    """Pallas ConvLSTM2d forward.

    x: (B, C, S, H, W) (PyTorch layout)
    weights[l]: (K, K, Cin_l + F, 4F) HWIO conv weight   biases[l]: (4F,)
    Returns [h_n, c_n] matching the PyTorch module's output shapes.
    """
    B, C, S, H, W = x.shape
    F = out_channels
    num_layers = len(weights)

    layer_in = jnp.transpose(x, (2, 0, 3, 4, 1)).astype(jnp.float32)  # (S,B,H,W,C)
    h_layers, c_layers = [], []
    for l in range(num_layers):
        h_seq, c_seq = _convlstm_layer(layer_in, weights[l], biases[l], F)
        h_layers.append(h_seq)
        c_layers.append(c_seq)
        layer_in = h_seq

    def to_torch_layout(seq):  # (S,B,H,W,F) -> (B,F,S,H,W)
        return jnp.transpose(seq, (1, 4, 0, 2, 3))

    h_n = jnp.stack([to_torch_layout(h) for h in h_layers])  # (nl,B,F,S,H,W)
    c_n = jnp.stack([to_torch_layout(c) for c in c_layers])
    if not return_sequences:
        h_n = h_n[:, :, :, -1]   # (nl,B,F,H,W)
        c_n = c_n[:, :, :, -1]
    if num_layers == 1:
        h_n = h_n[0]
        c_n = c_n[0]
    return [h_n, c_n]


# ---------------------------------------------------------------------------
# pure-JAX reference (correctness check)
# ---------------------------------------------------------------------------

def _reference_forward(x, weights, biases, out_channels, return_sequences=True):
    B, C, S, H, W = x.shape
    F = out_channels
    num_layers = len(weights)
    layer_in = jnp.transpose(x, (2, 0, 3, 4, 1)).astype(jnp.float32)
    h_layers, c_layers = [], []
    for l in range(num_layers):
        h = jnp.zeros((B, H, W, F), jnp.float32)
        c = jnp.zeros((B, H, W, F), jnp.float32)
        hs, cs = [], []
        for s in range(S):
            comb = jnp.concatenate([layer_in[s], h], axis=-1)
            gates = jax.lax.conv_general_dilated(
                comb, weights[l], (1, 1), 'SAME',
                dimension_numbers=('NHWC', 'HWIO', 'NHWC'),
                precision=jax.lax.Precision.HIGHEST) + biases[l]
            i = jax.nn.sigmoid(gates[..., :F])
            f = jax.nn.sigmoid(gates[..., F:2 * F])
            g = jnp.tanh(gates[..., 2 * F:3 * F])
            o = jax.nn.sigmoid(gates[..., 3 * F:])
            c = f * c + i * g
            h = o * jnp.tanh(c)
            hs.append(h)
            cs.append(c)
        h_layers.append(jnp.stack(hs))
        c_layers.append(jnp.stack(cs))
        layer_in = jnp.stack(hs)

    def to_torch_layout(seq):
        return jnp.transpose(seq, (1, 4, 0, 2, 3))

    h_n = jnp.stack([to_torch_layout(h) for h in h_layers])
    c_n = jnp.stack([to_torch_layout(c) for c in c_layers])
    if not return_sequences:
        h_n = h_n[:, :, :, -1]
        c_n = c_n[:, :, :, -1]
    if num_layers == 1:
        h_n = h_n[0]
        c_n = c_n[0]
    return [h_n, c_n]


if __name__ == "__main__":
    # Small shapes consistent with the module: x is (B, C, S, H, W)
    B, C, S, H, W = 2, 4, 8, 16, 16
    F = 8          # out_channels
    K = 3          # kernel_size
    num_layers = 1
    return_sequences = True

    key = jax.random.PRNGKey(0)
    kx, key = jax.random.split(key)
    x = jax.random.normal(kx, (B, C, S, H, W), dtype=jnp.float32)

    # Deterministic synthetic parameters; shapes match
    # Conv2d(Cin_l + F, 4F, K, padding=K//2) per layer, stored as HWIO.
    weights, biases = [], []
    for l in range(num_layers):
        cin_l = C if l == 0 else F
        kw_, kb_, key = jax.random.split(key, 3)
        weights.append(0.1 * jax.random.normal(
            kw_, (K, K, cin_l + F, 4 * F), dtype=jnp.float32))
        biases.append(0.1 * jax.random.normal(kb_, (4 * F,), dtype=jnp.float32))

    fwd = jax.jit(lambda xx, ww, bb: convlstm2d_forward(
        xx, ww, bb, F, return_sequences))
    h_n, c_n = fwd(x, weights, biases)
    jax.block_until_ready(h_n)
    jax.block_until_ready(c_n)

    h_ref, c_ref = _reference_forward(x, weights, biases, F, return_sequences)
    assert h_n.shape == h_ref.shape and c_n.shape == c_ref.shape
    # bf16 recurrent-h matmul operand vs f32 HIGHEST reference -> bf16 tolerance.
    assert jnp.max(jnp.abs(h_n - h_ref)) < 3e-2
    assert jnp.max(jnp.abs(c_n - c_ref)) < 3e-2

    print("KERNEL_OK")
</pallas_src>

<mosaic_0001>
module attributes {stable_mosaic.version = 11 : i64} {
  func.func @kernel(%arg0: i32, %arg1: i32, %arg2: memref<8x32x256xf32, #tpu.memory_space<vmem>>, %arg3: memref<32x72xbf16, #tpu.memory_space<vmem>>, %arg4: memref<9x8x256xf32, #tpu.memory_space<vmem>>, %arg5: memref<8x8x256xf32, #tpu.memory_space<vmem>>, %arg6: memref<8x8x256xf32, #tpu.memory_space<vmem>>, %arg7: memref<72x256xbf16, #tpu.memory_space<vmem>>, %arg8: memref<8x256xf32, #tpu.memory_space<vmem>>) attributes {dimension_semantics = [#tpu.dimension_semantics<parallel>, #tpu.dimension_semantics<arbitrary>], iteration_bounds = array<i64: 2, 1>, scalar_prefetch = 0 : i64, scratch_operands = 2 : i64, tpu.core_type = #tpu.core_type<tc>, window_params = [{transform_indices = @transform_0, window_bounds = array<i64: 8, 32, 256>}, {pipeline_mode = #tpu.pipeline_mode<synchronous>, transform_indices = @transform_1, window_bounds = array<i64: 32, 72>}, {pipeline_mode = #tpu.pipeline_mode<synchronous>, transform_indices = @transform_2, window_bounds = array<i64: 9, 8, 256>}, {transform_indices = @transform_3, window_bounds = array<i64: 8, 8, 256>}, {transform_indices = @transform_4, window_bounds = array<i64: 8, 8, 256>}]} {
    %c0_i32 = arith.constant 0 : i32
    %0 = arith.cmpi eq, %arg1, %c0_i32 : i32
    %1 = arith.extui %0 : i1 to i32
    %c0_i32_0 = arith.constant 0 : i32
    %2 = arith.cmpi ne, %1, %c0_i32_0 : i32
    scf.if %2 {
      %cst_403 = arith.constant 0.000000e+00 : bf16
      %564 = vector.broadcast %cst_403 : bf16 to vector<72x256xbf16>
      %c0_404 = arith.constant 0 : index
      %c0_405 = arith.constant 0 : index
      %565 = vector.load %arg7[%c0_404, %c0_405] : memref<72x256xbf16, #tpu.memory_space<vmem>>, vector<72x256xbf16>
      tpu.vector_store %arg7[%c0_404, %c0_405], %564 {strides = array<i32>} : memref<72x256xbf16, #tpu.memory_space<vmem>>, vector<72x256xbf16>,
      %cst_406 = arith.constant 0.000000e+00 : f32
      %566 = vector.broadcast %cst_406 : f32 to vector<8x256xf32>
      %c0_407 = arith.constant 0 : index
      %c0_408 = arith.constant 0 : index
      %567 = vector.load %arg8[%c0_407, %c0_408] : memref<8x256xf32, #tpu.memory_space<vmem>>, vector<8x256xf32>
      tpu.vector_store %arg8[%c0_407, %c0_408], %566 {strides = array<i32>} : memref<8x256xf32, #tpu.memory_space<vmem>>, vector<8x256xf32>,
    } else {
    }
    %c0 = arith.constant 0 : index
    %c0_1 = arith.constant 0 : index
    %3 = vector.load %arg3[%c0, %c0_1] : memref<32x72xbf16, #tpu.memory_space<vmem>>, vector<32x72xbf16>
    %c0_i32_2 = arith.constant 0 : i32
    %4 = arith.index_cast %c0_i32_2 : i32 to index
    %c0_3 = arith.constant 0 : index
    %c0_4 = arith.constant 0 : index
    %5 = vector.load %arg2[%4, %c0_3, %c0_4] : memref<8x32x256xf32, #tpu.memory_space<vmem>>, vector<1x32x256xf32>
    %6 = vector.shape_cast %5 : vector<1x32x256xf32> to vector<32x256xf32>
    %c0_5 = arith.constant 0 : index
    %c0_6 = arith.constant 0 : index
    %7 = vector.load %arg7[%c0_5, %c0_6] : memref<72x256xbf16, #tpu.memory_space<vmem>>, vector<72x256xbf16>
    %cst = arith.constant dense<0.000000e+00> : vector<32x256xf32>
    %8 = tpu.matmul %3, %7, %cst {dimension_numbers = #tpu.dot_dimension_numbers<[1], [0], [0], [1], [0, 0, 1, 1], [], []>} : vector<32x72xbf16>, vector<72x256xbf16>, vector<32x256xf32> -> vector<32x256xf32>
    %9 = arith.addf %6, %8 : vector<32x256xf32>
    %10 = arith.negf %9 : vector<32x256xf32>
    %11 = math.exp %10 : vector<32x256xf32>
    %cst_7 = arith.constant 1.000000e+00 : f32
    %12 = vector.broadcast %cst_7 : f32 to vector<32x256xf32>
    %13 = arith.addf %12, %11 : vector<32x256xf32>
    %14 = arith.divf %12, %13 : vector<32x256xf32>
    %15 = vector.extract_strided_slice %9 {offsets = [16, 0], sizes = [8, 256], strides = [1, 1]} : vector<32x256xf32> to vector<8x256xf32>
    %16 = math.tanh %15 : vector<8x256xf32>
    %17 = vector.extract_strided_slice %14 {offsets = [8, 0], sizes = [8, 256], strides = [1, 1]} : vector<32x256xf32> to vector<8x256xf32>
    %c0_8 = arith.constant 0 : index
    %c0_9 = arith.constant 0 : index
    %18 = vector.load %arg8[%c0_8, %c0_9] : memref<8x256xf32, #tpu.memory_space<vmem>>, vector<8x256xf32>
    %19 = arith.mulf %17, %18 : vector<8x256xf32>
    %20 = vector.extract_strided_slice %14 {offsets = [0, 0], sizes = [8, 256], strides = [1, 1]} : vector<32x256xf32> to vector<8x256xf32>
    %21 = arith.mulf %20, %16 : vector<8x256xf32>
    %22 = arith.addf %19, %21 : vector<8x256xf32>
    %23 = vector.extract_strided_slice %14 {offsets = [24, 0], sizes = [8, 256], strides = [1, 1]} : vector<32x256xf32> to vector<8x256xf32>
    %24 = math.tanh %22 : vector<8x256xf32>
    %25 = arith.mulf %23, %24 : vector<8x256xf32>
    %c0_10 = arith.constant 0 : index
    %c0_11 = arith.constant 0 : index
    %26 = vector.load %arg8[%c0_10, %c0_11] : memref<8x256xf32, #tpu.memory_space<vmem>>, vector<8x256xf32>
    tpu.vector_store %arg8[%c0_10, %c0_11], %22 {strides = array<i32>} : memref<8x256xf32, #tpu.memory_space<vmem>>, vector<8x256xf32>,
    %27 = arith.index_cast %c0_i32_2 : i32 to index
    %c0_12 = arith.constant 0 : index
    %c0_13 = arith.constant 0 : index
    %28 = vector.load %arg5[%27, %c0_12, %c0_13] : memref<8x8x256xf32, #tpu.memory_space<vmem>>, vector<1x8x256xf32>
    %29 = vector.shape_cast %28 : vector<1x8x256xf32> to vector<8x256xf32>
    %30 = vector.shape_cast %25 : vector<8x256xf32> to vector<1x8x256xf32>
    tpu.vector_store %arg5[%27, %c0_12, %c0_13], %30 {strides = array<i32>} : memref<8x8x256xf32, #tpu.memory_space<vmem>>, vector<1x8x256xf32>,
    %31 = arith.index_cast %c0_i32_2 : i32 to index
    %c0_14 = arith.constant 0 : index
    %c0_15 = arith.constant 0 : index
    %32 = vector.load %arg6[%31, %c0_14, %c0_15] : memref<8x8x256xf32, #tpu.memory_space<vmem>>, vector<1x8x256xf32>
    %33 = vector.shape_cast %32 : vector<1x8x256xf32> to vector<8x256xf32>
    %34 = vector.shape_cast %22 : vector<8x256xf32> to vector<1x8x256xf32>
    tpu.vector_store %arg6[%31, %c0_14, %c0_15], %34 {strides = array<i32>} : memref<8x8x256xf32, #tpu.memory_space<vmem>>, vector<1x8x256xf32>,
    %c17_i32 = arith.constant 17 : i32
    %35 = tpu.dynamic_rotate %25 by %c17_i32 dim 1 : vector<8x256xf32>, i32 -> vector<8x256xf32>
    %c0_16 = arith.constant 0 : index
    %c0_17 = arith.constant 0 : index
    %c0_18 = arith.constant 0 : index
    %36 = vector.load %arg4[%c0_16, %c0_17, %c0_18] : memref<9x8x256xf32, #tpu.memory_space<vmem>>, vector<1x8x256xf32>
    %37 = vector.shape_cast %36 : vector<1x8x256xf32> to vector<8x256xf32>
    %38 = arith.mulf %35, %37 : vector<8x256xf32>
    %c16_i32 = arith.constant 16 : i32
    %39 = tpu.dynamic_rotate %25 by %c16_i32 dim 1 : vector<8x256xf32>, i32 -> vector<8x256xf32>
    %c1 = arith.constant 1 : index
    %c0_19 = arith.constant 0 : index
    %c0_20 = arith.constant 0 : index
    %40 = vector.load %arg4[%c1, %c0_19, %c0_20] : memref<9x8x256xf32, #tpu.memory_space<vmem>>, vector<1x8x256xf32>
    %41 = vector.shape_cast %40 : vector<1x8x256xf32> to vector<8x256xf32>
    %42 = arith.mulf %39, %41 : vector<8x256xf32>
    %c15_i32 = arith.constant 15 : i32
    %43 = tpu.dynamic_rotate %25 by %c15_i32 dim 1 : vector<8x256xf32>, i32 -> vector<8x256xf32>
    %c2 = arith.constant 2 : index
    %c0_21 = arith.constant 0 : index
    %c0_22 = arith.constant 0 : index
    %44 = vector.load %arg4[%c2, %c0_21, %c0_22] : memref<9x8x256xf32, #tpu.memory_space<vmem>>, vector<1x8x256xf32>
    %45 = vector.shape_cast %44 : vector<1x8x256xf32> to vector<8x256xf32>
    %46 = arith.mulf %43, %45 : vector<8x256xf32>
    %c1_i32 = arith.constant 1 : i32
    %47 = tpu.dynamic_rotate %25 by %c1_i32 dim 1 : vector<8x256xf32>, i32 -> vector<8x256xf32>
    %c3 = arith.constant 3 : index
    %c0_23 = arith.constant 0 : index
    %c0_24 = arith.constant 0 : index
    %48 = vector.load %arg4[%c3, %c0_23, %c0_24] : memref<9x8x256xf32, #tpu.memory_space<vmem>>, vector<1x8x256xf32>
    %49 = vector.shape_cast %48 : vector<1x8x256xf32> to vector<8x256xf32>
    %50 = arith.mulf %47, %49 : vector<8x256xf32>
    %c0_i32_25 = arith.constant 0 : i32
    %51 = tpu.dynamic_rotate %25 by %c0_i32_25 dim 1 : vector<8x256xf32>, i32 -> vector<8x256xf32>
    %c4 = arith.constant 4 : index
    %c0_26 = arith.constant 0 : index
    %c0_27 = arith.constant 0 : index
    %52 = vector.load %arg4[%c4, %c0_26, %c0_27] : memref<9x8x256xf32, #tpu.memory_space<vmem>>, vector<1x8x256xf32>
    %53 = vector.shape_cast %52 : vector<1x8x256xf32> to vector<8x256xf32>
    %54 = arith.mulf %51, %53 : vector<8x256xf32>
    %c255_i32 = arith.constant 255 : i32
    %55 = tpu.dynamic_rotate %25 by %c255_i32 dim 1 : vector<8x256xf32>, i32 -> vector<8x256xf32>
    %c5 = arith.constant 5 : index
    %c0_28 = arith.constant 0 : index
    %c0_29 = arith.constant 0 : index
    %56 = vector.load %arg4[%c5, %c0_28, %c0_29] : memref<9x8x256xf32, #tpu.memory_space<vmem>>, vector<1x8x256xf32>
    %57 = vector.shape_cast %56 : vector<1x8x256xf32> to vector<8x256xf32>
    %58 = arith.mulf %55, %57 : vector<8x256xf32>
    %c241_i32 = arith.constant 241 : i32
    %59 = tpu.dynamic_rotate %25 by %c241_i32 dim 1 : vector<8x256xf32>, i32 -> vector<8x256xf32>
    %c6 = arith.constant 6 : index
    %c0_30 = arith.constant 0 : index
    %c0_31 = arith.constant 0 : index
    %60 = vector.load %arg4[%c6, %c0_30, %c0_31] : memref<9x8x256xf32, #tpu.memory_space<vmem>>, vector<1x8x256xf32>
    %61 = vector.shape_cast %60 : vector<1x8x256xf32> to vector<8x256xf32>
    %62 = arith.mulf %59, %61 : vector<8x256xf32>
    %c240_i32 = arith.constant 240 : i32
    %63 = tpu.dynamic_rotate %25 by %c240_i32 dim 1 : vector<8x256xf32>, i32 -> vector<8x256xf32>
    %c7 = arith.constant 7 : index
    %c0_32 = arith.constant 0 : index
    %c0_33 = arith.constant 0 : index
    %64 = vector.load %arg4[%c7, %c0_32, %c0_33] : memref<9x8x256xf32, #tpu.memory_space<vmem>>, vector<1x8x256xf32>
    %65 = vector.shape_cast %64 : vector<1x8x256xf32> to vector<8x256xf32>
    %66 = arith.mulf %63, %65 : vector<8x256xf32>
    %c239_i32 = arith.constant 239 : i32
    %67 = tpu.dynamic_rotate %25 by %c239_i32 dim 1 : vector<8x256xf32>, i32 -> vector<8x256xf32>
    %c8 = arith.constant 8 : index
    %c0_34 = arith.constant 0 : index
    %c0_35 = arith.constant 0 : index
    %68 = vector.load %arg4[%c8, %c0_34, %c0_35] : memref<9x8x256xf32, #tpu.memory_space<vmem>>, vector<1x8x256xf32>
    %69 = vector.shape_cast %68 : vector<1x8x256xf32> to vector<8x256xf32>
    %70 = arith.mulf %67, %69 : vector<8x256xf32>
    %71 = tpu.concatenate %38, %42, %46, %50, %54, %58, %62, %66, %70 in 0 : vector<8x256xf32>, vector<8x256xf32>, vector<8x256xf32>, vector<8x256xf32>, vector<8x256xf32>, vector<8x256xf32>, vector<8x256xf32>, vector<8x256xf32>, vector<8x256xf32> -> vector<72x256xf32>
    %72 = arith.truncf %71 : vector<72x256xf32> to vector<72x256xbf16>
    %c0_36 = arith.constant 0 : index
    %c0_37 = arith.constant 0 : index
    %73 = vector.load %arg7[%c0_36, %c0_37] : memref<72x256xbf16, #tpu.memory_space<vmem>>, vector<72x256xbf16>
    tpu.vector_store %arg7[%c0_36, %c0_37], %72 {strides = array<i32>} : memref<72x256xbf16, #tpu.memory_space<vmem>>, vector<72x256xbf16>,
    %c1_i32_38 = arith.constant 1 : i32
    %74 = arith.index_cast %c1_i32_38 : i32 to index
    %c0_39 = arith.constant 0 : index
    %c0_40 = arith.constant 0 : index
    %75 = vector.load %arg2[%74, %c0_39, %c0_40] : memref<8x32x256xf32, #tpu.memory_space<vmem>>, vector<1x32x256xf32>
    %76 = vector.shape_cast %75 : vector<1x32x256xf32> to vector<32x256xf32>
    %c0_41 = arith.constant 0 : index
    %c0_42 = arith.constant 0 : index
    %77 = vector.load %arg7[%c0_41, %c0_42] : memref<72x256xbf16, #tpu.memory_space<vmem>>, vector<72x256xbf16>
    %cst_43 = arith.constant dense<0.000000e+00> : vector<32x256xf32>
    %78 = tpu.matmul %3, %77, %cst_43 {dimension_numbers = #tpu.dot_dimension_numbers<[1], [0], [0], [1], [0, 0, 1, 1], [], []>} : vector<32x72xbf16>, vector<72x256xbf16>, vector<32x256xf32> -> vector<32x256xf32>
    %79 = arith.addf %76, %78 : vector<32x256xf32>
    %80 = arith.negf %79 : vector<32x256xf32>
    %81 = math.exp %80 : vector<32x256xf32>
    %cst_44 = arith.constant 1.000000e+00 : f32
    %82 = vector.broadcast %cst_44 : f32 to vector<32x256xf32>
    %83 = arith.addf %82, %81 : vector<32x256xf32>
    %84 = arith.divf %82, %83 : vector<32x256xf32>
    %85 = vector.extract_strided_slice %79 {offsets = [16, 0], sizes = [8, 256], strides = [1, 1]} : vector<32x256xf32> to vector<8x256xf32>
    %86 = math.tanh %85 : vector<8x256xf32>
    %87 = vector.extract_strided_slice %84 {offsets = [8, 0], sizes = [8, 256], strides = [1, 1]} : vector<32x256xf32> to vector<8x256xf32>
    %c0_45 = arith.constant 0 : index
    %c0_46 = arith.constant 0 : index
    %88 = vector.load %arg8[%c0_45, %c0_46] : memref<8x256xf32, #tpu.memory_space<vmem>>, vector<8x256xf32>
    %89 = arith.mulf %87, %88 : vector<8x256xf32>
    %90 = vector.extract_strided_slice %84 {offsets = [0, 0], sizes = [8, 256], strides = [1, 1]} : vector<32x256xf32> to vector<8x256xf32>
    %91 = arith.mulf %90, %86 : vector<8x256xf32>
    %92 = arith.addf %89, %91 : vector<8x256xf32>
    %93 = vector.extract_strided_slice %84 {offsets = [24, 0], sizes = [8, 256], strides = [1, 1]} : vector<32x256xf32> to vector<8x256xf32>
    %94 = math.tanh %92 : vector<8x256xf32>
    %95 = arith.mulf %93, %94 : vector<8x256xf32>
    %c0_47 = arith.constant 0 : index
    %c0_48 = arith.constant 0 : index
    %96 = vector.load %arg8[%c0_47, %c0_48] : memref<8x256xf32, #tpu.memory_space<vmem>>, vector<8x256xf32>
    tpu.vector_store %arg8[%c0_47, %c0_48], %92 {strides = array<i32>} : memref<8x256xf32, #tpu.memory_space<vmem>>, vector<8x256xf32>,
    %97 = arith.index_cast %c1_i32_38 : i32 to index
    %c0_49 = arith.constant 0 : index
    %c0_50 = arith.constant 0 : index
    %98 = vector.load %arg5[%97, %c0_49, %c0_50] : memref<8x8x256xf32, #tpu.memory_space<vmem>>, vector<1x8x256xf32>
    %99 = vector.shape_cast %98 : vector<1x8x256xf32> to vector<8x256xf32>
    %100 = vector.shape_cast %95 : vector<8x256xf32> to vector<1x8x256xf32>
    tpu.vector_store %arg5[%97, %c0_49, %c0_50], %100 {strides = array<i32>} : memref<8x8x256xf32, #tpu.memory_space<vmem>>, vector<1x8x256xf32>,
    %101 = arith.index_cast %c1_i32_38 : i32 to index
    %c0_51 = arith.constant 0 : index
    %c0_52 = arith.constant 0 : index
    %102 = vector.load %arg6[%101, %c0_51, %c0_52] : memref<8x8x256xf32, #tpu.memory_space<vmem>>, vector<1x8x256xf32>
    %103 = vector.shape_cast %102 : vector<1x8x256xf32> to vector<8x256xf32>
    %104 = vector.shape_cast %92 : vector<8x256xf32> to vector<1x8x256xf32>
    tpu.vector_store %arg6[%101, %c0_51, %c0_52], %104 {strides = array<i32>} : memref<8x8x256xf32, #tpu.memory_space<vmem>>, vector<1x8x256xf32>,
    %c17_i32_53 = arith.constant 17 : i32
    %105 = tpu.dynamic_rotate %95 by %c17_i32_53 dim 1 : vector<8x256xf32>, i32 -> vector<8x256xf32>
    %c0_54 = arith.constant 0 : index
    %c0_55 = arith.constant 0 : index
    %c0_56 = arith.constant 0 : index
    %106 = vector.load %arg4[%c0_54, %c0_55, %c0_56] : memref<9x8x256xf32, #tpu.memory_space<vmem>>, vector<1x8x256xf32>
    %107 = vector.shape_cast %106 : vector<1x8x256xf32> to vector<8x256xf32>
    %108 = arith.mulf %105, %107 : vector<8x256xf32>
    %c16_i32_57 = arith.constant 16 : i32
    %109 = tpu.dynamic_rotate %95 by %c16_i32_57 dim 1 : vector<8x256xf32>, i32 -> vector<8x256xf32>
    %c1_58 = arith.constant 1 : index
    %c0_59 = arith.constant 0 : index
    %c0_60 = arith.constant 0 : index
    %110 = vector.load %arg4[%c1_58, %c0_59, %c0_60] : memref<9x8x256xf32, #tpu.memory_space<vmem>>, vector<1x8x256xf32>
    %111 = vector.shape_cast %110 : vector<1x8x256xf32> to vector<8x256xf32>
    %112 = arith.mulf %109, %111 : vector<8x256xf32>
    %c15_i32_61 = arith.constant 15 : i32
    %113 = tpu.dynamic_rotate %95 by %c15_i32_61 dim 1 : vector<8x256xf32>, i32 -> vector<8x256xf32>
    %c2_62 = arith.constant 2 : index
    %c0_63 = arith.constant 0 : index
    %c0_64 = arith.constant 0 : index
    %114 = vector.load %arg4[%c2_62, %c0_63, %c0_64] : memref<9x8x256xf32, #tpu.memory_space<vmem>>, vector<1x8x256xf32>
    %115 = vector.shape_cast %114 : vector<1x8x256xf32> to vector<8x256xf32>
    %116 = arith.mulf %113, %115 : vector<8x256xf32>
    %c1_i32_65 = arith.constant 1 : i32
    %117 = tpu.dynamic_rotate %95 by %c1_i32_65 dim 1 : vector<8x256xf32>, i32 -> vector<8x256xf32>
    %c3_66 = arith.constant 3 : index
    %c0_67 = arith.constant 0 : index
    %c0_68 = arith.constant 0 : index
    %118 = vector.load %arg4[%c3_66, %c0_67, %c0_68] : memref<9x8x256xf32, #tpu.memory_space<vmem>>, vector<1x8x256xf32>
    %119 = vector.shape_cast %118 : vector<1x8x256xf32> to vector<8x256xf32>
    %120 = arith.mulf %117, %119 : vector<8x256xf32>
    %c0_i32_69 = arith.constant 0 : i32
    %121 = tpu.dynamic_rotate %95 by %c0_i32_69 dim 1 : vector<8x256xf32>, i32 -> vector<8x256xf32>
    %c4_70 = arith.constant 4 : index
    %c0_71 = arith.constant 0 : index
    %c0_72 = arith.constant 0 : index
    %122 = vector.load %arg4[%c4_70, %c0_71, %c0_72] : memref<9x8x256xf32, #tpu.memory_space<vmem>>, vector<1x8x256xf32>
    %123 = vector.shape_cast %122 : vector<1x8x256xf32> to vector<8x256xf32>
    %124 = arith.mulf %121, %123 : vector<8x256xf32>
    %c255_i32_73 = arith.constant 255 : i32
    %125 = tpu.dynamic_rotate %95 by %c255_i32_73 dim 1 : vector<8x256xf32>, i32 -> vector<8x256xf32>
    %c5_74 = arith.constant 5 : index
    %c0_75 = arith.constant 0 : index
    %c0_76 = arith.constant 0 : index
    %126 = vector.load %arg4[%c5_74, %c0_75, %c0_76] : memref<9x8x256xf32, #tpu.memory_space<vmem>>, vector<1x8x256xf32>
    %127 = vector.shape_cast %126 : vector<1x8x256xf32> to vector<8x256xf32>
    %128 = arith.mulf %125, %127 : vector<8x256xf32>
    %c241_i32_77 = arith.constant 241 : i32
    %129 = tpu.dynamic_rotate %95 by %c241_i32_77 dim 1 : vector<8x256xf32>, i32 -> vector<8x256xf32>
    %c6_78 = arith.constant 6 : index
    %c0_79 = arith.constant 0 : index
    %c0_80 = arith.constant 0 : index
    %130 = vector.load %arg4[%c6_78, %c0_79, %c0_80] : memref<9x8x256xf32, #tpu.memory_space<vmem>>, vector<1x8x256xf32>
    %131 = vector.shape_cast %130 : vector<1x8x256xf32> to vector<8x256xf32>
    %132 = arith.mulf %129, %131 : vector<8x256xf32>
    %c240_i32_81 = arith.constant 240 : i32
    %133 = tpu.dynamic_rotate %95 by %c240_i32_81 dim 1 : vector<8x256xf32>, i32 -> vector<8x256xf32>
    %c7_82 = arith.constant 7 : index
    %c0_83 = arith.constant 0 : index
    %c0_84 = arith.constant 0 : index
    %134 = vector.load %arg4[%c7_82, %c0_83, %c0_84] : memref<9x8x256xf32, #tpu.memory_space<vmem>>, vector<1x8x256xf32>
    %135 = vector.shape_cast %134 : vector<1x8x256xf32> to vector<8x256xf32>
    %136 = arith.mulf %133, %135 : vector<8x256xf32>
    %c239_i32_85 = arith.constant 239 : i32
    %137 = tpu.dynamic_rotate %95 by %c239_i32_85 dim 1 : vector<8x256xf32>, i32 -> vector<8x256xf32>
    %c8_86 = arith.constant 8 : index
    %c0_87 = arith.constant 0 : index
    %c0_88 = arith.constant 0 : index
    %138 = vector.load %arg4[%c8_86, %c0_87, %c0_88] : memref<9x8x256xf32, #tpu.memory_space<vmem>>, vector<1x8x256xf32>
    %139 = vector.shape_cast %138 : vector<1x8x256xf32> to vector<8x256xf32>
    %140 = arith.mulf %137, %139 : vector<8x256xf32>
    %141 = tpu.concatenate %108, %112, %116, %120, %124, %128, %132, %136, %140 in 0 : vector<8x256xf32>, vector<8x256xf32>, vector<8x256xf32>, vector<8x256xf32>, vector<8x256xf32>, vector<8x256xf32>, vector<8x256xf32>, vector<8x256xf32>, vector<8x256xf32> -> vector<72x256xf32>
    %142 = arith.truncf %141 : vector<72x256xf32> to vector<72x256xbf16>
    %c0_89 = arith.constant 0 : index
    %c0_90 = arith.constant 0 : index
    %143 = vector.load %arg7[%c0_89, %c0_90] : memref<72x256xbf16, #tpu.memory_space<vmem>>, vector<72x256xbf16>
    tpu.vector_store %arg7[%c0_89, %c0_90], %142 {strides = array<i32>} : memref<72x256xbf16, #tpu.memory_space<vmem>>, vector<72x256xbf16>,
    %c2_i32 = arith.constant 2 : i32
    %144 = arith.index_cast %c2_i32 : i32 to index
    %c0_91 = arith.constant 0 : index
    %c0_92 = arith.constant 0 : index
    %145 = vector.load %arg2[%144, %c0_91, %c0_92] : memref<8x32x256xf32, #tpu.memory_space<vmem>>, vector<1x32x256xf32>
    %146 = vector.shape_cast %145 : vector<1x32x256xf32> to vector<32x256xf32>
    %c0_93 = arith.constant 0 : index
    %c0_94 = arith.constant 0 : index
    %147 = vector.load %arg7[%c0_93, %c0_94] : memref<72x256xbf16, #tpu.memory_space<vmem>>, vector<72x256xbf16>
    %cst_95 = arith.constant dense<0.000000e+00> : vector<32x256xf32>
    %148 = tpu.matmul %3, %147, %cst_95 {dimension_numbers = #tpu.dot_dimension_numbers<[1], [0], [0], [1], [0, 0, 1, 1], [], []>} : vector<32x72xbf16>, vector<72x256xbf16>, vector<32x256xf32> -> vector<32x256xf32>
    %149 = arith.addf %146, %148 : vector<32x256xf32>
    %150 = arith.negf %149 : vector<32x256xf32>
    %151 = math.exp %150 : vector<32x256xf32>
    %cst_96 = arith.constant 1.000000e+00 : f32
    %152 = vector.broadcast %cst_96 : f32 to vector<32x256xf32>
    %153 = arith.addf %152, %151 : vector<32x256xf32>
    %154 = arith.divf %152, %153 : vector<32x256xf32>
    %155 = vector.extract_strided_slice %149 {offsets = [16, 0], sizes = [8, 256], strides = [1, 1]} : vector<32x256xf32> to vector<8x256xf32>
    %156 = math.tanh %155 : vector<8x256xf32>
    %157 = vector.extract_strided_slice %154 {offsets = [8, 0], sizes = [8, 256], strides = [1, 1]} : vector<32x256xf32> to vector<8x256xf32>
    %c0_97 = arith.constant 0 : index
    %c0_98 = arith.constant 0 : index
    %158 = vector.load %arg8[%c0_97, %c0_98] : memref<8x256xf32, #tpu.memory_space<vmem>>, vector<8x256xf32>
    %159 = arith.mulf %157, %158 : vector<8x256xf32>
    %160 = vector.extract_strided_slice %154 {offsets = [0, 0], sizes = [8, 256], strides = [1, 1]} : vector<32x256xf32> to vector<8x256xf32>
    %161 = arith.mulf %160, %156 : vector<8x256xf32>
    %162 = arith.addf %159, %161 : vector<8x256xf32>
    %163 = vector.extract_strided_slice %154 {offsets = [24, 0], sizes = [8, 256], strides = [1, 1]} : vector<32x256xf32> to vector<8x256xf32>
    %164 = math.tanh %162 : vector<8x256xf32>
    %165 = arith.mulf %163, %164 : vector<8x256xf32>
    %c0_99 = arith.constant 0 : index
    %c0_100 = arith.constant 0 : index
    %166 = vector.load %arg8[%c0_99, %c0_100] : memref<8x256xf32, #tpu.memory_space<vmem>>, vector<8x256xf32>
    tpu.vector_store %arg8[%c0_99, %c0_100], %162 {strides = array<i32>} : memref<8x256xf32, #tpu.memory_space<vmem>>, vector<8x256xf32>,
    %167 = arith.index_cast %c2_i32 : i32 to index
    %c0_101 = arith.constant 0 : index
    %c0_102 = arith.constant 0 : index
    %168 = vector.load %arg5[%167, %c0_101, %c0_102] : memref<8x8x256xf32, #tpu.memory_space<vmem>>, vector<1x8x256xf32>
    %169 = vector.shape_cast %168 : vector<1x8x256xf32> to vector<8x256xf32>
    %170 = vector.shape_cast %165 : vector<8x256xf32> to vector<1x8x256xf32>
    tpu.vector_store %arg5[%167, %c0_101, %c0_102], %170 {strides = array<i32>} : memref<8x8x256xf32, #tpu.memory_space<vmem>>, vector<1x8x256xf32>,
    %171 = arith.index_cast %c2_i32 : i32 to index
    %c0_103 = arith.constant 0 : index
    %c0_104 = arith.constant 0 : index
    %172 = vector.load %arg6[%171, %c0_103, %c0_104] : memref<8x8x256xf32, #tpu.memory_space<vmem>>, vector<1x8x256xf32>
    %173 = vector.shape_cast %172 : vector<1x8x256xf32> to vector<8x256xf32>
    %174 = vector.shape_cast %162 : vector<8x256xf32> to vector<1x8x256xf32>
    tpu.vector_store %arg6[%171, %c0_103, %c0_104], %174 {strides = array<i32>} : memref<8x8x256xf32, #tpu.memory_space<vmem>>, vector<1x8x256xf32>,
    %c17_i32_105 = arith.constant 17 : i32
    %175 = tpu.dynamic_rotate %165 by %c17_i32_105 dim 1 : vector<8x256xf32>, i32 -> vector<8x256xf32>
    %c0_106 = arith.constant 0 : index
    %c0_107 = arith.constant 0 : index
    %c0_108 = arith.constant 0 : index
    %176 = vector.load %arg4[%c0_106, %c0_107, %c0_108] : memref<9x8x256xf32, #tpu.memory_space<vmem>>, vector<1x8x256xf32>
    %177 = vector.shape_cast %176 : vector<1x8x256xf32> to vector<8x256xf32>
    %178 = arith.mulf %175, %177 : vector<8x256xf32>
    %c16_i32_109 = arith.constant 16 : i32
    %179 = tpu.dynamic_rotate %165 by %c16_i32_109 dim 1 : vector<8x256xf32>, i32 -> vector<8x256xf32>
    %c1_110 = arith.constant 1 : index
    %c0_111 = arith.constant 0 : index
    %c0_112 = arith.constant 0 : index
    %180 = vector.load %arg4[%c1_110, %c0_111, %c0_112] : memref<9x8x256xf32, #tpu.memory_space<vmem>>, vector<1x8x256xf32>
    %181 = vector.shape_cast %180 : vector<1x8x256xf32> to vector<8x256xf32>
    %182 = arith.mulf %179, %181 : vector<8x256xf32>
    %c15_i32_113 = arith.constant 15 : i32
    %183 = tpu.dynamic_rotate %165 by %c15_i32_113 dim 1 : vector<8x256xf32>, i32 -> vector<8x256xf32>
    %c2_114 = arith.constant 2 : index
    %c0_115 = arith.constant 0 : index
    %c0_116 = arith.constant 0 : index
    %184 = vector.load %arg4[%c2_114, %c0_115, %c0_116] : memref<9x8x256xf32, #tpu.memory_space<vmem>>, vector<1x8x256xf32>
    %185 = vector.shape_cast %184 : vector<1x8x256xf32> to vector<8x256xf32>
    %186 = arith.mulf %183, %185 : vector<8x256xf32>
    %c1_i32_117 = arith.constant 1 : i32
    %187 = tpu.dynamic_rotate %165 by %c1_i32_117 dim 1 : vector<8x256xf32>, i32 -> vector<8x256xf32>
    %c3_118 = arith.constant 3 : index
    %c0_119 = arith.constant 0 : index
    %c0_120 = arith.constant 0 : index
    %188 = vector.load %arg4[%c3_118, %c0_119, %c0_120] : memref<9x8x256xf32, #tpu.memory_space<vmem>>, vector<1x8x256xf32>
    %189 = vector.shape_cast %188 : vector<1x8x256xf32> to vector<8x256xf32>
    %190 = arith.mulf %187, %189 : vector<8x256xf32>
    %c0_i32_121 = arith.constant 0 : i32
    %191 = tpu.dynamic_rotate %165 by %c0_i32_121 dim 1 : vector<8x256xf32>, i32 -> vector<8x256xf32>
    %c4_122 = arith.constant 4 : index
    %c0_123 = arith.constant 0 : index
    %c0_124 = arith.constant 0 : index
    %192 = vector.load %arg4[%c4_122, %c0_123, %c0_124] : memref<9x8x256xf32, #tpu.memory_space<vmem>>, vector<1x8x256xf32>
    %193 = vector.shape_cast %192 : vector<1x8x256xf32> to vector<8x256xf32>
    %194 = arith.mulf %191, %193 : vector<8x256xf32>
    %c255_i32_125 = arith.constant 255 : i32
    %195 = tpu.dynamic_rotate %165 by %c255_i32_125 dim 1 : vector<8x256xf32>, i32 -> vector<8x256xf32>
    %c5_126 = arith.constant 5 : index
    %c0_127 = arith.constant 0 : index
    %c0_128 = arith.constant 0 : index
    %196 = vector.load %arg4[%c5_126, %c0_127, %c0_128] : memref<9x8x256xf32, #tpu.memory_space<vmem>>, vector<1x8x256xf32>
    %197 = vector.shape_cast %196 : vector<1x8x256xf32> to vector<8x256xf32>
    %198 = arith.mulf %195, %197 : vector<8x256xf32>
    %c241_i32_129 = arith.constant 241 : i32
    %199 = tpu.dynamic_rotate %165 by %c241_i32_129 dim 1 : vector<8x256xf32>, i32 -> vector<8x256xf32>
    %c6_130 = arith.constant 6 : index
    %c0_131 = arith.constant 0 : index
    %c0_132 = arith.constant 0 : index
    %200 = vector.load %arg4[%c6_130, %c0_131, %c0_132] : memref<9x8x256xf32, #tpu.memory_space<vmem>>, vector<1x8x256xf32>
    %201 = vector.shape_cast %200 : vector<1x8x256xf32> to vector<8x256xf32>
    %202 = arith.mulf %199, %201 : vector<8x256xf32>
    %c240_i32_133 = arith.constant 240 : i32
    %203 = tpu.dynamic_rotate %165 by %c240_i32_133 dim 1 : vector<8x256xf32>, i32 -> vector<8x256xf32>
    %c7_134 = arith.constant 7 : index
    %c0_135 = arith.constant 0 : index
    %c0_136 = arith.constant 0 : index
    %204 = vector.load %arg4[%c7_134, %c0_135, %c0_136] : memref<9x8x256xf32, #tpu.memory_space<vmem>>, vector<1x8x256xf32>
    %205 = vector.shape_cast %204 : vector<1x8x256xf32> to vector<8x256xf32>
    %206 = arith.mulf %203, %205 : vector<8x256xf32>
    %c239_i32_137 = arith.constant 239 : i32
    %207 = tpu.dynamic_rotate %165 by %c239_i32_137 dim 1 : vector<8x256xf32>, i32 -> vector<8x256xf32>
    %c8_138 = arith.constant 8 : index
    %c0_139 = arith.constant 0 : index
    %c0_140 = arith.constant 0 : index
    %208 = vector.load %arg4[%c8_138, %c0_139, %c0_140] : memref<9x8x256xf32, #tpu.memory_space<vmem>>, vector<1x8x256xf32>
    %209 = vector.shape_cast %208 : vector<1x8x256xf32> to vector<8x256xf32>
    %210 = arith.mulf %207, %209 : vector<8x256xf32>
    %211 = tpu.concatenate %178, %182, %186, %190, %194, %198, %202, %206, %210 in 0 : vector<8x256xf32>, vector<8x256xf32>, vector<8x256xf32>, vector<8x256xf32>, vector<8x256xf32>, vector<8x256xf32>, vector<8x256xf32>, vector<8x256xf32>, vector<8x256xf32> -> vector<72x256xf32>
    %212 = arith.truncf %211 : vector<72x256xf32> to vector<72x256xbf16>
    %c0_141 = arith.constant 0 : index
    %c0_142 = arith.constant 0 : index
    %213 = vector.load %arg7[%c0_141, %c0_142] : memref<72x256xbf16, #tpu.memory_space<vmem>>, vector<72x256xbf16>
    tpu.vector_store %arg7[%c0_141, %c0_142], %212 {strides = array<i32>} : memref<72x256xbf16, #tpu.memory_space<vmem>>, vector<72x256xbf16>,
    %c3_i32 = arith.constant 3 : i32
    %214 = arith.index_cast %c3_i32 : i32 to index
    %c0_143 = arith.constant 0 : index
    %c0_144 = arith.constant 0 : index
    %215 = vector.load %arg2[%214, %c0_143, %c0_144] : memref<8x32x256xf32, #tpu.memory_space<vmem>>, vector<1x32x256xf32>
    %216 = vector.shape_cast %215 : vector<1x32x256xf32> to vector<32x256xf32>
    %c0_145 = arith.constant 0 : index
    %c0_146 = arith.constant 0 : index
    %217 = vector.load %arg7[%c0_145, %c0_146] : memref<72x256xbf16, #tpu.memory_space<vmem>>, vector<72x256xbf16>
    %cst_147 = arith.constant dense<0.000000e+00> : vector<32x256xf32>
    %218 = tpu.matmul %3, %217, %cst_147 {dimension_numbers = #tpu.dot_dimension_numbers<[1], [0], [0], [1], [0, 0, 1, 1], [], []>} : vector<32x72xbf16>, vector<72x256xbf16>, vector<32x256xf32> -> vector<32x256xf32>
    %219 = arith.addf %216, %218 : vector<32x256xf32>
    %220 = arith.negf %219 : vector<32x256xf32>
    %221 = math.exp %220 : vector<32x256xf32>
    %cst_148 = arith.constant 1.000000e+00 : f32
    %222 = vector.broadcast %cst_148 : f32 to vector<32x256xf32>
    %223 = arith.addf %222, %221 : vector<32x256xf32>
    %224 = arith.divf %222, %223 : vector<32x256xf32>
    %225 = vector.extract_strided_slice %219 {offsets = [16, 0], sizes = [8, 256], strides = [1, 1]} : vector<32x256xf32> to vector<8x256xf32>
    %226 = math.tanh %225 : vector<8x256xf32>
    %227 = vector.extract_strided_slice %224 {offsets = [8, 0], sizes = [8, 256], strides = [1, 1]} : vector<32x256xf32> to vector<8x256xf32>
    %c0_149 = arith.constant 0 : index
    %c0_150 = arith.constant 0 : index
    %228 = vector.load %arg8[%c0_149, %c0_150] : memref<8x256xf32, #tpu.memory_space<vmem>>, vector<8x256xf32>
    %229 = arith.mulf %227, %228 : vector<8x256xf32>
    %230 = vector.extract_strided_slice %224 {offsets = [0, 0], sizes = [8, 256], strides = [1, 1]} : vector<32x256xf32> to vector<8x256xf32>
    %231 = arith.mulf %230, %226 : vector<8x256xf32>
    %232 = arith.addf %229, %231 : vector<8x256xf32>
    %233 = vector.extract_strided_slice %224 {offsets = [24, 0], sizes = [8, 256], strides = [1, 1]} : vector<32x256xf32> to vector<8x256xf32>
    %234 = math.tanh %232 : vector<8x256xf32>
    %235 = arith.mulf %233, %234 : vector<8x256xf32>
    %c0_151 = arith.constant 0 : index
    %c0_152 = arith.constant 0 : index
    %236 = vector.load %arg8[%c0_151, %c0_152] : memref<8x256xf32, #tpu.memory_space<vmem>>, vector<8x256xf32>
    tpu.vector_store %arg8[%c0_151, %c0_152], %232 {strides = array<i32>} : memref<8x256xf32, #tpu.memory_space<vmem>>, vector<8x256xf32>,
    %237 = arith.index_cast %c3_i32 : i32 to index
    %c0_153 = arith.constant 0 : index
    %c0_154 = arith.constant 0 : index
    %238 = vector.load %arg5[%237, %c0_153, %c0_154] : memref<8x8x256xf32, #tpu.memory_space<vmem>>, vector<1x8x256xf32>
    %239 = vector.shape_cast %238 : vector<1x8x256xf32> to vector<8x256xf32>
    %240 = vector.shape_cast %235 : vector<8x256xf32> to vector<1x8x256xf32>
    tpu.vector_store %arg5[%237, %c0_153, %c0_154], %240 {strides = array<i32>} : memref<8x8x256xf32, #tpu.memory_space<vmem>>, vector<1x8x256xf32>,
    %241 = arith.index_cast %c3_i32 : i32 to index
    %c0_155 = arith.constant 0 : index
    %c0_156 = arith.constant 0 : index
    %242 = vector.load %arg6[%241, %c0_155, %c0_156] : memref<8x8x256xf32, #tpu.memory_space<vmem>>, vector<1x8x256xf32>
    %243 = vector.shape_cast %242 : vector<1x8x256xf32> to vector<8x256xf32>
    %244 = vector.shape_cast %232 : vector<8x256xf32> to vector<1x8x256xf32>
    tpu.vector_store %arg6[%241, %c0_155, %c0_156], %244 {strides = array<i32>} : memref<8x8x256xf32, #tpu.memory_space<vmem>>, vector<1x8x256xf32>,
    %c17_i32_157 = arith.constant 17 : i32
    %245 = tpu.dynamic_rotate %235 by %c17_i32_157 dim 1 : vector<8x256xf32>, i32 -> vector<8x256xf32>
    %c0_158 = arith.constant 0 : index
    %c0_159 = arith.constant 0 : index
    %c0_160 = arith.constant 0 : index
    %246 = vector.load %arg4[%c0_158, %c0_159, %c0_160] : memref<9x8x256xf32, #tpu.memory_space<vmem>>, vector<1x8x256xf32>
    %247 = vector.shape_cast %246 : vector<1x8x256xf32> to vector<8x256xf32>
    %248 = arith.mulf %245, %247 : vector<8x256xf32>
    %c16_i32_161 = arith.constant 16 : i32
    %249 = tpu.dynamic_rotate %235 by %c16_i32_161 dim 1 : vector<8x256xf32>, i32 -> vector<8x256xf32>
    %c1_162 = arith.constant 1 : index
    %c0_163 = arith.constant 0 : index
    %c0_164 = arith.constant 0 : index
    %250 = vector.load %arg4[%c1_162, %c0_163, %c0_164] : memref<9x8x256xf32, #tpu.memory_space<vmem>>, vector<1x8x256xf32>
    %251 = vector.shape_cast %250 : vector<1x8x256xf32> to vector<8x256xf32>
    %252 = arith.mulf %249, %251 : vector<8x256xf32>
    %c15_i32_165 = arith.constant 15 : i32
    %253 = tpu.dynamic_rotate %235 by %c15_i32_165 dim 1 : vector<8x256xf32>, i32 -> vector<8x256xf32>
    %c2_166 = arith.constant 2 : index
    %c0_167 = arith.constant 0 : index
    %c0_168 = arith.constant 0 : index
    %254 = vector.load %arg4[%c2_166, %c0_167, %c0_168] : memref<9x8x256xf32, #tpu.memory_space<vmem>>, vector<1x8x256xf32>
    %255 = vector.shape_cast %254 : vector<1x8x256xf32> to vector<8x256xf32>
    %256 = arith.mulf %253, %255 : vector<8x256xf32>
    %c1_i32_169 = arith.constant 1 : i32
    %257 = tpu.dynamic_rotate %235 by %c1_i32_169 dim 1 : vector<8x256xf32>, i32 -> vector<8x256xf32>
    %c3_170 = arith.constant 3 : index
    %c0_171 = arith.constant 0 : index
    %c0_172 = arith.constant 0 : index
    %258 = vector.load %arg4[%c3_170, %c0_171, %c0_172] : memref<9x8x256xf32, #tpu.memory_space<vmem>>, vector<1x8x256xf32>
    %259 = vector.shape_cast %258 : vector<1x8x256xf32> to vector<8x256xf32>
    %260 = arith.mulf %257, %259 : vector<8x256xf32>
    %c0_i32_173 = arith.constant 0 : i32
    %261 = tpu.dynamic_rotate %235 by %c0_i32_173 dim 1 : vector<8x256xf32>, i32 -> vector<8x256xf32>
    %c4_174 = arith.constant 4 : index
    %c0_175 = arith.constant 0 : index
    %c0_176 = arith.constant 0 : index
    %262 = vector.load %arg4[%c4_174, %c0_175, %c0_176] : memref<9x8x256xf32, #tpu.memory_space<vmem>>, vector<1x8x256xf32>
    %263 = vector.shape_cast %262 : vector<1x8x256xf32> to vector<8x256xf32>
    %264 = arith.mulf %261, %263 : vector<8x256xf32>
    %c255_i32_177 = arith.constant 255 : i32
    %265 = tpu.dynamic_rotate %235 by %c255_i32_177 dim 1 : vector<8x256xf32>, i32 -> vector<8x256xf32>
    %c5_178 = arith.constant 5 : index
    %c0_179 = arith.constant 0 : index
    %c0_180 = arith.constant 0 : index
    %266 = vector.load %arg4[%c5_178, %c0_179, %c0_180] : memref<9x8x256xf32, #tpu.memory_space<vmem>>, vector<1x8x256xf32>
    %267 = vector.shape_cast %266 : vector<1x8x256xf32> to vector<8x256xf32>
    %268 = arith.mulf %265, %267 : vector<8x256xf32>
    %c241_i32_181 = arith.constant 241 : i32
    %269 = tpu.dynamic_rotate %235 by %c241_i32_181 dim 1 : vector<8x256xf32>, i32 -> vector<8x256xf32>
    %c6_182 = arith.constant 6 : index
    %c0_183 = arith.constant 0 : index
    %c0_184 = arith.constant 0 : index
    %270 = vector.load %arg4[%c6_182, %c0_183, %c0_184] : memref<9x8x256xf32, #tpu.memory_space<vmem>>, vector<1x8x256xf32>
    %271 = vector.shape_cast %270 : vector<1x8x256xf32> to vector<8x256xf32>
    %272 = arith.mulf %269, %271 : vector<8x256xf32>
    %c240_i32_185 = arith.constant 240 : i32
    %273 = tpu.dynamic_rotate %235 by %c240_i32_185 dim 1 : vector<8x256xf32>, i32 -> vector<8x256xf32>
    %c7_186 = arith.constant 7 : index
    %c0_187 = arith.constant 0 : index
    %c0_188 = arith.constant 0 : index
    %274 = vector.load %arg4[%c7_186, %c0_187, %c0_188] : memref<9x8x256xf32, #tpu.memory_space<vmem>>, vector<1x8x256xf32>
    %275 = vector.shape_cast %274 : vector<1x8x256xf32> to vector<8x256xf32>
    %276 = arith.mulf %273, %275 : vector<8x256xf32>
    %c239_i32_189 = arith.constant 239 : i32
    %277 = tpu.dynamic_rotate %235 by %c239_i32_189 dim 1 : vector<8x256xf32>, i32 -> vector<8x256xf32>
    %c8_190 = arith.constant 8 : index
    %c0_191 = arith.constant 0 : index
    %c0_192 = arith.constant 0 : index
    %278 = vector.load %arg4[%c8_190, %c0_191, %c0_192] : memref<9x8x256xf32, #tpu.memory_space<vmem>>, vector<1x8x256xf32>
    %279 = vector.shape_cast %278 : vector<1x8x256xf32> to vector<8x256xf32>
    %280 = arith.mulf %277, %279 : vector<8x256xf32>
    %281 = tpu.concatenate %248, %252, %256, %260, %264, %268, %272, %276, %280 in 0 : vector<8x256xf32>, vector<8x256xf32>, vector<8x256xf32>, vector<8x256xf32>, vector<8x256xf32>, vector<8x256xf32>, vector<8x256xf32>, vector<8x256xf32>, vector<8x256xf32> -> vector<72x256xf32>
    %282 = arith.truncf %281 : vector<72x256xf32> to vector<72x256xbf16>
    %c0_193 = arith.constant 0 : index
    %c0_194 = arith.constant 0 : index
    %283 = vector.load %arg7[%c0_193, %c0_194] : memref<72x256xbf16, #tpu.memory_space<vmem>>, vector<72x256xbf16>
    tpu.vector_store %arg7[%c0_193, %c0_194], %282 {strides = array<i32>} : memref<72x256xbf16, #tpu.memory_space<vmem>>, vector<72x256xbf16>,
    %c4_i32 = arith.constant 4 : i32
    %284 = arith.index_cast %c4_i32 : i32 to index
    %c0_195 = arith.constant 0 : index
    %c0_196 = arith.constant 0 : index
    %285 = vector.load %arg2[%284, %c0_195, %c0_196] : memref<8x32x256xf32, #tpu.memory_space<vmem>>, vector<1x32x256xf32>
    %286 = vector.shape_cast %285 : vector<1x32x256xf32> to vector<32x256xf32>
    %c0_197 = arith.constant 0 : index
    %c0_198 = arith.constant 0 : index
    %287 = vector.load %arg7[%c0_197, %c0_198] : memref<72x256xbf16, #tpu.memory_space<vmem>>, vector<72x256xbf16>
    %cst_199 = arith.constant dense<0.000000e+00> : vector<32x256xf32>
    %288 = tpu.matmul %3, %287, %cst_199 {dimension_numbers = #tpu.dot_dimension_numbers<[1], [0], [0], [1], [0, 0, 1, 1], [], []>} : vector<32x72xbf16>, vector<72x256xbf16>, vector<32x256xf32> -> vector<32x256xf32>
    %289 = arith.addf %286, %288 : vector<32x256xf32>
    %290 = arith.negf %289 : vector<32x256xf32>
    %291 = math.exp %290 : vector<32x256xf32>
    %cst_200 = arith.constant 1.000000e+00 : f32
    %292 = vector.broadcast %cst_200 : f32 to vector<32x256xf32>
    %293 = arith.addf %292, %291 : vector<32x256xf32>
    %294 = arith.divf %292, %293 : vector<32x256xf32>
    %295 = vector.extract_strided_slice %289 {offsets = [16, 0], sizes = [8, 256], strides = [1, 1]} : vector<32x256xf32> to vector<8x256xf32>
    %296 = math.tanh %295 : vector<8x256xf32>
    %297 = vector.extract_strided_slice %294 {offsets = [8, 0], sizes = [8, 256], strides = [1, 1]} : vector<32x256xf32> to vector<8x256xf32>
    %c0_201 = arith.constant 0 : index
    %c0_202 = arith.constant 0 : index
    %298 = vector.load %arg8[%c0_201, %c0_202] : memref<8x256xf32, #tpu.memory_space<vmem>>, vector<8x256xf32>
    %299 = arith.mulf %297, %298 : vector<8x256xf32>
    %300 = vector.extract_strided_slice %294 {offsets = [0, 0], sizes = [8, 256], strides = [1, 1]} : vector<32x256xf32> to vector<8x256xf32>
    %301 = arith.mulf %300, %296 : vector<8x256xf32>
    %302 = arith.addf %299, %301 : vector<8x256xf32>
    %303 = vector.extract_strided_slice %294 {offsets = [24, 0], sizes = [8, 256], strides = [1, 1]} : vector<32x256xf32> to vector<8x256xf32>
    %304 = math.tanh %302 : vector<8x256xf32>
    %305 = arith.mulf %303, %304 : vector<8x256xf32>
    %c0_203 = arith.constant 0 : index
    %c0_204 = arith.constant 0 : index
    %306 = vector.load %arg8[%c0_203, %c0_204] : memref<8x256xf32, #tpu.memory_space<vmem>>, vector<8x256xf32>
    tpu.vector_store %arg8[%c0_203, %c0_204], %302 {strides = array<i32>} : memref<8x256xf32, #tpu.memory_space<vmem>>, vector<8x256xf32>,
    %307 = arith.index_cast %c4_i32 : i32 to index
    %c0_205 = arith.constant 0 : index
    %c0_206 = arith.constant 0 : index
    %308 = vector.load %arg5[%307, %c0_205, %c0_206] : memref<8x8x256xf32, #tpu.memory_space<vmem>>, vector<1x8x256xf32>
    %309 = vector.shape_cast %308 : vector<1x8x256xf32> to vector<8x256xf32>
    %310 = vector.shape_cast %305 : vector<8x256xf32> to vector<1x8x256xf32>
    tpu.vector_store %arg5[%307, %c0_205, %c0_206], %310 {strides = array<i32>} : memref<8x8x256xf32, #tpu.memory_space<vmem>>, vector<1x8x256xf32>,
    %311 = arith.index_cast %c4_i32 : i32 to index
    %c0_207 = arith.constant 0 : index
    %c0_208 = arith.constant 0 : index
    %312 = vector.load %arg6[%311, %c0_207, %c0_208] : memref<8x8x256xf32, #tpu.memory_space<vmem>>, vector<1x8x256xf32>
    %313 = vector.shape_cast %312 : vector<1x8x256xf32> to vector<8x256xf32>
    %314 = vector.shape_cast %302 : vector<8x256xf32> to vector<1x8x256xf32>
    tpu.vector_store %arg6[%311, %c0_207, %c0_208], %314 {strides = array<i32>} : memref<8x8x256xf32, #tpu.memory_space<vmem>>, vector<1x8x256xf32>,
    %c17_i32_209 = arith.constant 17 : i32
    %315 = tpu.dynamic_rotate %305 by %c17_i32_209 dim 1 : vector<8x256xf32>, i32 -> vector<8x256xf32>
    %c0_210 = arith.constant 0 : index
    %c0_211 = arith.constant 0 : index
    %c0_212 = arith.constant 0 : index
    %316 = vector.load %arg4[%c0_210, %c0_211, %c0_212] : memref<9x8x256xf32, #tpu.memory_space<vmem>>, vector<1x8x256xf32>
    %317 = vector.shape_cast %316 : vector<1x8x256xf32> to vector<8x256xf32>
    %318 = arith.mulf %315, %317 : vector<8x256xf32>
    %c16_i32_213 = arith.constant 16 : i32
    %319 = tpu.dynamic_rotate %305 by %c16_i32_213 dim 1 : vector<8x256xf32>, i32 -> vector<8x256xf32>
    %c1_214 = arith.constant 1 : index
    %c0_215 = arith.constant 0 : index
    %c0_216 = arith.constant 0 : index
    %320 = vector.load %arg4[%c1_214, %c0_215, %c0_216] : memref<9x8x256xf32, #tpu.memory_space<vmem>>, vector<1x8x256xf32>
    %321 = vector.shape_cast %320 : vector<1x8x256xf32> to vector<8x256xf32>
    %322 = arith.mulf %319, %321 : vector<8x256xf32>
    %c15_i32_217 = arith.constant 15 : i32
    %323 = tpu.dynamic_rotate %305 by %c15_i32_217 dim 1 : vector<8x256xf32>, i32 -> vector<8x256xf32>
    %c2_218 = arith.constant 2 : index
    %c0_219 = arith.constant 0 : index
    %c0_220 = arith.constant 0 : index
    %324 = vector.load %arg4[%c2_218, %c0_219, %c0_220] : memref<9x8x256xf32, #tpu.memory_space<vmem>>, vector<1x8x256xf32>
    %325 = vector.shape_cast %324 : vector<1x8x256xf32> to vector<8x256xf32>
    %326 = arith.mulf %323, %325 : vector<8x256xf32>
    %c1_i32_221 = arith.constant 1 : i32
    %327 = tpu.dynamic_rotate %305 by %c1_i32_221 dim 1 : vector<8x256xf32>, i32 -> vector<8x256xf32>
    %c3_222 = arith.constant 3 : index
    %c0_223 = arith.constant 0 : index
    %c0_224 = arith.constant 0 : index
    %328 = vector.load %arg4[%c3_222, %c0_223, %c0_224] : memref<9x8x256xf32, #tpu.memory_space<vmem>>, vector<1x8x256xf32>
    %329 = vector.shape_cast %328 : vector<1x8x256xf32> to vector<8x256xf32>
    %330 = arith.mulf %327, %329 : vector<8x256xf32>
    %c0_i32_225 = arith.constant 0 : i32
    %331 = tpu.dynamic_rotate %305 by %c0_i32_225 dim 1 : vector<8x256xf32>, i32 -> vector<8x256xf32>
    %c4_226 = arith.constant 4 : index
    %c0_227 = arith.constant 0 : index
    %c0_228 = arith.constant 0 : index
    %332 = vector.load %arg4[%c4_226, %c0_227, %c0_228] : memref<9x8x256xf32, #tpu.memory_space<vmem>>, vector<1x8x256xf32>
    %333 = vector.shape_cast %332 : vector<1x8x256xf32> to vector<8x256xf32>
    %334 = arith.mulf %331, %333 : vector<8x256xf32>
    %c255_i32_229 = arith.constant 255 : i32
    %335 = tpu.dynamic_rotate %305 by %c255_i32_229 dim 1 : vector<8x256xf32>, i32 -> vector<8x256xf32>
    %c5_230 = arith.constant 5 : index
    %c0_231 = arith.constant 0 : index
    %c0_232 = arith.constant 0 : index
    %336 = vector.load %arg4[%c5_230, %c0_231, %c0_232] : memref<9x8x256xf32, #tpu.memory_space<vmem>>, vector<1x8x256xf32>
    %337 = vector.shape_cast %336 : vector<1x8x256xf32> to vector<8x256xf32>
    %338 = arith.mulf %335, %337 : vector<8x256xf32>
    %c241_i32_233 = arith.constant 241 : i32
    %339 = tpu.dynamic_rotate %305 by %c241_i32_233 dim 1 : vector<8x256xf32>, i32 -> vector<8x256xf32>
    %c6_234 = arith.constant 6 : index
    %c0_235 = arith.constant 0 : index
    %c0_236 = arith.constant 0 : index
    %340 = vector.load %arg4[%c6_234, %c0_235, %c0_236] : memref<9x8x256xf32, #tpu.memory_space<vmem>>, vector<1x8x256xf32>
    %341 = vector.shape_cast %340 : vector<1x8x256xf32> to vector<8x256xf32>
    %342 = arith.mulf %339, %341 : vector<8x256xf32>
    %c240_i32_237 = arith.constant 240 : i32
    %343 = tpu.dynamic_rotate %305 by %c240_i32_237 dim 1 : vector<8x256xf32>, i32 -> vector<8x256xf32>
    %c7_238 = arith.constant 7 : index
    %c0_239 = arith.constant 0 : index
    %c0_240 = arith.constant 0 : index
    %344 = vector.load %arg4[%c7_238, %c0_239, %c0_240] : memref<9x8x256xf32, #tpu.memory_space<vmem>>, vector<1x8x256xf32>
    %345 = vector.shape_cast %344 : vector<1x8x256xf32> to vector<8x256xf32>
    %346 = arith.mulf %343, %345 : vector<8x256xf32>
    %c239_i32_241 = arith.constant 239 : i32
    %347 = tpu.dynamic_rotate %305 by %c239_i32_241 dim 1 : vector<8x256xf32>, i32 -> vector<8x256xf32>
    %c8_242 = arith.constant 8 : index
    %c0_243 = arith.constant 0 : index
    %c0_244 = arith.constant 0 : index
    %348 = vector.load %arg4[%c8_242, %c0_243, %c0_244] : memref<9x8x256xf32, #tpu.memory_space<vmem>>, vector<1x8x256xf32>
    %349 = vector.shape_cast %348 : vector<1x8x256xf32> to vector<8x256xf32>
    %350 = arith.mulf %347, %349 : vector<8x256xf32>
    %351 = tpu.concatenate %318, %322, %326, %330, %334, %338, %342, %346, %350 in 0 : vector<8x256xf32>, vector<8x256xf32>, vector<8x256xf32>, vector<8x256xf32>, vector<8x256xf32>, vector<8x256xf32>, vector<8x256xf32>, vector<8x256xf32>, vector<8x256xf32> -> vector<72x256xf32>
    %352 = arith.truncf %351 : vector<72x256xf32> to vector<72x256xbf16>
    %c0_245 = arith.constant 0 : index
    %c0_246 = arith.constant 0 : index
    %353 = vector.load %arg7[%c0_245, %c0_246] : memref<72x256xbf16, #tpu.memory_space<vmem>>, vector<72x256xbf16>
    tpu.vector_store %arg7[%c0_245, %c0_246], %352 {strides = array<i32>} : memref<72x256xbf16, #tpu.memory_space<vmem>>, vector<72x256xbf16>,
    %c5_i32 = arith.constant 5 : i32
    %354 = arith.index_cast %c5_i32 : i32 to index
    %c0_247 = arith.constant 0 : index
    %c0_248 = arith.constant 0 : index
    %355 = vector.load %arg2[%354, %c0_247, %c0_248] : memref<8x32x256xf32, #tpu.memory_space<vmem>>, vector<1x32x256xf32>
    %356 = vector.shape_cast %355 : vector<1x32x256xf32> to vector<32x256xf32>
    %c0_249 = arith.constant 0 : index
    %c0_250 = arith.constant 0 : index
    %357 = vector.load %arg7[%c0_249, %c0_250] : memref<72x256xbf16, #tpu.memory_space<vmem>>, vector<72x256xbf16>
    %cst_251 = arith.constant dense<0.000000e+00> : vector<32x256xf32>
    %358 = tpu.matmul %3, %357, %cst_251 {dimension_numbers = #tpu.dot_dimension_numbers<[1], [0], [0], [1], [0, 0, 1, 1], [], []>} : vector<32x72xbf16>, vector<72x256xbf16>, vector<32x256xf32> -> vector<32x256xf32>
    %359 = arith.addf %356, %358 : vector<32x256xf32>
    %360 = arith.negf %359 : vector<32x256xf32>
    %361 = math.exp %360 : vector<32x256xf32>
    %cst_252 = arith.constant 1.000000e+00 : f32
    %362 = vector.broadcast %cst_252 : f32 to vector<32x256xf32>
    %363 = arith.addf %362, %361 : vector<32x256xf32>
    %364 = arith.divf %362, %363 : vector<32x256xf32>
    %365 = vector.extract_strided_slice %359 {offsets = [16, 0], sizes = [8, 256], strides = [1, 1]} : vector<32x256xf32> to vector<8x256xf32>
    %366 = math.tanh %365 : vector<8x256xf32>
    %367 = vector.extract_strided_slice %364 {offsets = [8, 0], sizes = [8, 256], strides = [1, 1]} : vector<32x256xf32> to vector<8x256xf32>
    %c0_253 = arith.constant 0 : index
    %c0_254 = arith.constant 0 : index
    %368 = vector.load %arg8[%c0_253, %c0_254] : memref<8x256xf32, #tpu.memory_space<vmem>>, vector<8x256xf32>
    %369 = arith.mulf %367, %368 : vector<8x256xf32>
    %370 = vector.extract_strided_slice %364 {offsets = [0, 0], sizes = [8, 256], strides = [1, 1]} : vector<32x256xf32> to vector<8x256xf32>
    %371 = arith.mulf %370, %366 : vector<8x256xf32>
    %372 = arith.addf %369, %371 : vector<8x256xf32>
    %373 = vector.extract_strided_slice %364 {offsets = [24, 0], sizes = [8, 256], strides = [1, 1]} : vector<32x256xf32> to vector<8x256xf32>
    %374 = math.tanh %372 : vector<8x256xf32>
    %375 = arith.mulf %373, %374 : vector<8x256xf32>
    %c0_255 = arith.constant 0 : index
    %c0_256 = arith.constant 0 : index
    %376 = vector.load %arg8[%c0_255, %c0_256] : memref<8x256xf32, #tpu.memory_space<vmem>>, vector<8x256xf32>
    tpu.vector_store %arg8[%c0_255, %c0_256], %372 {strides = array<i32>} : memref<8x256xf32, #tpu.memory_space<vmem>>, vector<8x256xf32>,
    %377 = arith.index_cast %c5_i32 : i32 to index
    %c0_257 = arith.constant 0 : index
    %c0_258 = arith.constant 0 : index
    %378 = vector.load %arg5[%377, %c0_257, %c0_258] : memref<8x8x256xf32, #tpu.memory_space<vmem>>, vector<1x8x256xf32>
    %379 = vector.shape_cast %378 : vector<1x8x256xf32> to vector<8x256xf32>
    %380 = vector.shape_cast %375 : vector<8x256xf32> to vector<1x8x256xf32>
    tpu.vector_store %arg5[%377, %c0_257, %c0_258], %380 {strides = array<i32>} : memref<8x8x256xf32, #tpu.memory_space<vmem>>, vector<1x8x256xf32>,
    %381 = arith.index_cast %c5_i32 : i32 to index
    %c0_259 = arith.constant 0 : index
    %c0_260 = arith.constant 0 : index
    %382 = vector.load %arg6[%381, %c0_259, %c0_260] : memref<8x8x256xf32, #tpu.memory_space<vmem>>, vector<1x8x256xf32>
    %383 = vector.shape_cast %382 : vector<1x8x256xf32> to vector<8x256xf32>
    %384 = vector.shape_cast %372 : vector<8x256xf32> to vector<1x8x256xf32>
    tpu.vector_store %arg6[%381, %c0_259, %c0_260], %384 {strides = array<i32>} : memref<8x8x256xf32, #tpu.memory_space<vmem>>, vector<1x8x256xf32>,
    %c17_i32_261 = arith.constant 17 : i32
    %385 = tpu.dynamic_rotate %375 by %c17_i32_261 dim 1 : vector<8x256xf32>, i32 -> vector<8x256xf32>
    %c0_262 = arith.constant 0 : index
    %c0_263 = arith.constant 0 : index
    %c0_264 = arith.constant 0 : index
    %386 = vector.load %arg4[%c0_262, %c0_263, %c0_264] : memref<9x8x256xf32, #tpu.memory_space<vmem>>, vector<1x8x256xf32>
    %387 = vector.shape_cast %386 : vector<1x8x256xf32> to vector<8x256xf32>
    %388 = arith.mulf %385, %387 : vector<8x256xf32>
    %c16_i32_265 = arith.constant 16 : i32
    %389 = tpu.dynamic_rotate %375 by %c16_i32_265 dim 1 : vector<8x256xf32>, i32 -> vector<8x256xf32>
    %c1_266 = arith.constant 1 : index
    %c0_267 = arith.constant 0 : index
    %c0_268 = arith.constant 0 : index
    %390 = vector.load %arg4[%c1_266, %c0_267, %c0_268] : memref<9x8x256xf32, #tpu.memory_space<vmem>>, vector<1x8x256xf32>
    %391 = vector.shape_cast %390 : vector<1x8x256xf32> to vector<8x256xf32>
    %392 = arith.mulf %389, %391 : vector<8x256xf32>
    %c15_i32_269 = arith.constant 15 : i32
    %393 = tpu.dynamic_rotate %375 by %c15_i32_269 dim 1 : vector<8x256xf32>, i32 -> vector<8x256xf32>
    %c2_270 = arith.constant 2 : index
    %c0_271 = arith.constant 0 : index
    %c0_272 = arith.constant 0 : index
    %394 = vector.load %arg4[%c2_270, %c0_271, %c0_272] : memref<9x8x256xf32, #tpu.memory_space<vmem>>, vector<1x8x256xf32>
    %395 = vector.shape_cast %394 : vector<1x8x256xf32> to vector<8x256xf32>
    %396 = arith.mulf %393, %395 : vector<8x256xf32>
    %c1_i32_273 = arith.constant 1 : i32
    %397 = tpu.dynamic_rotate %375 by %c1_i32_273 dim 1 : vector<8x256xf32>, i32 -> vector<8x256xf32>
    %c3_274 = arith.constant 3 : index
    %c0_275 = arith.constant 0 : index
    %c0_276 = arith.constant 0 : index
    %398 = vector.load %arg4[%c3_274, %c0_275, %c0_276] : memref<9x8x256xf32, #tpu.memory_space<vmem>>, vector<1x8x256xf32>
    %399 = vector.shape_cast %398 : vector<1x8x256xf32> to vector<8x256xf32>
    %400 = arith.mulf %397, %399 : vector<8x256xf32>
    %c0_i32_277 = arith.constant 0 : i32
    %401 = tpu.dynamic_rotate %375 by %c0_i32_277 dim 1 : vector<8x256xf32>, i32 -> vector<8x256xf32>
    %c4_278 = arith.constant 4 : index
    %c0_279 = arith.constant 0 : index
    %c0_280 = arith.constant 0 : index
    %402 = vector.load %arg4[%c4_278, %c0_279, %c0_280] : memref<9x8x256xf32, #tpu.memory_space<vmem>>, vector<1x8x256xf32>
    %403 = vector.shape_cast %402 : vector<1x8x256xf32> to vector<8x256xf32>
    %404 = arith.mulf %401, %403 : vector<8x256xf32>
    %c255_i32_281 = arith.constant 255 : i32
    %405 = tpu.dynamic_rotate %375 by %c255_i32_281 dim 1 : vector<8x256xf32>, i32 -> vector<8x256xf32>
    %c5_282 = arith.constant 5 : index
    %c0_283 = arith.constant 0 : index
    %c0_284 = arith.constant 0 : index
    %406 = vector.load %arg4[%c5_282, %c0_283, %c0_284] : memref<9x8x256xf32, #tpu.memory_space<vmem>>, vector<1x8x256xf32>
    %407 = vector.shape_cast %406 : vector<1x8x256xf32> to vector<8x256xf32>
    %408 = arith.mulf %405, %407 : vector<8x256xf32>
    %c241_i32_285 = arith.constant 241 : i32
    %409 = tpu.dynamic_rotate %375 by %c241_i32_285 dim 1 : vector<8x256xf32>, i32 -> vector<8x256xf32>
    %c6_286 = arith.constant 6 : index
    %c0_287 = arith.constant 0 : index
    %c0_288 = arith.constant 0 : index
    %410 = vector.load %arg4[%c6_286, %c0_287, %c0_288] : memref<9x8x256xf32, #tpu.memory_space<vmem>>, vector<1x8x256xf32>
    %411 = vector.shape_cast %410 : vector<1x8x256xf32> to vector<8x256xf32>
    %412 = arith.mulf %409, %411 : vector<8x256xf32>
    %c240_i32_289 = arith.constant 240 : i32
    %413 = tpu.dynamic_rotate %375 by %c240_i32_289 dim 1 : vector<8x256xf32>, i32 -> vector<8x256xf32>
    %c7_290 = arith.constant 7 : index
    %c0_291 = arith.constant 0 : index
    %c0_292 = arith.constant 0 : index
    %414 = vector.load %arg4[%c7_290, %c0_291, %c0_292] : memref<9x8x256xf32, #tpu.memory_space<vmem>>, vector<1x8x256xf32>
    %415 = vector.shape_cast %414 : vector<1x8x256xf32> to vector<8x256xf32>
    %416 = arith.mulf %413, %415 : vector<8x256xf32>
    %c239_i32_293 = arith.constant 239 : i32
    %417 = tpu.dynamic_rotate %375 by %c239_i32_293 dim 1 : vector<8x256xf32>, i32 -> vector<8x256xf32>
    %c8_294 = arith.constant 8 : index
    %c0_295 = arith.constant 0 : index
    %c0_296 = arith.constant 0 : index
    %418 = vector.load %arg4[%c8_294, %c0_295, %c0_296] : memref<9x8x256xf32, #tpu.memory_space<vmem>>, vector<1x8x256xf32>
    %419 = vector.shape_cast %418 : vector<1x8x256xf32> to vector<8x256xf32>
    %420 = arith.mulf %417, %419 : vector<8x256xf32>
    %421 = tpu.concatenate %388, %392, %396, %400, %404, %408, %412, %416, %420 in 0 : vector<8x256xf32>, vector<8x256xf32>, vector<8x256xf32>, vector<8x256xf32>, vector<8x256xf32>, vector<8x256xf32>, vector<8x256xf32>, vector<8x256xf32>, vector<8x256xf32> -> vector<72x256xf32>
    %422 = arith.truncf %421 : vector<72x256xf32> to vector<72x256xbf16>
    %c0_297 = arith.constant 0 : index
    %c0_298 = arith.constant 0 : index
    %423 = vector.load %arg7[%c0_297, %c0_298] : memref<72x256xbf16, #tpu.memory_space<vmem>>, vector<72x256xbf16>
    tpu.vector_store %arg7[%c0_297, %c0_298], %422 {strides = array<i32>} : memref<72x256xbf16, #tpu.memory_space<vmem>>, vector<72x256xbf16>,
    %c6_i32 = arith.constant 6 : i32
    %424 = arith.index_cast %c6_i32 : i32 to index
    %c0_299 = arith.constant 0 : index
    %c0_300 = arith.constant 0 : index
    %425 = vector.load %arg2[%424, %c0_299, %c0_300] : memref<8x32x256xf32, #tpu.memory_space<vmem>>, vector<1x32x256xf32>
    %426 = vector.shape_cast %425 : vector<1x32x256xf32> to vector<32x256xf32>
    %c0_301 = arith.constant 0 : index
    %c0_302 = arith.constant 0 : index
    %427 = vector.load %arg7[%c0_301, %c0_302] : memref<72x256xbf16, #tpu.memory_space<vmem>>, vector<72x256xbf16>
    %cst_303 = arith.constant dense<0.000000e+00> : vector<32x256xf32>
    %428 = tpu.matmul %3, %427, %cst_303 {dimension_numbers = #tpu.dot_dimension_numbers<[1], [0], [0], [1], [0, 0, 1, 1], [], []>} : vector<32x72xbf16>, vector<72x256xbf16>, vector<32x256xf32> -> vector<32x256xf32>
    %429 = arith.addf %426, %428 : vector<32x256xf32>
    %430 = arith.negf %429 : vector<32x256xf32>
    %431 = math.exp %430 : vector<32x256xf32>
    %cst_304 = arith.constant 1.000000e+00 : f32
    %432 = vector.broadcast %cst_304 : f32 to vector<32x256xf32>
    %433 = arith.addf %432, %431 : vector<32x256xf32>
    %434 = arith.divf %432, %433 : vector<32x256xf32>
    %435 = vector.extract_strided_slice %429 {offsets = [16, 0], sizes = [8, 256], strides = [1, 1]} : vector<32x256xf32> to vector<8x256xf32>
    %436 = math.tanh %435 : vector<8x256xf32>
    %437 = vector.extract_strided_slice %434 {offsets = [8, 0], sizes = [8, 256], strides = [1, 1]} : vector<32x256xf32> to vector<8x256xf32>
    %c0_305 = arith.constant 0 : index
    %c0_306 = arith.constant 0 : index
    %438 = vector.load %arg8[%c0_305, %c0_306] : memref<8x256xf32, #tpu.memory_space<vmem>>, vector<8x256xf32>
    %439 = arith.mulf %437, %438 : vector<8x256xf32>
    %440 = vector.extract_strided_slice %434 {offsets = [0, 0], sizes = [8, 256], strides = [1, 1]} : vector<32x256xf32> to vector<8x256xf32>
    %441 = arith.mulf %440, %436 : vector<8x256xf32>
    %442 = arith.addf %439, %441 : vector<8x256xf32>
    %443 = vector.extract_strided_slice %434 {offsets = [24, 0], sizes = [8, 256], strides = [1, 1]} : vector<32x256xf32> to vector<8x256xf32>
    %444 = math.tanh %442 : vector<8x256xf32>
    %445 = arith.mulf %443, %444 : vector<8x256xf32>
    %c0_307 = arith.constant 0 : index
    %c0_308 = arith.constant 0 : index
    %446 = vector.load %arg8[%c0_307, %c0_308] : memref<8x256xf32, #tpu.memory_space<vmem>>, vector<8x256xf32>
    tpu.vector_store %arg8[%c0_307, %c0_308], %442 {strides = array<i32>} : memref<8x256xf32, #tpu.memory_space<vmem>>, vector<8x256xf32>,
    %447 = arith.index_cast %c6_i32 : i32 to index
    %c0_309 = arith.constant 0 : index
    %c0_310 = arith.constant 0 : index
    %448 = vector.load %arg5[%447, %c0_309, %c0_310] : memref<8x8x256xf32, #tpu.memory_space<vmem>>, vector<1x8x256xf32>
    %449 = vector.shape_cast %448 : vector<1x8x256xf32> to vector<8x256xf32>
    %450 = vector.shape_cast %445 : vector<8x256xf32> to vector<1x8x256xf32>
    tpu.vector_store %arg5[%447, %c0_309, %c0_310], %450 {strides = array<i32>} : memref<8x8x256xf32, #tpu.memory_space<vmem>>, vector<1x8x256xf32>,
    %451 = arith.index_cast %c6_i32 : i32 to index
    %c0_311 = arith.constant 0 : index
    %c0_312 = arith.constant 0 : index
    %452 = vector.load %arg6[%451, %c0_311, %c0_312] : memref<8x8x256xf32, #tpu.memory_space<vmem>>, vector<1x8x256xf32>
    %453 = vector.shape_cast %452 : vector<1x8x256xf32> to vector<8x256xf32>
    %454 = vector.shape_cast %442 : vector<8x256xf32> to vector<1x8x256xf32>
    tpu.vector_store %arg6[%451, %c0_311, %c0_312], %454 {strides = array<i32>} : memref<8x8x256xf32, #tpu.memory_space<vmem>>, vector<1x8x256xf32>,
    %c17_i32_313 = arith.constant 17 : i32
    %455 = tpu.dynamic_rotate %445 by %c17_i32_313 dim 1 : vector<8x256xf32>, i32 -> vector<8x256xf32>
    %c0_314 = arith.constant 0 : index
    %c0_315 = arith.constant 0 : index
    %c0_316 = arith.constant 0 : index
    %456 = vector.load %arg4[%c0_314, %c0_315, %c0_316] : memref<9x8x256xf32, #tpu.memory_space<vmem>>, vector<1x8x256xf32>
    %457 = vector.shape_cast %456 : vector<1x8x256xf32> to vector<8x256xf32>
    %458 = arith.mulf %455, %457 : vector<8x256xf32>
    %c16_i32_317 = arith.constant 16 : i32
    %459 = tpu.dynamic_rotate %445 by %c16_i32_317 dim 1 : vector<8x256xf32>, i32 -> vector<8x256xf32>
    %c1_318 = arith.constant 1 : index
    %c0_319 = arith.constant 0 : index
    %c0_320 = arith.constant 0 : index
    %460 = vector.load %arg4[%c1_318, %c0_319, %c0_320] : memref<9x8x256xf32, #tpu.memory_space<vmem>>, vector<1x8x256xf32>
    %461 = vector.shape_cast %460 : vector<1x8x256xf32> to vector<8x256xf32>
    %462 = arith.mulf %459, %461 : vector<8x256xf32>
    %c15_i32_321 = arith.constant 15 : i32
    %463 = tpu.dynamic_rotate %445 by %c15_i32_321 dim 1 : vector<8x256xf32>, i32 -> vector<8x256xf32>
    %c2_322 = arith.constant 2 : index
    %c0_323 = arith.constant 0 : index
    %c0_324 = arith.constant 0 : index
    %464 = vector.load %arg4[%c2_322, %c0_323, %c0_324] : memref<9x8x256xf32, #tpu.memory_space<vmem>>, vector<1x8x256xf32>
    %465 = vector.shape_cast %464 : vector<1x8x256xf32> to vector<8x256xf32>
    %466 = arith.mulf %463, %465 : vector<8x256xf32>
    %c1_i32_325 = arith.constant 1 : i32
    %467 = tpu.dynamic_rotate %445 by %c1_i32_325 dim 1 : vector<8x256xf32>, i32 -> vector<8x256xf32>
    %c3_326 = arith.constant 3 : index
    %c0_327 = arith.constant 0 : index
    %c0_328 = arith.constant 0 : index
    %468 = vector.load %arg4[%c3_326, %c0_327, %c0_328] : memref<9x8x256xf32, #tpu.memory_space<vmem>>, vector<1x8x256xf32>
    %469 = vector.shape_cast %468 : vector<1x8x256xf32> to vector<8x256xf32>
    %470 = arith.mulf %467, %469 : vector<8x256xf32>
    %c0_i32_329 = arith.constant 0 : i32
    %471 = tpu.dynamic_rotate %445 by %c0_i32_329 dim 1 : vector<8x256xf32>, i32 -> vector<8x256xf32>
    %c4_330 = arith.constant 4 : index
    %c0_331 = arith.constant 0 : index
    %c0_332 = arith.constant 0 : index
    %472 = vector.load %arg4[%c4_330, %c0_331, %c0_332] : memref<9x8x256xf32, #tpu.memory_space<vmem>>, vector<1x8x256xf32>
    %473 = vector.shape_cast %472 : vector<1x8x256xf32> to vector<8x256xf32>
    %474 = arith.mulf %471, %473 : vector<8x256xf32>
    %c255_i32_333 = arith.constant 255 : i32
    %475 = tpu.dynamic_rotate %445 by %c255_i32_333 dim 1 : vector<8x256xf32>, i32 -> vector<8x256xf32>
    %c5_334 = arith.constant 5 : index
    %c0_335 = arith.constant 0 : index
    %c0_336 = arith.constant 0 : index
    %476 = vector.load %arg4[%c5_334, %c0_335, %c0_336] : memref<9x8x256xf32, #tpu.memory_space<vmem>>, vector<1x8x256xf32>
    %477 = vector.shape_cast %476 : vector<1x8x256xf32> to vector<8x256xf32>
    %478 = arith.mulf %475, %477 : vector<8x256xf32>
    %c241_i32_337 = arith.constant 241 : i32
    %479 = tpu.dynamic_rotate %445 by %c241_i32_337 dim 1 : vector<8x256xf32>, i32 -> vector<8x256xf32>
    %c6_338 = arith.constant 6 : index
    %c0_339 = arith.constant 0 : index
    %c0_340 = arith.constant 0 : index
    %480 = vector.load %arg4[%c6_338, %c0_339, %c0_340] : memref<9x8x256xf32, #tpu.memory_space<vmem>>, vector<1x8x256xf32>
    %481 = vector.shape_cast %480 : vector<1x8x256xf32> to vector<8x256xf32>
    %482 = arith.mulf %479, %481 : vector<8x256xf32>
    %c240_i32_341 = arith.constant 240 : i32
    %483 = tpu.dynamic_rotate %445 by %c240_i32_341 dim 1 : vector<8x256xf32>, i32 -> vector<8x256xf32>
    %c7_342 = arith.constant 7 : index
    %c0_343 = arith.constant 0 : index
    %c0_344 = arith.constant 0 : index
    %484 = vector.load %arg4[%c7_342, %c0_343, %c0_344] : memref<9x8x256xf32, #tpu.memory_space<vmem>>, vector<1x8x256xf32>
    %485 = vector.shape_cast %484 : vector<1x8x256xf32> to vector<8x256xf32>
    %486 = arith.mulf %483, %485 : vector<8x256xf32>
    %c239_i32_345 = arith.constant 239 : i32
    %487 = tpu.dynamic_rotate %445 by %c239_i32_345 dim 1 : vector<8x256xf32>, i32 -> vector<8x256xf32>
    %c8_346 = arith.constant 8 : index
    %c0_347 = arith.constant 0 : index
    %c0_348 = arith.constant 0 : index
    %488 = vector.load %arg4[%c8_346, %c0_347, %c0_348] : memref<9x8x256xf32, #tpu.memory_space<vmem>>, vector<1x8x256xf32>
    %489 = vector.shape_cast %488 : vector<1x8x256xf32> to vector<8x256xf32>
    %490 = arith.mulf %487, %489 : vector<8x256xf32>
    %491 = tpu.concatenate %458, %462, %466, %470, %474, %478, %482, %486, %490 in 0 : vector<8x256xf32>, vector<8x256xf32>, vector<8x256xf32>, vector<8x256xf32>, vector<8x256xf32>, vector<8x256xf32>, vector<8x256xf32>, vector<8x256xf32>, vector<8x256xf32> -> vector<72x256xf32>
    %492 = arith.truncf %491 : vector<72x256xf32> to vector<72x256xbf16>
    %c0_349 = arith.constant 0 : index
    %c0_350 = arith.constant 0 : index
    %493 = vector.load %arg7[%c0_349, %c0_350] : memref<72x256xbf16, #tpu.memory_space<vmem>>, vector<72x256xbf16>
    tpu.vector_store %arg7[%c0_349, %c0_350], %492 {strides = array<i32>} : memref<72x256xbf16, #tpu.memory_space<vmem>>, vector<72x256xbf16>,
    %c7_i32 = arith.constant 7 : i32
    %494 = arith.index_cast %c7_i32 : i32 to index
    %c0_351 = arith.constant 0 : index
    %c0_352 = arith.constant 0 : index
    %495 = vector.load %arg2[%494, %c0_351, %c0_352] : memref<8x32x256xf32, #tpu.memory_space<vmem>>, vector<1x32x256xf32>
    %496 = vector.shape_cast %495 : vector<1x32x256xf32> to vector<32x256xf32>
    %c0_353 = arith.constant 0 : index
    %c0_354 = arith.constant 0 : index
    %497 = vector.load %arg7[%c0_353, %c0_354] : memref<72x256xbf16, #tpu.memory_space<vmem>>, vector<72x256xbf16>
    %cst_355 = arith.constant dense<0.000000e+00> : vector<32x256xf32>
    %498 = tpu.matmul %3, %497, %cst_355 {dimension_numbers = #tpu.dot_dimension_numbers<[1], [0], [0], [1], [0, 0, 1, 1], [], []>} : vector<32x72xbf16>, vector<72x256xbf16>, vector<32x256xf32> -> vector<32x256xf32>
    %499 = arith.addf %496, %498 : vector<32x256xf32>
    %500 = arith.negf %499 : vector<32x256xf32>
    %501 = math.exp %500 : vector<32x256xf32>
    %cst_356 = arith.constant 1.000000e+00 : f32
    %502 = vector.broadcast %cst_356 : f32 to vector<32x256xf32>
    %503 = arith.addf %502, %501 : vector<32x256xf32>
    %504 = arith.divf %502, %503 : vector<32x256xf32>
    %505 = vector.extract_strided_slice %499 {offsets = [16, 0], sizes = [8, 256], strides = [1, 1]} : vector<32x256xf32> to vector<8x256xf32>
    %506 = math.tanh %505 : vector<8x256xf32>
    %507 = vector.extract_strided_slice %504 {offsets = [8, 0], sizes = [8, 256], strides = [1, 1]} : vector<32x256xf32> to vector<8x256xf32>
    %c0_357 = arith.constant 0 : index
    %c0_358 = arith.constant 0 : index
    %508 = vector.load %arg8[%c0_357, %c0_358] : memref<8x256xf32, #tpu.memory_space<vmem>>, vector<8x256xf32>
    %509 = arith.mulf %507, %508 : vector<8x256xf32>
    %510 = vector.extract_strided_slice %504 {offsets = [0, 0], sizes = [8, 256], strides = [1, 1]} : vector<32x256xf32> to vector<8x256xf32>
    %511 = arith.mulf %510, %506 : vector<8x256xf32>
    %512 = arith.addf %509, %511 : vector<8x256xf32>
    %513 = vector.extract_strided_slice %504 {offsets = [24, 0], sizes = [8, 256], strides = [1, 1]} : vector<32x256xf32> to vector<8x256xf32>
    %514 = math.tanh %512 : vector<8x256xf32>
    %515 = arith.mulf %513, %514 : vector<8x256xf32>
    %c0_359 = arith.constant 0 : index
    %c0_360 = arith.constant 0 : index
    %516 = vector.load %arg8[%c0_359, %c0_360] : memref<8x256xf32, #tpu.memory_space<vmem>>, vector<8x256xf32>
    tpu.vector_store %arg8[%c0_359, %c0_360], %512 {strides = array<i32>} : memref<8x256xf32, #tpu.memory_space<vmem>>, vector<8x256xf32>,
    %517 = arith.index_cast %c7_i32 : i32 to index
    %c0_361 = arith.constant 0 : index
    %c0_362 = arith.constant 0 : index
    %518 = vector.load %arg5[%517, %c0_361, %c0_362] : memref<8x8x256xf32, #tpu.memory_space<vmem>>, vector<1x8x256xf32>
    %519 = vector.shape_cast %518 : vector<1x8x256xf32> to vector<8x256xf32>
    %520 = vector.shape_cast %515 : vector<8x256xf32> to vector<1x8x256xf32>
    tpu.vector_store %arg5[%517, %c0_361, %c0_362], %520 {strides = array<i32>} : memref<8x8x256xf32, #tpu.memory_space<vmem>>, vector<1x8x256xf32>,
    %521 = arith.index_cast %c7_i32 : i32 to index
    %c0_363 = arith.constant 0 : index
    %c0_364 = arith.constant 0 : index
    %522 = vector.load %arg6[%521, %c0_363, %c0_364] : memref<8x8x256xf32, #tpu.memory_space<vmem>>, vector<1x8x256xf32>
    %523 = vector.shape_cast %522 : vector<1x8x256xf32> to vector<8x256xf32>
    %524 = vector.shape_cast %512 : vector<8x256xf32> to vector<1x8x256xf32>
    tpu.vector_store %arg6[%521, %c0_363, %c0_364], %524 {strides = array<i32>} : memref<8x8x256xf32, #tpu.memory_space<vmem>>, vector<1x8x256xf32>,
    %c17_i32_365 = arith.constant 17 : i32
    %525 = tpu.dynamic_rotate %515 by %c17_i32_365 dim 1 : vector<8x256xf32>, i32 -> vector<8x256xf32>
    %c0_366 = arith.constant 0 : index
    %c0_367 = arith.constant 0 : index
    %c0_368 = arith.constant 0 : index
    %526 = vector.load %arg4[%c0_366, %c0_367, %c0_368] : memref<9x8x256xf32, #tpu.memory_space<vmem>>, vector<1x8x256xf32>
    %527 = vector.shape_cast %526 : vector<1x8x256xf32> to vector<8x256xf32>
    %528 = arith.mulf %525, %527 : vector<8x256xf32>
    %c16_i32_369 = arith.constant 16 : i32
    %529 = tpu.dynamic_rotate %515 by %c16_i32_369 dim 1 : vector<8x256xf32>, i32 -> vector<8x256xf32>
    %c1_370 = arith.constant 1 : index
    %c0_371 = arith.constant 0 : index
    %c0_372 = arith.constant 0 : index
    %530 = vector.load %arg4[%c1_370, %c0_371, %c0_372] : memref<9x8x256xf32, #tpu.memory_space<vmem>>, vector<1x8x256xf32>
    %531 = vector.shape_cast %530 : vector<1x8x256xf32> to vector<8x256xf32>
    %532 = arith.mulf %529, %531 : vector<8x256xf32>
    %c15_i32_373 = arith.constant 15 : i32
    %533 = tpu.dynamic_rotate %515 by %c15_i32_373 dim 1 : vector<8x256xf32>, i32 -> vector<8x256xf32>
    %c2_374 = arith.constant 2 : index
    %c0_375 = arith.constant 0 : index
    %c0_376 = arith.constant 0 : index
    %534 = vector.load %arg4[%c2_374, %c0_375, %c0_376] : memref<9x8x256xf32, #tpu.memory_space<vmem>>, vector<1x8x256xf32>
    %535 = vector.shape_cast %534 : vector<1x8x256xf32> to vector<8x256xf32>
    %536 = arith.mulf %533, %535 : vector<8x256xf32>
    %c1_i32_377 = arith.constant 1 : i32
    %537 = tpu.dynamic_rotate %515 by %c1_i32_377 dim 1 : vector<8x256xf32>, i32 -> vector<8x256xf32>
    %c3_378 = arith.constant 3 : index
    %c0_379 = arith.constant 0 : index
    %c0_380 = arith.constant 0 : index
    %538 = vector.load %arg4[%c3_378, %c0_379, %c0_380] : memref<9x8x256xf32, #tpu.memory_space<vmem>>, vector<1x8x256xf32>
    %539 = vector.shape_cast %538 : vector<1x8x256xf32> to vector<8x256xf32>
    %540 = arith.mulf %537, %539 : vector<8x256xf32>
    %c0_i32_381 = arith.constant 0 : i32
    %541 = tpu.dynamic_rotate %515 by %c0_i32_381 dim 1 : vector<8x256xf32>, i32 -> vector<8x256xf32>
    %c4_382 = arith.constant 4 : index
    %c0_383 = arith.constant 0 : index
    %c0_384 = arith.constant 0 : index
    %542 = vector.load %arg4[%c4_382, %c0_383, %c0_384] : memref<9x8x256xf32, #tpu.memory_space<vmem>>, vector<1x8x256xf32>
    %543 = vector.shape_cast %542 : vector<1x8x256xf32> to vector<8x256xf32>
    %544 = arith.mulf %541, %543 : vector<8x256xf32>
    %c255_i32_385 = arith.constant 255 : i32
    %545 = tpu.dynamic_rotate %515 by %c255_i32_385 dim 1 : vector<8x256xf32>, i32 -> vector<8x256xf32>
    %c5_386 = arith.constant 5 : index
    %c0_387 = arith.constant 0 : index
    %c0_388 = arith.constant 0 : index
    %546 = vector.load %arg4[%c5_386, %c0_387, %c0_388] : memref<9x8x256xf32, #tpu.memory_space<vmem>>, vector<1x8x256xf32>
    %547 = vector.shape_cast %546 : vector<1x8x256xf32> to vector<8x256xf32>
    %548 = arith.mulf %545, %547 : vector<8x256xf32>
    %c241_i32_389 = arith.constant 241 : i32
    %549 = tpu.dynamic_rotate %515 by %c241_i32_389 dim 1 : vector<8x256xf32>, i32 -> vector<8x256xf32>
    %c6_390 = arith.constant 6 : index
    %c0_391 = arith.constant 0 : index
    %c0_392 = arith.constant 0 : index
    %550 = vector.load %arg4[%c6_390, %c0_391, %c0_392] : memref<9x8x256xf32, #tpu.memory_space<vmem>>, vector<1x8x256xf32>
    %551 = vector.shape_cast %550 : vector<1x8x256xf32> to vector<8x256xf32>
    %552 = arith.mulf %549, %551 : vector<8x256xf32>
    %c240_i32_393 = arith.constant 240 : i32
    %553 = tpu.dynamic_rotate %515 by %c240_i32_393 dim 1 : vector<8x256xf32>, i32 -> vector<8x256xf32>
    %c7_394 = arith.constant 7 : index
    %c0_395 = arith.constant 0 : index
    %c0_396 = arith.constant 0 : index
    %554 = vector.load %arg4[%c7_394, %c0_395, %c0_396] : memref<9x8x256xf32, #tpu.memory_space<vmem>>, vector<1x8x256xf32>
    %555 = vector.shape_cast %554 : vector<1x8x256xf32> to vector<8x256xf32>
    %556 = arith.mulf %553, %555 : vector<8x256xf32>
    %c239_i32_397 = arith.constant 239 : i32
    %557 = tpu.dynamic_rotate %515 by %c239_i32_397 dim 1 : vector<8x256xf32>, i32 -> vector<8x256xf32>
    %c8_398 = arith.constant 8 : index
    %c0_399 = arith.constant 0 : index
    %c0_400 = arith.constant 0 : index
    %558 = vector.load %arg4[%c8_398, %c0_399, %c0_400] : memref<9x8x256xf32, #tpu.memory_space<vmem>>, vector<1x8x256xf32>
    %559 = vector.shape_cast %558 : vector<1x8x256xf32> to vector<8x256xf32>
    %560 = arith.mulf %557, %559 : vector<8x256xf32>
    %561 = tpu.concatenate %528, %532, %536, %540, %544, %548, %552, %556, %560 in 0 : vector<8x256xf32>, vector<8x256xf32>, vector<8x256xf32>, vector<8x256xf32>, vector<8x256xf32>, vector<8x256xf32>, vector<8x256xf32>, vector<8x256xf32>, vector<8x256xf32> -> vector<72x256xf32>
    %562 = arith.truncf %561 : vector<72x256xf32> to vector<72x256xbf16>
    %c0_401 = arith.constant 0 : index
    %c0_402 = arith.constant 0 : index
    %563 = vector.load %arg7[%c0_401, %c0_402] : memref<72x256xbf16, #tpu.memory_space<vmem>>, vector<72x256xbf16>
    tpu.vector_store %arg7[%c0_401, %c0_402], %562 {strides = array<i32>} : memref<72x256xbf16, #tpu.memory_space<vmem>>, vector<72x256xbf16>,
    %c8_i32 = arith.constant 8 : i32
    return
  }
  func.func @transform_0(%arg0: i32, %arg1: i32) -> (i32, i32, i32) {
    %c0_i32 = arith.constant 0 : i32
    %c0_i32_0 = arith.constant 0 : i32
    return %arg1, %c0_i32, %arg0 : i32, i32, i32
  }
  func.func @transform_1(%arg0: i32, %arg1: i32) -> (i32, i32) {
    %c0_i32 = arith.constant 0 : i32
    %c0_i32_0 = arith.constant 0 : i32
    %c0_i32_1 = arith.constant 0 : i32
    return %c0_i32, %c0_i32_0 : i32, i32
  }
  func.func @transform_2(%arg0: i32, %arg1: i32) -> (i32, i32, i32) {
    %c0_i32 = arith.constant 0 : i32
    %c0_i32_0 = arith.constant 0 : i32
    %c0_i32_1 = arith.constant 0 : i32
    %c0_i32_2 = arith.constant 0 : i32
    return %c0_i32, %c0_i32_0, %c0_i32_1 : i32, i32, i32
  }
  func.func @transform_3(%arg0: i32, %arg1: i32) -> (i32, i32, i32) {
    %c0_i32 = arith.constant 0 : i32
    %c0_i32_0 = arith.constant 0 : i32
    return %arg1, %c0_i32, %arg0 : i32, i32, i32
  }
  func.func @transform_4(%arg0: i32, %arg1: i32) -> (i32, i32, i32) {
    %c0_i32 = arith.constant 0 : i32
    %c0_i32_0 = arith.constant 0 : i32
    return %arg1, %c0_i32, %arg0 : i32, i32, i32
  }
}

</mosaic_0001>

<bundles_post_ra>
// kernel: _lambda_.1
= control target key start
LH: loop header
LB: loop body
LE: loop exit
PB: predicated region body
PF: predicated region fallthrough
CT: control target
= control target key end

     0   :  { %s4335_s15 = smov 0   ;;  %s4337_s16 = smov 0   ;;  %s5599_s0 = inlined_call_operand.vmem [shape: f32[8,32,512], index: 0, kind: input, shape index: {}]   ;;  %s5600_s1 = inlined_call_operand.vmem [shape: bf16[32,72], index: 1, kind: input, shape index: {}]   ;;  %s5601_s2 = inlined_call_operand.vmem [shape: f32[9,8,256], index: 2, kind: input, shape index: {}]   ;;  %s5602_s3 = inlined_call_operand.vmem [shape: f32[8,8,512], index: 3, kind: output, shape index: {0}]   ;;  %s5603_s4 = inlined_call_operand.vmem [shape: f32[8,8,512], index: 4, kind: output, shape index: {1}]  }
   0x1   :  { %s4339_s17 = smov 0   ;;  %s4341_s18 = smov 0  }
   0x2   :  { %s4343_s19 = smov 0  }
   0x3 LB: > { %s27_s20 = sadd.s32 1, %s4295_s18  ;;  %s3343_s21 = sadd.s32 4294967295, %s4299_s19   ;;  %s4299_s19 = sphi %s4343_s19, %s15_s19   ;;  %s4295_s18 = sphi %s4341_s18, %s5608_s18   ;;  %s4291_s17 = sphi %s4339_s17, %s5607_s17   ;;  %s4287_s16 = sphi %s4337_s16, %s5606_s16   ;;  %s4283_s15 = sphi %s4335_s15, %s5605_s15  }
   0x4   : > { %p29_p0 = scmp.ge.s32.totalorder %s27_s20, 2  ;;  %p43_p1 = scmp.ne.s32.totalorder %s4287_s16, %s4283_s15 }
   0x5   : > { %p44_p2 = scmp.eq.s32.totalorder %s4299_s19, 0  ;;  %p117_p4 = scmp.eq.s32.totalorder %s3343_s21, 1 }
   0x6   : > { %s5610_s20 = smov (%p29_p0, %s27_s20), 0  ;;  %s36_s23 = sadd.s32 1, %s4287_s16 }
   0x7   : > { %p45_p3 = por %p44_p2, %p43_p1  ;;  %s32_s22 = ssub.s32 %s4295_s18, %s5610_s20 }
   0x8   : > { %p34_p5 = scmp.eq.s32.totalorder %s32_s22, 0  ;;  %p4370_p6 = por %p117_p4, %p43_p1 }
   0x9   : > { %p3346_p7 = scmp.ge.s32.totalorder %s4299_s19, 2 }
   0xa   : > { %s4375_s25 = scalar_select %p34_p5, %s4287_s16, %s36_s23  }
   0xb   : > { %173 = sbr.rel (%p3346_p7) target bundleno = 54 (0x36), region = 24 }
  0x12   : > { %176 = sbr.rel (!%p45_p3) target bundleno = 54 (0x36), region = 28  ;;  %s178_s26 = sand.u32 (%p45_p3), 1, %s4287_s16  }
  0x13   : > { %s3800_s27 = sshll.u32 (%p45_p3), %s4295_s18, 4  ;;  %s3347_s28 = sshll.u32 (%p45_p3), %s178_s26, 9 }
  0x14   : > { %s4383_s5 = scalar_lea.vmem (%p45_p3), %s5599_s0, %s3800_s27  ;;  %s4388_s6 = scalar_lea.vmem (%p45_p3), [#allocation4], %s3347_s28 }
  0x15   : > { %v199_v0 = vld [vmem:[%s4383_s5] sm:$0xff] (%p45_p3)  ;;  %v201_v1 = vld [vmem:[%s4383_s5 + $0x8] sm:$0xff] (%p45_p3) }
  0x16   : > { %v203_v2 = vld [vmem:[%s4383_s5 + $0x20] sm:$0xff] (%p45_p3)  ;;  %200 = vst [vmem:[%s4388_s6] sm:$0xff] (%p45_p3), %v199_v0  ;;  %202 = vst [vmem:[%s4388_s6 + $0x8] sm:$0xff] (%p45_p3), %v201_v1  ;;  %v205_v3 = vld [vmem:[%s4383_s5 + $0x28] sm:$0xff] (%p45_p3) }
  0x17   : > { %204 = vst [vmem:[%s4388_s6 + $0x10] sm:$0xff] (%p45_p3), %v203_v2  ;;  %v207_v4 = vld [vmem:[%s4383_s5 + $0x40] sm:$0xff] (%p45_p3)  ;;  %v209_v5 = vld [vmem:[%s4383_s5 + $0x48] sm:$0xff] (%p45_p3)  ;;  %206 = vst [vmem:[%s4388_s6 + $0x18] sm:$0xff] (%p45_p3), %v205_v3 }
  0x18   : > { %208 = vst [vmem:[%s4388_s6 + $0x20] sm:$0xff] (%p45_p3), %v207_v4  ;;  %210 = vst [vmem:[%s4388_s6 + $0x28] sm:$0xff] (%p45_p3), %v209_v5  ;;  %v211_v6 = vld [vmem:[%s4383_s5 + $0x60] sm:$0xff] (%p45_p3)  ;;  %v213_v7 = vld [vmem:[%s4383_s5 + $0x68] sm:$0xff] (%p45_p3) }
  0x19   : > { %v215_v8 = vld [vmem:[%s4383_s5 + $0x80] sm:$0xff]  ;;  %212 = vst [vmem:[%s4388_s6 + $0x30] sm:$0xff] %v211_v6  ;;  %214 = vst [vmem:[%s4388_s6 + $0x38] sm:$0xff] %v213_v7  ;;  %v217_v9 = vld [vmem:[%s4383_s5 + $0x88] sm:$0xff] }
  0x1a   : > { %216 = vst [vmem:[%s4388_s6 + $0x40] sm:$0xff] %v215_v8  ;;  %v219_v10 = vld [vmem:[%s4383_s5 + $0xa0] sm:$0xff]  ;;  %v221_v11 = vld [vmem:[%s4383_s5 + $0xa8] sm:$0xff]  ;;  %218 = vst [vmem:[%s4388_s6 + $0x48] sm:$0xff] %v217_v9 }
  0x1b   : > { %220 = vst [vmem:[%s4388_s6 + $0x50] sm:$0xff] %v219_v10  ;;  %222 = vst [vmem:[%s4388_s6 + $0x58] sm:$0xff] %v221_v11  ;;  %v223_v12 = vld [vmem:[%s4383_s5 + $0xc0] sm:$0xff]  ;;  %v225_v13 = vld [vmem:[%s4383_s5 + $0xc8] sm:$0xff] }
  0x1c   : > { %v227_v14 = vld [vmem:[%s4383_s5 + $0xe0] sm:$0xff]  ;;  %224 = vst [vmem:[%s4388_s6 + $0x60] sm:$0xff] %v223_v12  ;;  %226 = vst [vmem:[%s4388_s6 + $0x68] sm:$0xff] %v225_v13  ;;  %v229_v15 = vld [vmem:[%s4383_s5 + $0xe8] sm:$0xff] }
  0x1d   : > { %228 = vst [vmem:[%s4388_s6 + $0x70] sm:$0xff] %v227_v14  ;;  %v231_v16 = vld [vmem:[%s4383_s5 + $0x100] sm:$0xff]  ;;  %v233_v17 = vld [vmem:[%s4383_s5 + $0x108] sm:$0xff]  ;;  %230 = vst [vmem:[%s4388_s6 + $0x78] sm:$0xff] %v229_v15 }
  0x1e   : > { %232 = vst [vmem:[%s4388_s6 + $0x80] sm:$0xff] %v231_v16  ;;  %234 = vst [vmem:[%s4388_s6 + $0x88] sm:$0xff] %v233_v17  ;;  %v235_v18 = vld [vmem:[%s4383_s5 + $0x120] sm:$0xff]  ;;  %v237_v19 = vld [vmem:[%s4383_s5 + $0x128] sm:$0xff] }
  0x1f   : > { %v239_v20 = vld [vmem:[%s4383_s5 + $0x140] sm:$0xff]  ;;  %236 = vst [vmem:[%s4388_s6 + $0x90] sm:$0xff] %v235_v18  ;;  %238 = vst [vmem:[%s4388_s6 + $0x98] sm:$0xff] %v237_v19  ;;  %v241_v21 = vld [vmem:[%s4383_s5 + $0x148] sm:$0xff] }
  0x20   : > { %240 = vst [vmem:[%s4388_s6 + $0xa0] sm:$0xff] %v239_v20  ;;  %v243_v22 = vld [vmem:[%s4383_s5 + $0x160] sm:$0xff]  ;;  %v245_v23 = vld [vmem:[%s4383_s5 + $0x168] sm:$0xff]  ;;  %242 = vst [vmem:[%s4388_s6 + $0xa8] sm:$0xff] %v241_v21 }
  0x21   : > { %244 = vst [vmem:[%s4388_s6 + $0xb0] sm:$0xff] %v243_v22  ;;  %246 = vst [vmem:[%s4388_s6 + $0xb8] sm:$0xff] %v245_v23  ;;  %v247_v24 = vld [vmem:[%s4383_s5 + $0x180] sm:$0xff]  ;;  %v249_v25 = vld [vmem:[%s4383_s5 + $0x188] sm:$0xff] }
  0x22   : > { %v251_v26 = vld [vmem:[%s4383_s5 + $0x1a0] sm:$0xff]  ;;  %248 = vst [vmem:[%s4388_s6 + $0xc0] sm:$0xff] %v247_v24  ;;  %250 = vst [vmem:[%s4388_s6 + $0xc8] sm:$0xff] %v249_v25  ;;  %v253_v27 = vld [vmem:[%s4383_s5 + $0x1a8] sm:$0xff] }
  0x23   : > { %252 = vst [vmem:[%s4388_s6 + $0xd0] sm:$0xff] %v251_v26  ;;  %v255_v28 = vld [vmem:[%s4383_s5 + $0x1c0] sm:$0xff]  ;;  %v257_v29 = vld [vmem:[%s4383_s5 + $0x1c8] sm:$0xff]  ;;  %254 = vst [vmem:[%s4388_s6 + $0xd8] sm:$0xff] %v253_v27 }
  0x24   : > { %256 = vst [vmem:[%s4388_s6 + $0xe0] sm:$0xff] %v255_v28  ;;  %258 = vst [vmem:[%s4388_s6 + $0xe8] sm:$0xff] %v257_v29  ;;  %v259_v30 = vld [vmem:[%s4383_s5 + $0x1e0] sm:$0xff]  ;;  %v261_v31 = vld [vmem:[%s4383_s5 + $0x1e8] sm:$0xff] }
  0x25   : > { %v263_v32 = vld [vmem:[%s4383_s5 + $0x200] sm:$0xff]  ;;  %260 = vst [vmem:[%s4388_s6 + $0xf0] sm:$0xff] %v259_v30  ;;  %262 = vst [vmem:[%s4388_s6 + $0xf8] sm:$0xff] %v261_v31  ;;  %v265_v33 = vld [vmem:[%s4383_s5 + $0x208] sm:$0xff] }
  0x26   : > { %264 = vst [vmem:[%s4388_s6 + $0x100] sm:$0xff] %v263_v32  ;;  %v267_v34 = vld [vmem:[%s4383_s5 + $0x220] sm:$0xff]  ;;  %v269_v35 = vld [vmem:[%s4383_s5 + $0x228] sm:$0xff]  ;;  %266 = vst [vmem:[%s4388_s6 + $0x108] sm:$0xff] %v265_v33 }
  0x27   : > { %268 = vst [vmem:[%s4388_s6 + $0x110] sm:$0xff] %v267_v34  ;;  %270 = vst [vmem:[%s4388_s6 + $0x118] sm:$0xff] %v269_v35  ;;  %v271_v36 = vld [vmem:[%s4383_s5 + $0x240] sm:$0xff]  ;;  %v273_v37 = vld [vmem:[%s4383_s5 + $0x248] sm:$0xff] }
  0x28   : > { %v275_v38 = vld [vmem:[%s4383_s5 + $0x260] sm:$0xff]  ;;  %272 = vst [vmem:[%s4388_s6 + $0x120] sm:$0xff] %v271_v36  ;;  %274 = vst [vmem:[%s4388_s6 + $0x128] sm:$0xff] %v273_v37  ;;  %v277_v39 = vld [vmem:[%s4383_s5 + $0x268] sm:$0xff] }
  0x29   : > { %276 = vst [vmem:[%s4388_s6 + $0x130] sm:$0xff] %v275_v38  ;;  %v279_v40 = vld [vmem:[%s4383_s5 + $0x280] sm:$0xff]  ;;  %v281_v41 = vld [vmem:[%s4383_s5 + $0x288] sm:$0xff]  ;;  %278 = vst [vmem:[%s4388_s6 + $0x138] sm:$0xff] %v277_v39 }
  0x2a   : > { %280 = vst [vmem:[%s4388_s6 + $0x140] sm:$0xff] %v279_v40  ;;  %282 = vst [vmem:[%s4388_s6 + $0x148] sm:$0xff] %v281_v41  ;;  %v283_v42 = vld [vmem:[%s4383_s5 + $0x2a0] sm:$0xff]  ;;  %v285_v43 = vld [vmem:[%s4383_s5 + $0x2a8] sm:$0xff] }
  0x2b   : > { %v287_v44 = vld [vmem:[%s4383_s5 + $0x2c0] sm:$0xff]  ;;  %284 = vst [vmem:[%s4388_s6 + $0x150] sm:$0xff] %v283_v42  ;;  %286 = vst [vmem:[%s4388_s6 + $0x158] sm:$0xff] %v285_v43  ;;  %v289_v45 = vld [vmem:[%s4383_s5 + $0x2c8] sm:$0xff] }
  0x2c   : > { %288 = vst [vmem:[%s4388_s6 + $0x160] sm:$0xff] %v287_v44  ;;  %v291_v46 = vld [vmem:[%s4383_s5 + $0x2e0] sm:$0xff]  ;;  %v293_v47 = vld [vmem:[%s4383_s5 + $0x2e8] sm:$0xff]  ;;  %290 = vst [vmem:[%s4388_s6 + $0x168] sm:$0xff] %v289_v45 }
  0x2d   : > { %292 = vst [vmem:[%s4388_s6 + $0x170] sm:$0xff] %v291_v46  ;;  %294 = vst [vmem:[%s4388_s6 + $0x178] sm:$0xff] %v293_v47  ;;  %v295_v48 = vld [vmem:[%s4383_s5 + $0x300] sm:$0xff]  ;;  %v297_v49 = vld [vmem:[%s4383_s5 + $0x308] sm:$0xff] }
  0x2e   : > { %v299_v50 = vld [vmem:[%s4383_s5 + $0x320] sm:$0xff]  ;;  %296 = vst [vmem:[%s4388_s6 + $0x180] sm:$0xff] %v295_v48  ;;  %298 = vst [vmem:[%s4388_s6 + $0x188] sm:$0xff] %v297_v49  ;;  %v301_v51 = vld [vmem:[%s4383_s5 + $0x328] sm:$0xff] }
  0x2f   : > { %300 = vst [vmem:[%s4388_s6 + $0x190] sm:$0xff] %v299_v50  ;;  %v303_v52 = vld [vmem:[%s4383_s5 + $0x340] sm:$0xff]  ;;  %v305_v53 = vld [vmem:[%s4383_s5 + $0x348] sm:$0xff]  ;;  %302 = vst [vmem:[%s4388_s6 + $0x198] sm:$0xff] %v301_v51 }
  0x30   : > { %304 = vst [vmem:[%s4388_s6 + $0x1a0] sm:$0xff] %v303_v52  ;;  %306 = vst [vmem:[%s4388_s6 + $0x1a8] sm:$0xff] %v305_v53  ;;  %v307_v54 = vld [vmem:[%s4383_s5 + $0x360] sm:$0xff]  ;;  %v309_v55 = vld [vmem:[%s4383_s5 + $0x368] sm:$0xff] }
  0x31   : > { %v311_v56 = vld [vmem:[%s4383_s5 + $0x380] sm:$0xff]  ;;  %308 = vst [vmem:[%s4388_s6 + $0x1b0] sm:$0xff] %v307_v54  ;;  %310 = vst [vmem:[%s4388_s6 + $0x1b8] sm:$0xff] %v309_v55  ;;  %v313_v57 = vld [vmem:[%s4383_s5 + $0x388] sm:$0xff] }
  0x32   : > { %312 = vst [vmem:[%s4388_s6 + $0x1c0] sm:$0xff] %v311_v56  ;;  %v315_v58 = vld [vmem:[%s4383_s5 + $0x3a0] sm:$0xff]  ;;  %v317_v59 = vld [vmem:[%s4383_s5 + $0x3a8] sm:$0xff]  ;;  %314 = vst [vmem:[%s4388_s6 + $0x1c8] sm:$0xff] %v313_v57 }
  0x33   : > { %316 = vst [vmem:[%s4388_s6 + $0x1d0] sm:$0xff] %v315_v58  ;;  %318 = vst [vmem:[%s4388_s6 + $0x1d8] sm:$0xff] %v317_v59  ;;  %v319_v60 = vld [vmem:[%s4383_s5 + $0x3c0] sm:$0xff]  ;;  %v321_v61 = vld [vmem:[%s4383_s5 + $0x3c8] sm:$0xff] }
  0x34   : > { %v323_v62 = vld [vmem:[%s4383_s5 + $0x3e0] sm:$0xff]  ;;  %320 = vst [vmem:[%s4388_s6 + $0x1e0] sm:$0xff] %v319_v60  ;;  %322 = vst [vmem:[%s4388_s6 + $0x1e8] sm:$0xff] %v321_v61  ;;  %v325_v63 = vld [vmem:[%s4383_s5 + $0x3e8] sm:$0xff] }
  0x35   : > { %324 = vst [vmem:[%s4388_s6 + $0x1f0] sm:$0xff] %v323_v62  ;;  %326 = vst [vmem:[%s4388_s6 + $0x1f8] sm:$0xff] %v325_v63 }
  0x36 PF: > { %p3350_p8 = scmp.ge.s32.totalorder %s4299_s19, 1  ;;  %p331_p9 = scmp.lt.s32.totalorder %s4299_s19, 3 }
  0x38   : > { %p332_p10 = pnand %p3350_p8, %p331_p9 }
  0x39   : > { %v4301_v0 = vmov (!%p332_p10), 0   ;;  %vm471_vm0 = vcmask (!%p332_p10), 1043456   ;;  %v4528_v4 = vld [vmem:[%s5600_s1] sm:$0xff] (!%p332_p10)   ;;  %vm464_vm1 = vcmask (!%p332_p10), 588800   ;;  %v4536_v5 = vld [vmem:[%s5600_s1 + $0x8] sm:$0xff] (!%p332_p10)   ;;  %s338_s11 = sand.u32 (!%p332_p10), 1, %s4283_s15  }
  0x3a   : > { %335 = sbr.rel (%p332_p10) target bundleno = 3242 (0xcaa), region = 51  ;;  %v3357_v1 = vcombine.high (!%p332_p10), %v4301_v0, %v4301_v0  ;;  %v3356_v2 = vcombine.low (!%p332_p10), %v4301_v0, %v4301_v0  ;;  %510 = vmatprep.mubr.bf16.mxu0 (!%p332_p10), %v4301_v0  ;;  %863 = vmatprep.mubr.bf16.mxu1 (!%p332_p10), %v4301_v0  ;;  %s3351_s12 = sshll.u32 (!%p332_p10), %s338_s11, 9 }
  0x3b   : > { %s4544_s13 = scalar_lea.vmem (!%p332_p10), [#allocation4], %s3351_s12  ;;  %s3352_s14 = sshll.u32 (!%p332_p10), %s338_s11, 7 }
  0x3c   : > { %478 = vmatprep.subr.bf16.mxu0 (!%p332_p10), %v3357_v1  ;;  %v473_v3 = vsel (!%p332_p10), %vm471_vm0, %v3356_v2, 0  ;;  %v392_v6 = vld [vmem:[%s4544_s13] sm:$0xff] (!%p332_p10)  ;;  %v393_v7 = vld [vmem:[%s4544_s13 + $0x8] sm:$0xff] (!%p332_p10)  ;;  %v394_v9 = vld [vmem:[%s4544_s13 + $0x10] sm:$0xff] (!%p332_p10)  ;;  %s4561_s21 = scalar_lea.vmem (!%p332_p10), [#allocation6], %s3352_s14  ;;  %s4572_s15 = scalar_lea.vmem (!%p332_p10), [#allocation5], %s3352_s14 }
  0x3d   : > { %479 = vmatpush1.bf16.msra.mxu0 (!%p332_p10), %v3356_v2  ;;  %v395_v12 = vld [vmem:[%s4544_s13 + $0x18] sm:$0xff] (!%p332_p10)  ;;  %v396_v22 = vld [vmem:[%s4544_s13 + $0x20] sm:$0xff] (!%p332_p10)  ;;  %v397_v24 = vld [vmem:[%s4544_s13 + $0x28] sm:$0xff] (!%p332_p10)  ;;  %s4302_s22 = smov (!%p332_p10), 16   ;;  %s4303_s23 = smov (!%p332_p10), 17  }
  0x3e   : > { %480 = vmatprep.subr.bf16.mxu0 (!%p332_p10), %v3357_v1  ;;  %v398_v25 = vld [vmem:[%s4544_s13 + $0x30] sm:$0xff] (!%p332_p10)  ;;  %v399_v27 = vld [vmem:[%s4544_s13 + $0x38] sm:$0xff] (!%p332_p10)  ;;  %s4304_s26 = smov (!%p332_p10), 15   ;;  %s4305_s27 = smov (!%p332_p10), 1  }
  0x3f   : > { %s4306_s28 = smov (!%p332_p10), 127   ;;  %s4307_s29 = smov (!%p332_p10), 113  }
  0x40   : > { %s4308_s30 = smov (!%p332_p10), 112   ;;  %s4309_s5 = smov (!%p332_p10), 111  }
  0x41   : > { %481 = vmatpush1.bf16.msra.mxu0 %v3356_v2 }
  0x42   : > { %482 = vmatprep.subr.bf16.mxu0 %v3357_v1 }
  0x45   : > { %483 = vmatpush1.bf16.msra.mxu0 %v3356_v2 }
  0x46   : > { %484 = vmatprep.subr.bf16.mxu0 %v3357_v1 }
  0x49   : > { %485 = vmatpush1.bf16.msra.mxu0 %v3356_v2 }
  0x4a   : > { %3366 = vmatprep.subr.msk.bf16.mxu0 %vm471_vm0, %v3357_v1 }
  0x4d   : > { %487 = vmatpush1.bf16.msra.mxu0 %v473_v3  ;;  %v599_v3 = vlaneseq }
  0x50   : > { %3367 = vmatmul.mubr.msk.bf16.vlgmr.msra.gmra.mrb[0].mxu0 %vm464_vm1, %v4528_v4 }
  0x51   : > { %520 = vmatprep.mubr.bf16.mxu0 %v4301_v0 }
  0x58   : > { %3368 = vmatmul.mubr.msk.bf16.gmra.mrb[4].mxu0 %vm464_vm1, %v4536_v5 }
  0x59   : > { %1200 = vmatprep.mubr.bf16.mxu0 %v4301_v0 }
 0x123   : > { %v512_v8 = vpop.f32.mrb[0].mxu0 }
 0x124   : > { %v531_v10 = vadd.f32 %v512_v8, %v392_v6  ;;  %v514_v11 = vpop.f32.mrb[1].mxu0  ;;  %v4610_v8 = vand.u32 127, %v599_v3 }
 0x125   : > { %v532_v13 = vadd.f32 %v514_v11, %v393_v7  ;;  %v516_v14 = vpop.f32.mrb[2].mxu0 }
 0x126   : > { %v3369_v15 = vmul.f32 -1.442695, %v531_v10  ;;  %v533_v16 = vadd.f32 %v516_v14, %v394_v9  ;;  %v518_v17 = vpop.f32.mrb[3].mxu0  ;;  %vm612_vm2 = vcmp.lt.s32.totalorder %v4610_v8, 16  ;;  %vm624_vm3 = vcmp.lt.s32.totalorder %v4610_v8, 15 }
 0x127   : > { %v3370_v18 = vmul.f32 -1.442695, %v532_v13  ;;  %v534_v19 = vadd.f32 %v518_v17, %v395_v12  ;;  %vm636_vm4 = vcmp.lt.s32.totalorder %v4610_v8, 1  ;;  %vm601_vm5 = vcmp.lt.s32.totalorder %v4610_v8, 17  ;;  %v4633_v17 = vld [vmem:[%s5601_s2 + $0x38] sm:$0xff] }
 0x128   : > { %3996 = vpow2.f32 %v3369_v15  ;;  %v3371_v20 = vmul.f32 -1.442695, %v533_v16  ;;  %v4620_v15 = vld [vmem:[%s5601_s2 + $0x18] sm:$0xff]  ;;  %v4625_v16 = vld [vmem:[%s5601_s2 + $0x10] sm:$0xff]  ;;  %vm653_vm6 = vcmp.lt.s32.totalorder %v4610_v8, 127  ;;  %vm665_vm7 = vcmp.lt.s32.totalorder %v4610_v8, 113 }
 0x129   : > { %3998 = vpow2.f32 %v3370_v18  ;;  %v3372_v21 = vmul.f32 -1.442695, %v534_v19  ;;  %v4638_v18 = vld [vmem:[%s5601_s2 + $0x8] sm:$0xff]  ;;  %v4643_v19 = vld [vmem:[%s5601_s2] sm:$0xff]  ;;  %vm677_vm8 = vcmp.lt.s32.totalorder %v4610_v8, 112  ;;  %vm689_vm9 = vcmp.lt.s32.totalorder %v4610_v8, 111 }
 0x12a   : > { %4000 = vpow2.f32 %v3371_v20  ;;  %v3736_v8 = vld [vmem:[%s4544_s13 + $0x1c0] sm:$0xff] }
 0x12b   : > { %4002 = vpow2.f32 %v3372_v21  ;;  %v522_v23 = vpop.f32.mrb[4].mxu0 }
 0x12c   : > { %v524_v26 = vpop.f32.mrb[5].mxu0  ;;  %v535_v28 = vadd.f32 %v522_v23, %v396_v22 }
 0x12d   : > { %v526_v29 = vpop.f32.mrb[6].mxu0  ;;  %v536_v30 = vadd.f32 %v524_v26, %v397_v24  ;;  %v4651_v24 = vld [vmem:[%s5601_s2 + $0x28] sm:$0xff] }
 0x12e   : > { %v537_v31 = vadd.f32 %v526_v29, %v398_v25  ;;  %v528_v32 = vpop.f32.mrb[7].mxu0  ;;  %4004 = vtanh.f32 %v535_v28  ;;  %v4664_v29 = vld [vmem:[%s5601_s2 + $0x30] sm:$0xff] }
 0x12f   : > { %v538_v33 = vadd.f32 %v528_v32, %v399_v27  ;;  %4006 = vtanh.f32 %v536_v30 }
 0x130   : > { %v3373_v34 = vmul.f32 -1.442695, %v537_v31 }
 0x131   : > { %v3374_v35 = vmul.f32 -1.442695, %v538_v33 }
 0x132   : > { %v3997_v36 = vpop.eup %3996  ;;  %4008 = vpow2.f32 %v3373_v34  ;;  %v4674_v34 = vld [vmem:[%s5601_s2 + $0x58] sm:$0xff] }
 0x133   : > { %v3999_v37 = vpop.eup %3998  ;;  %v557_v38 = vadd.f32 1.0, %v3997_v36  ;;  %4010 = vpow2.f32 %v3374_v35  ;;  %v4679_v35 = vld [vmem:[%s5601_s2 + $0x20] sm:$0xff] }
 0x134   : > { %v4001_v39 = vpop.eup %4000  ;;  %v558_v40 = vadd.f32 1.0, %v3999_v37 }
 0x135   : > { %v4003_v41 = vpop.eup %4002  ;;  %4012 = vrcp.f32 %v557_v38  ;;  %v559_v42 = vadd.f32 1.0, %v4001_v39 }
 0x136   : > { %4014 = vrcp.f32 %v558_v40  ;;  %v560_v43 = vadd.f32 1.0, %v4003_v41 }
 0x137   : > { %4016 = vrcp.f32 %v559_v42 }
 0x138   : > { %4018 = vrcp.f32 %v560_v43  ;;  %v4005_v44 = vpop.eup %4004 }
 0x139   : > { %v4007_v45 = vpop.eup %4006 }
 0x13c   : > { %v4009_v46 = vpop.eup %4008 }
 0x13d   : > { %v4011_v47 = vpop.eup %4010  ;;  %v561_v51 = vadd.f32 1.0, %v4009_v46 }
 0x13e   : > { %v562_v54 = vadd.f32 1.0, %v4011_v47 }
 0x13f   : > { %v4013_v48 = vpop.eup %4012  ;;  %4020 = vrcp.f32 %v561_v51 }
 0x140   : > { %v4015_v49 = vpop.eup %4014  ;;  %v581_v50 = vmul.f32 %v4013_v48, %v4005_v44  ;;  %4022 = vrcp.f32 %v562_v54  ;;  %v4690_v44 = vld [vmem:[%s5601_s2 + $0x48] sm:$0xff] }
 0x141   : > { %v4017_v52 = vpop.eup %4016  ;;  %v582_v53 = vmul.f32 %v4015_v49, %v4007_v45  ;;  %v4695_v45 = vld [vmem:[%s5601_s2 + $0x50] sm:$0xff] }
 0x142   : > { %v4019_v55 = vpop.eup %4018  ;;  %v579_v56 = vmul.f32 0.0, %v4017_v52 }
 0x143   : > { %v580_v57 = vmul.f32 0.0, %v4019_v55 }
 0x144   : > { %v4556_v58 = vadd.f32 %v581_v50, %v579_v56  ;;  %v4713_v56 = vld [vmem:[%s5601_s2 + $0x60] sm:$0xff] }
 0x145   : > { %v4558_v59 = vadd.f32 %v582_v53, %v580_v57  ;;  %v4707_v53 = vld [vmem:[%s5601_s2 + $0x40] sm:$0xff] }
 0x146   : > { %4024 = vtanh.f32 %v4556_v58  ;;  %593 = vst [vmem:[%s4561_s21] sm:$0xff] %v4556_v58 }
 0x147   : > { %4026 = vtanh.f32 %v4558_v59  ;;  %594 = vst [vmem:[%s4561_s21 + $0x8] sm:$0xff] %v4558_v59 }
 0x149   : > { %v4021_v60 = vpop.eup %4020 }
 0x14a   : > { %v4023_v61 = vpop.eup %4022 }
 0x150   : > { %v4025_v62 = vpop.eup %4024 }
 0x151   : > { %v4027_v63 = vpop.eup %4026  ;;  %v4568_v1 = vmul.f32 %v4025_v62, %v4021_v60  ;;  %v4719_v60 = vld [vmem:[%s5601_s2 + $0x68] sm:$0xff] }
 0x152   : > { %v4570_v2 = vmul.f32 %v4027_v63, %v4023_v61  ;;  %v4728_v63 = vld [vmem:[%s5601_s2 + $0x70] sm:$0xff] }
 0x153   : > { %591 = vst [vmem:[%s4572_s15] sm:$0xff] %v4568_v1  ;;  %608 = vrot.lane.b32.xlu1 %v4568_v1, %s4302_s22  ;;  %595 = vrot.lane.b32.xlu0 %v4568_v1, %s4303_s23  ;;  %v647_v3 = vmul.f32 %v4707_v53, %v4568_v1 }
 0x154   : > { %592 = vst [vmem:[%s4572_s15 + $0x8] sm:$0xff] %v4570_v2  ;;  %v648_v52 = vmul.f32 %v4690_v44, %v4570_v2 }
 0x157   : > { %610 = vrot.lane.b32.xlu1 %v4570_v2, %s4302_s22  ;;  %620 = vrot.lane.b32.xlu0 %v4568_v1, %s4304_s26 }
 0x15b   : > { %622 = vrot.lane.b32.xlu1 %v4570_v2, %s4304_s26  ;;  %632 = vrot.lane.b32.xlu0 %v4568_v1, %s4305_s27 }
 0x15f   : > { %634 = vrot.lane.b32.xlu1 %v4570_v2, %s4305_s27  ;;  %597 = vrot.lane.b32.xlu0 %v4570_v2, %s4303_s23 }
 0x163   : > { %651 = vrot.lane.b32.xlu1 %v4570_v2, %s4306_s28  ;;  %649 = vrot.lane.b32.xlu0 %v4568_v1, %s4306_s28 }
 0x167   : > { %663 = vrot.lane.b32.xlu1 %v4570_v2, %s4307_s29  ;;  %661 = vrot.lane.b32.xlu0 %v4568_v1, %s4307_s29 }
 0x16b   : > { %675 = vrot.lane.b32.xlu1 %v4570_v2, %s4308_s30  ;;  %673 = vrot.lane.b32.xlu0 %v4568_v1, %s4308_s30 }
 0x16f   : > { %687 = vrot.lane.b32.xlu1 %v4570_v2, %s4309_s5  ;;  %685 = vrot.lane.b32.xlu0 %v4568_v1, %s4309_s5  ;;  %v4733_v2 = vld [vmem:[%s5601_s2 + $0x78] sm:$0xff] }
 0x1c5   : > { %v609_v6 = vpop.permute.xlu1 %608  ;;  %v596_v7 = vpop.permute.xlu0 %595 }
 0x1c9   : > { %v611_v9 = vpop.permute.xlu1 %610  ;;  %v621_v10 = vpop.permute.xlu0 %620 }
 0x1ca   : > { %v614_v13 = vsel %vm612_vm2, %v611_v9, %v609_v6  ;;  %v613_v14 = vsel %vm612_vm2, %v609_v6, %v611_v9 }
 0x1cb   : > { %v619_v22 = vmul.f32 %v4620_v15, %v613_v14  ;;  %v618_v23 = vmul.f32 %v4625_v16, %v614_v13 }
 0x1cd   : > { %v623_v11 = vpop.permute.xlu1 %622  ;;  %v633_v12 = vpop.permute.xlu0 %632 }
 0x1ce   : > { %v625_v25 = vsel %vm624_vm3, %v621_v10, %v623_v11  ;;  %v626_v36 = vsel %vm624_vm3, %v623_v11, %v621_v10 }
 0x1cf   : > { %v631_v37 = vmul.f32 %v4651_v24, %v625_v25  ;;  %v630_v49 = vmul.f32 %v4679_v35, %v626_v36 }
 0x1d1   : > { %v635_v20 = vpop.permute.xlu1 %634  ;;  %v598_v21 = vpop.permute.xlu0 %597 }
 0x1d2   : > { %v637_v26 = vsel %vm636_vm4, %v633_v12, %v635_v20  ;;  %v603_v27 = vsel %vm601_vm5, %v598_v21, %v596_v7  ;;  %v602_v28 = vsel %vm601_vm5, %v596_v7, %v598_v21  ;;  %v638_v30 = vsel %vm636_vm4, %v635_v20, %v633_v12  ;;  %v4749_v20 = vld [vmem:[%s5601_s2 + $0x80] sm:$0xff]  ;;  %v4754_v21 = vld [vmem:[%s5601_s2 + $0x88] sm:$0xff] }
 0x1d3   : > { %v643_v31 = vmul.f32 %v4633_v17, %v637_v26  ;;  %v607_v32 = vmul.f32 %v4638_v18, %v602_v28  ;;  %v606_v33 = vmul.f32 %v4643_v19, %v603_v27  ;;  %v642_v42 = vmul.f32 %v4664_v29, %v638_v30 }
 0x1d5   : > { %v652_v38 = vpop.permute.xlu1 %651  ;;  %v650_v39 = vpop.permute.xlu0 %649  ;;  %v3876_v40 = vpack.c.bf16 %v619_v22, %v607_v32  ;;  %v3875_v41 = vpack.c.bf16 %v618_v23, %v606_v33  ;;  %v3878_v48 = vpack.c.bf16 %v643_v31, %v631_v37  ;;  %v3877_v55 = vpack.c.bf16 %v642_v42, %v630_v49  ;;  %v3400_v37 = vld [vmem:[%s4544_s13 + $0x40] sm:$0xff] }
 0x1d6   : > { %v655_v43 = vsel %vm653_vm6, %v652_v38, %v650_v39  ;;  %v654_v46 = vsel %vm653_vm6, %v650_v39, %v652_v38  ;;  %v3401_v38 = vld [vmem:[%s4544_s13 + $0x48] sm:$0xff] }
 0x1d7   : > { %v660_v47 = vmul.f32 %v4674_v34, %v655_v43  ;;  %831 = vmatprep.subr.bf16.mxu1 %v3876_v40  ;;  %v659_v54 = vmul.f32 %v4695_v45, %v654_v46  ;;  %v3402_v40 = vld [vmem:[%s4544_s13 + $0x50] sm:$0xff]  ;;  %v3403_v43 = vld [vmem:[%s4544_s13 + $0x58] sm:$0xff] }
 0x1d8   : > { %832 = vmatpush1.bf16.msra.mxu1 %v3875_v41 }
 0x1d9   : > { %v664_v50 = vpop.permute.xlu1 %663  ;;  %833 = vmatprep.subr.bf16.mxu1 %v3878_v48  ;;  %v662_v51 = vpop.permute.xlu0 %661  ;;  %v3880_v57 = vpack.c.bf16 %v660_v47, %v648_v52  ;;  %v3879_v11 = vpack.c.bf16 %v659_v54, %v647_v3  ;;  %v3406_v3 = vld [vmem:[%s4544_s13 + $0x70] sm:$0xff] }
 0x1da   : > { %v666_v61 = vsel %vm665_vm7, %v662_v51, %v664_v50  ;;  %v667_v62 = vsel %vm665_vm7, %v664_v50, %v662_v51 }
 0x1db   : > { %v671_v12 = vmul.f32 %v4713_v56, %v666_v61  ;;  %v672_v13 = vmul.f32 %v4719_v60, %v667_v62  ;;  %v3405_v62 = vld [vmem:[%s4544_s13 + $0x68] sm:$0xff] }
 0x1dc   : > { %834 = vmatpush1.bf16.msra.mxu1 %v3877_v55 }
 0x1dd   : > { %v676_v6 = vpop.permute.xlu1 %675  ;;  %835 = vmatprep.subr.bf16.mxu1 %v3880_v57  ;;  %v674_v7 = vpop.permute.xlu0 %673  ;;  %v3404_v57 = vld [vmem:[%s4544_s13 + $0x60] sm:$0xff] }
 0x1de   : > { %v678_v9 = vsel %vm677_vm8, %v674_v7, %v676_v6  ;;  %v679_v10 = vsel %vm677_vm8, %v676_v6, %v674_v7  ;;  %v3407_v7 = vld [vmem:[%s4544_s13 + $0x78] sm:$0xff] }
 0x1df   : > { %v683_v14 = vmul.f32 %v4728_v63, %v678_v9  ;;  %v684_v1 = vmul.f32 %v4733_v2, %v679_v10 }
 0x1e0   : > { %836 = vmatpush1.bf16.msra.mxu1 %v3879_v11 }
 0x1e1   : > { %v688_v22 = vpop.permute.xlu1 %687  ;;  %v686_v23 = vpop.permute.xlu0 %685  ;;  %v3882_v25 = vpack.c.bf16 %v684_v1, %v672_v13  ;;  %v3881_v26 = vpack.c.bf16 %v683_v14, %v671_v12 }
 0x1e2   : > { %v690_v27 = vsel %vm689_vm9, %v686_v23, %v688_v22  ;;  %v691_v28 = vsel %vm689_vm9, %v688_v22, %v686_v23 }
 0x1e3   : > { %v695_v30 = vmul.f32 %v4749_v20, %v690_v27  ;;  %v696_v31 = vmul.f32 %v4754_v21, %v691_v28  ;;  %837 = vmatprep.subr.bf16.mxu1 %v3882_v25 }
 0x1e4   : > { %838 = vmatpush1.bf16.msra.mxu1 %v3881_v26 }
 0x1e5   : > { %v3883_v32 = vpack.c.bf16 %v695_v30, %v695_v30  ;;  %v3884_v33 = vpack.c.bf16 %v696_v31, %v696_v31 }
 0x1e7   : > { %3418 = vmatprep.subr.msk.bf16.mxu1 %vm471_vm0, %v3884_v33  ;;  %v826_v36 = vsel %vm471_vm0, %v3883_v32, 0 }
 0x1e8   : > { %840 = vmatpush1.bf16.msra.mxu1 %v826_v36 }
 0x1eb   : > { %3419 = vmatmul.mubr.msk.bf16.vlgmr.msra.gmra.mrb[0].mxu1 %vm464_vm1, %v4528_v4 }
 0x1ec   : > { %873 = vmatprep.mubr.bf16.mxu1 %v4301_v0 }
 0x1f3   : > { %3420 = vmatmul.mubr.msk.bf16.gmra.mrb[4].mxu1 %vm464_vm1, %v4536_v5 }
 0x1f4   : > { %1537 = vmatprep.mubr.bf16.mxu1 %v4301_v0 }
 0x2be   : > { %v865_v39 = vpop.f32.mrb[0].mxu1 }
 0x2bf   : > { %v884_v41 = vadd.f32 %v3400_v37, %v865_v39  ;;  %v867_v42 = vpop.f32.mrb[1].mxu1 }
 0x2c0   : > { %v885_v46 = vadd.f32 %v3401_v38, %v867_v42  ;;  %v869_v47 = vpop.f32.mrb[2].mxu1 }
 0x2c1   : > { %v3421_v48 = vmul.f32 -1.442695, %v884_v41  ;;  %v886_v49 = vadd.f32 %v3402_v40, %v869_v47  ;;  %v871_v50 = vpop.f32.mrb[3].mxu1 }
 0x2c2   : > { %v3422_v51 = vmul.f32 -1.442695, %v885_v46  ;;  %v887_v52 = vadd.f32 %v3403_v43, %v871_v50 }
 0x2c3   : > { %4028 = vpow2.f32 %v3421_v48  ;;  %v3423_v54 = vmul.f32 -1.442695, %v886_v49 }
 0x2c4   : > { %4030 = vpow2.f32 %v3422_v51  ;;  %v3424_v55 = vmul.f32 -1.442695, %v887_v52 }
 0x2c5   : > { %4032 = vpow2.f32 %v3423_v54 }
 0x2c6   : > { %4034 = vpow2.f32 %v3424_v55  ;;  %v875_v61 = vpop.f32.mrb[4].mxu1 }
 0x2c7   : > { %v877_v6 = vpop.f32.mrb[5].mxu1  ;;  %v888_v9 = vadd.f32 %v3404_v57, %v875_v61 }
 0x2c8   : > { %v879_v10 = vpop.f32.mrb[6].mxu1  ;;  %v889_v11 = vadd.f32 %v3405_v62, %v877_v6 }
 0x2c9   : > { %v890_v12 = vadd.f32 %v3406_v3, %v879_v10  ;;  %v881_v13 = vpop.f32.mrb[7].mxu1  ;;  %4036 = vtanh.f32 %v888_v9 }
 0x2ca   : > { %v891_v14 = vadd.f32 %v3407_v7, %v881_v13  ;;  %4038 = vtanh.f32 %v889_v11 }
 0x2cb   : > { %v3425_v1 = vmul.f32 -1.442695, %v890_v12 }
 0x2cc   : > { %v3426_v22 = vmul.f32 -1.442695, %v891_v14 }
 0x2cd   : > { %v4029_v23 = vpop.eup %4028  ;;  %4040 = vpow2.f32 %v3425_v1 }
 0x2ce   : > { %v4031_v25 = vpop.eup %4030  ;;  %v910_v26 = vadd.f32 1.0, %v4029_v23  ;;  %4042 = vpow2.f32 %v3426_v22 }
 0x2cf   : > { %v4033_v27 = vpop.eup %4032  ;;  %v911_v28 = vadd.f32 1.0, %v4031_v25 }
 0x2d0   : > { %v4035_v30 = vpop.eup %4034  ;;  %4044 = vrcp.f32 %v910_v26  ;;  %v912_v31 = vadd.f32 1.0, %v4033_v27 }
 0x2d1   : > { %4046 = vrcp.f32 %v911_v28  ;;  %v913_v32 = vadd.f32 1.0, %v4035_v30 }
 0x2d2   : > { %4048 = vrcp.f32 %v912_v31 }
 0x2d3   : > { %4050 = vrcp.f32 %v913_v32  ;;  %v4037_v33 = vpop.eup %4036 }
 0x2d4   : > { %v4039_v36 = vpop.eup %4038 }
 0x2d7   : > { %v4041_v37 = vpop.eup %4040 }
 0x2d8   : > { %v4043_v38 = vpop.eup %4042  ;;  %v914_v42 = vadd.f32 1.0, %v4041_v37 }
 0x2d9   : > { %v915_v47 = vadd.f32 1.0, %v4043_v38 }
 0x2da   : > { %v4045_v39 = vpop.eup %4044  ;;  %4052 = vrcp.f32 %v914_v42 }
 0x2db   : > { %v4047_v40 = vpop.eup %4046  ;;  %v934_v41 = vmul.f32 %v4045_v39, %v4037_v33  ;;  %4054 = vrcp.f32 %v915_v47 }
 0x2dc   : > { %v4049_v43 = vpop.eup %4048  ;;  %v935_v46 = vmul.f32 %v4047_v40, %v4039_v36 }
 0x2dd   : > { %v4051_v48 = vpop.eup %4050  ;;  %v932_v49 = vmul.f32 %v4049_v43, %v4556_v58 }
 0x2de   : > { %v933_v50 = vmul.f32 %v4051_v48, %v4558_v59 }
 0x2df   : > { %v4780_v51 = vadd.f32 %v934_v41, %v932_v49 }
 0x2e0   : > { %v4782_v52 = vadd.f32 %v935_v46, %v933_v50 }
 0x2e1   : > { %4056 = vtanh.f32 %v4780_v51  ;;  %3429 = vst [vmem:[%s4561_s21 + $0x10] sm:$0xff] %v4780_v51 }
 0x2e2   : > { %4058 = vtanh.f32 %v4782_v52  ;;  %3430 = vst [vmem:[%s4561_s21 + $0x18] sm:$0xff] %v4782_v52 }
 0x2e4   : > { %v4053_v54 = vpop.eup %4052 }
 0x2e5   : > { %v4055_v58 = vpop.eup %4054 }
 0x2eb   : > { %v4057_v55 = vpop.eup %4056 }
 0x2ec   : > { %v4059_v57 = vpop.eup %4058  ;;  %v940_v59 = vmul.f32 %v4057_v55, %v4053_v54 }
 0x2ed   : > { %v941_v61 = vmul.f32 %v4059_v57, %v4055_v58 }
 0x2ee   : > { %3427 = vst [vmem:[%s4572_s15 + $0x10] sm:$0xff] %v940_v59  ;;  %950 = vrot.lane.b32.xlu0 %v940_v59, %s4303_s23  ;;  %v992_v49 = vmul.f32 %v4707_v53, %v940_v59 }
 0x2ef   : > { %3428 = vst [vmem:[%s4572_s15 + $0x18] sm:$0xff] %v941_v61  ;;  %952 = vrot.lane.b32.xlu1 %v941_v61, %s4303_s23  ;;  %v993_v58 = vmul.f32 %v4690_v44, %v941_v61 }
 0x2f2   : > { %960 = vrot.lane.b32.xlu0 %v940_v59, %s4302_s22 }
 0x2f3   : > { %962 = vrot.lane.b32.xlu1 %v941_v61, %s4302_s22 }
 0x2f6   : > { %970 = vrot.lane.b32.xlu0 %v940_v59, %s4304_s26 }
 0x2f7   : > { %972 = vrot.lane.b32.xlu1 %v941_v61, %s4304_s26 }
 0x2fa   : > { %980 = vrot.lane.b32.xlu0 %v940_v59, %s4305_s27 }
 0x2fb   : > { %982 = vrot.lane.b32.xlu1 %v941_v61, %s4305_s27 }
 0x2fe   : > { %994 = vrot.lane.b32.xlu0 %v940_v59, %s4306_s28 }
 0x2ff   : > { %996 = vrot.lane.b32.xlu1 %v941_v61, %s4306_s28 }
 0x302   : > { %1004 = vrot.lane.b32.xlu0 %v940_v59, %s4307_s29 }
 0x303   : > { %1006 = vrot.lane.b32.xlu1 %v941_v61, %s4307_s29 }
 0x306   : > { %1014 = vrot.lane.b32.xlu0 %v940_v59, %s4308_s30 }
 0x307   : > { %1016 = vrot.lane.b32.xlu1 %v941_v61, %s4308_s30 }
 0x30a   : > { %1024 = vrot.lane.b32.xlu0 %v940_v59, %s4309_s5 }
 0x30b   : > { %1026 = vrot.lane.b32.xlu1 %v941_v61, %s4309_s5 }
 0x360   : > { %v951_v62 = vpop.permute.xlu0 %950 }
 0x361   : > { %v953_v3 = vpop.permute.xlu1 %952 }
 0x362   : > { %v954_v6 = vsel %vm601_vm5, %v951_v62, %v953_v3  ;;  %v955_v7 = vsel %vm601_vm5, %v953_v3, %v951_v62 }
 0x363   : > { %v958_v13 = vmul.f32 %v955_v7, %v4643_v19  ;;  %v959_v14 = vmul.f32 %v954_v6, %v4638_v18 }
 0x364   : > { %v961_v9 = vpop.permute.xlu0 %960 }
 0x365   : > { %v963_v10 = vpop.permute.xlu1 %962 }
 0x366   : > { %v964_v11 = vsel %vm612_vm2, %v961_v9, %v963_v10  ;;  %v965_v12 = vsel %vm612_vm2, %v963_v10, %v961_v9 }
 0x367   : > { %v968_v1 = vmul.f32 %v4625_v16, %v965_v12  ;;  %v969_v22 = vmul.f32 %v4620_v15, %v964_v11 }
 0x368   : > { %v971_v23 = vpop.permute.xlu0 %970 }
 0x369   : > { %v3885_v25 = vpack.c.bf16 %v968_v1, %v958_v13  ;;  %v973_v26 = vpop.permute.xlu1 %972  ;;  %v3886_v27 = vpack.c.bf16 %v969_v22, %v959_v14 }
 0x36a   : > { %v974_v28 = vsel %vm624_vm3, %v971_v23, %v973_v26  ;;  %v975_v30 = vsel %vm624_vm3, %v973_v26, %v971_v23 }
 0x36b   : > { %1168 = vmatprep.subr.bf16.mxu0 %v3886_v27  ;;  %v978_v37 = vmul.f32 %v4679_v35, %v975_v30  ;;  %v979_v38 = vmul.f32 %v4651_v24, %v974_v28 }
 0x36c   : > { %v981_v31 = vpop.permute.xlu0 %980  ;;  %1169 = vmatpush1.bf16.msra.mxu0 %v3885_v25 }
 0x36d   : > { %v983_v32 = vpop.permute.xlu1 %982 }
 0x36e   : > { %v984_v33 = vsel %vm636_vm4, %v981_v31, %v983_v32  ;;  %v985_v36 = vsel %vm636_vm4, %v983_v32, %v981_v31 }
 0x36f   : > { %v988_v39 = vmul.f32 %v4664_v29, %v985_v36  ;;  %v989_v40 = vmul.f32 %v4633_v17, %v984_v33  ;;  %v3456_v36 = vld [vmem:[%s4544_s13 + $0x80] sm:$0xff] }
 0x370   : > { %v995_v41 = vpop.permute.xlu0 %994 }
 0x371   : > { %v3887_v42 = vpack.c.bf16 %v988_v39, %v978_v37  ;;  %v997_v43 = vpop.permute.xlu1 %996  ;;  %v3888_v46 = vpack.c.bf16 %v989_v40, %v979_v38  ;;  %v3457_v37 = vld [vmem:[%s4544_s13 + $0x88] sm:$0xff]  ;;  %v3458_v39 = vld [vmem:[%s4544_s13 + $0x90] sm:$0xff] }
 0x372   : > { %v998_v47 = vsel %vm653_vm6, %v995_v41, %v997_v43  ;;  %v999_v48 = vsel %vm653_vm6, %v997_v43, %v995_v41 }
 0x373   : > { %v1002_v50 = vmul.f32 %v4695_v45, %v998_v47  ;;  %v1003_v54 = vmul.f32 %v4674_v34, %v999_v48  ;;  %1170 = vmatprep.subr.bf16.mxu0 %v3888_v46 }
 0x374   : > { %v1005_v55 = vpop.permute.xlu0 %1004  ;;  %1171 = vmatpush1.bf16.msra.mxu0 %v3887_v42  ;;  %v3459_v42 = vld [vmem:[%s4544_s13 + $0x98] sm:$0xff] }
 0x375   : > { %v3889_v57 = vpack.c.bf16 %v1002_v50, %v992_v49  ;;  %v1007_v62 = vpop.permute.xlu1 %1006  ;;  %v3890_v3 = vpack.c.bf16 %v1003_v54, %v993_v58  ;;  %v3460_v58 = vld [vmem:[%s4544_s13 + $0xa0] sm:$0xff] }
 0x376   : > { %v1008_v6 = vsel %vm665_vm7, %v1005_v55, %v1007_v62  ;;  %v1009_v7 = vsel %vm665_vm7, %v1007_v62, %v1005_v55  ;;  %v3462_v62 = vld [vmem:[%s4544_s13 + $0xb0] sm:$0xff] }
 0x377   : > { %1172 = vmatprep.subr.bf16.mxu0 %v3890_v3  ;;  %v1012_v11 = vmul.f32 %v4713_v56, %v1008_v6  ;;  %v1013_v12 = vmul.f32 %v4719_v60, %v1009_v7  ;;  %v3463_v6 = vld [vmem:[%s4544_s13 + $0xb8] sm:$0xff] }
 0x378   : > { %v1015_v59 = vpop.permute.xlu0 %1014  ;;  %1173 = vmatpush1.bf16.msra.mxu0 %v3889_v57  ;;  %v3461_v57 = vld [vmem:[%s4544_s13 + $0xa8] sm:$0xff] }
 0x379   : > { %v1017_v9 = vpop.permute.xlu1 %1016 }
 0x37a   : > { %v1018_v10 = vsel %vm677_vm8, %v1015_v59, %v1017_v9  ;;  %v1019_v61 = vsel %vm677_vm8, %v1017_v9, %v1015_v59 }
 0x37b   : > { %v1022_v13 = vmul.f32 %v4728_v63, %v1018_v10  ;;  %v1023_v14 = vmul.f32 %v4733_v2, %v1019_v61 }
 0x37c   : > { %v1025_v1 = vpop.permute.xlu0 %1024 }
 0x37d   : > { %v3891_v22 = vpack.c.bf16 %v1022_v13, %v1012_v11  ;;  %v1027_v23 = vpop.permute.xlu1 %1026  ;;  %v3892_v25 = vpack.c.bf16 %v1023_v14, %v1013_v12 }
 0x37e   : > { %v1028_v26 = vsel %vm689_vm9, %v1025_v1, %v1027_v23  ;;  %v1029_v27 = vsel %vm689_vm9, %v1027_v23, %v1025_v1 }
 0x37f   : > { %v1032_v28 = vmul.f32 %v4749_v20, %v1028_v26  ;;  %v1033_v30 = vmul.f32 %v4754_v21, %v1029_v27  ;;  %1174 = vmatprep.subr.bf16.mxu0 %v3892_v25 }
 0x380   : > { %1175 = vmatpush1.bf16.msra.mxu0 %v3891_v22 }
 0x381   : > { %v3893_v31 = vpack.c.bf16 %v1032_v28, %v1032_v28  ;;  %v3894_v32 = vpack.c.bf16 %v1033_v30, %v1033_v30 }
 0x383   : > { %3474 = vmatprep.subr.msk.bf16.mxu0 %vm471_vm0, %v3894_v32  ;;  %v1163_v33 = vsel %vm471_vm0, %v3893_v31, 0 }
 0x384   : > { %1177 = vmatpush1.bf16.msra.mxu0 %v1163_v33 }
 0x387   : > { %3475 = vmatmul.mubr.msk.bf16.vlgmr.msra.gmra.mrb[8].mxu0 %vm464_vm1, %v4528_v4 }
 0x388   : > { %1210 = vmatprep.mubr.bf16.mxu0 %v4301_v0 }
 0x38f   : > { %3476 = vmatmul.mubr.msk.bf16.gmra.mrb[12].mxu0 %vm464_vm1, %v4536_v5 }
 0x390   : > { %1874 = vmatprep.mubr.bf16.mxu0 %v4301_v0 }
 0x45a   : > { %v1202_v38 = vpop.f32.mrb[8].mxu0 }
 0x45b   : > { %v1221_v40 = vadd.f32 %v3456_v36, %v1202_v38  ;;  %v1204_v41 = vpop.f32.mrb[9].mxu0 }
 0x45c   : > { %v1222_v43 = vadd.f32 %v3457_v37, %v1204_v41  ;;  %v1206_v46 = vpop.f32.mrb[10].mxu0 }
 0x45d   : > { %v3477_v4 = vmul.f32 -1.442695, %v1221_v40  ;;  %v1223_v47 = vadd.f32 %v3458_v39, %v1206_v46  ;;  %v1208_v48 = vpop.f32.mrb[11].mxu0 }
 0x45e   : > { %v3478_v49 = vmul.f32 -1.442695, %v1222_v43  ;;  %v1224_v5 = vadd.f32 %v3459_v42, %v1208_v48 }
 0x45f   : > { %4060 = vpow2.f32 %v3477_v4  ;;  %v3479_v50 = vmul.f32 -1.442695, %v1223_v47 }
 0x460   : > { %4062 = vpow2.f32 %v3478_v49  ;;  %v3480_v54 = vmul.f32 -1.442695, %v1224_v5 }
 0x461   : > { %4064 = vpow2.f32 %v3479_v50 }
 0x462   : > { %4066 = vpow2.f32 %v3480_v54  ;;  %v1212_v55 = vpop.f32.mrb[12].mxu0 }
 0x463   : > { %v1214_v3 = vpop.f32.mrb[13].mxu0  ;;  %v1225_v7 = vadd.f32 %v3460_v58, %v1212_v55 }
 0x464   : > { %v1216_v59 = vpop.f32.mrb[14].mxu0  ;;  %v1226_v9 = vadd.f32 %v3461_v57, %v1214_v3 }
 0x465   : > { %v1227_v10 = vadd.f32 %v3462_v62, %v1216_v59  ;;  %v1218_v61 = vpop.f32.mrb[15].mxu0  ;;  %4068 = vtanh.f32 %v1225_v7 }
 0x466   : > { %v1228_v11 = vadd.f32 %v3463_v6, %v1218_v61  ;;  %4070 = vtanh.f32 %v1226_v9 }
 0x467   : > { %v3481_v12 = vmul.f32 -1.442695, %v1227_v10 }
 0x468   : > { %v3482_v13 = vmul.f32 -1.442695, %v1228_v11 }
 0x469   : > { %v4061_v14 = vpop.eup %4060  ;;  %4072 = vpow2.f32 %v3481_v12 }
 0x46a   : > { %v4063_v1 = vpop.eup %4062  ;;  %v1247_v22 = vadd.f32 1.0, %v4061_v14  ;;  %4074 = vpow2.f32 %v3482_v13 }
 0x46b   : > { %v4065_v23 = vpop.eup %4064  ;;  %v1248_v25 = vadd.f32 1.0, %v4063_v1 }
 0x46c   : > { %v4067_v26 = vpop.eup %4066  ;;  %4076 = vrcp.f32 %v1247_v22  ;;  %v1249_v27 = vadd.f32 1.0, %v4065_v23 }
 0x46d   : > { %4078 = vrcp.f32 %v1248_v25  ;;  %v1250_v28 = vadd.f32 1.0, %v4067_v26 }
 0x46e   : > { %4080 = vrcp.f32 %v1249_v27 }
 0x46f   : > { %4082 = vrcp.f32 %v1250_v28  ;;  %v4069_v30 = vpop.eup %4068 }
 0x470   : > { %v4071_v31 = vpop.eup %4070 }
 0x473   : > { %v4073_v32 = vpop.eup %4072 }
 0x474   : > { %v4075_v33 = vpop.eup %4074  ;;  %v1251_v39 = vadd.f32 1.0, %v4073_v32 }
 0x475   : > { %v1252_v42 = vadd.f32 1.0, %v4075_v33 }
 0x476   : > { %v4077_v36 = vpop.eup %4076  ;;  %4084 = vrcp.f32 %v1251_v39 }
 0x477   : > { %v4079_v37 = vpop.eup %4078  ;;  %v1271_v38 = vmul.f32 %v4077_v36, %v4069_v30  ;;  %4086 = vrcp.f32 %v1252_v42 }
 0x478   : > { %v4081_v40 = vpop.eup %4080  ;;  %v1272_v41 = vmul.f32 %v4079_v37, %v4071_v31 }
 0x479   : > { %v4083_v43 = vpop.eup %4082  ;;  %v1269_v46 = vmul.f32 %v4081_v40, %v4780_v51 }
 0x47a   : > { %v1270_v4 = vmul.f32 %v4083_v43, %v4782_v52 }
 0x47b   : > { %v4876_v47 = vadd.f32 %v1271_v38, %v1269_v46 }
 0x47c   : > { %v4878_v48 = vadd.f32 %v1272_v41, %v1270_v4 }
 0x47d   : > { %4088 = vtanh.f32 %v4876_v47  ;;  %3485 = vst [vmem:[%s4561_s21 + $0x20] sm:$0xff] %v4876_v47 }
 0x47e   : > { %4090 = vtanh.f32 %v4878_v48  ;;  %3486 = vst [vmem:[%s4561_s21 + $0x28] sm:$0xff] %v4878_v48 }
 0x480   : > { %v4085_v49 = vpop.eup %4084 }
 0x481   : > { %v4087_v51 = vpop.eup %4086 }
 0x487   : > { %v4089_v5 = vpop.eup %4088 }
 0x488   : > { %v4091_v50 = vpop.eup %4090  ;;  %v1277_v52 = vmul.f32 %v4089_v5, %v4085_v49 }
 0x489   : > { %v1278_v54 = vmul.f32 %v4091_v50, %v4087_v51 }
 0x48a   : > { %3483 = vst [vmem:[%s4572_s15 + $0x20] sm:$0xff] %v1277_v52  ;;  %1287 = vrot.lane.b32.xlu0 %v1277_v52, %s4303_s23  ;;  %v1329_v38 = vmul.f32 %v4707_v53, %v1277_v52 }
 0x48b   : > { %3484 = vst [vmem:[%s4572_s15 + $0x28] sm:$0xff] %v1278_v54  ;;  %1289 = vrot.lane.b32.xlu1 %v1278_v54, %s4303_s23 }
 0x48e   : > { %1297 = vrot.lane.b32.xlu0 %v1277_v52, %s4302_s22 }
 0x48f   : > { %1299 = vrot.lane.b32.xlu1 %v1278_v54, %s4302_s22 }
 0x492   : > { %1307 = vrot.lane.b32.xlu0 %v1277_v52, %s4304_s26 }
 0x493   : > { %1309 = vrot.lane.b32.xlu1 %v1278_v54, %s4304_s26 }
 0x496   : > { %1317 = vrot.lane.b32.xlu0 %v1277_v52, %s4305_s27 }
 0x497   : > { %1319 = vrot.lane.b32.xlu1 %v1278_v54, %s4305_s27 }
 0x49a   : > { %1331 = vrot.lane.b32.xlu0 %v1277_v52, %s4306_s28 }
 0x49b   : > { %1333 = vrot.lane.b32.xlu1 %v1278_v54, %s4306_s28 }
 0x49e   : > { %1341 = vrot.lane.b32.xlu0 %v1277_v52, %s4307_s29 }
 0x49f   : > { %1343 = vrot.lane.b32.xlu1 %v1278_v54, %s4307_s29 }
 0x4a2   : > { %1351 = vrot.lane.b32.xlu0 %v1277_v52, %s4308_s30 }
 0x4a3   : > { %1353 = vrot.lane.b32.xlu1 %v1278_v54, %s4308_s30 }
 0x4a6   : > { %1361 = vrot.lane.b32.xlu0 %v1277_v52, %s4309_s5 }
 0x4a7   : > { %1363 = vrot.lane.b32.xlu1 %v1278_v54, %s4309_s5 }
 0x4fc   : > { %v1288_v58 = vpop.permute.xlu0 %1287 }
 0x4fd   : > { %v1290_v55 = vpop.permute.xlu1 %1289 }
 0x4fe   : > { %v1291_v57 = vsel %vm601_vm5, %v1288_v58, %v1290_v55  ;;  %v1292_v62 = vsel %vm601_vm5, %v1290_v55, %v1288_v58 }
 0x4ff   : > { %v1295_v9 = vmul.f32 %v1292_v62, %v4643_v19  ;;  %v1296_v10 = vmul.f32 %v1291_v57, %v4638_v18  ;;  %v4959_v62 = vld [vmem:[%s5600_s1] sm:$0xff]  }
 0x500   : > { %v1298_v3 = vpop.permute.xlu0 %1297 }
 0x501   : > { %v1300_v6 = vpop.permute.xlu1 %1299 }
 0x502   : > { %v1301_v7 = vsel %vm612_vm2, %v1298_v3, %v1300_v6  ;;  %v1302_v59 = vsel %vm612_vm2, %v1300_v6, %v1298_v3  ;;  %v3513_v3 = vld [vmem:[%s4544_s13 + $0xc8] sm:$0xff] }
 0x503   : > { %v1305_v61 = vmul.f32 %v4625_v16, %v1302_v59  ;;  %v1306_v11 = vmul.f32 %v4620_v15, %v1301_v7  ;;  %v3514_v7 = vld [vmem:[%s4544_s13 + $0xd0] sm:$0xff] }
 0x504   : > { %v1308_v12 = vpop.permute.xlu0 %1307 }
 0x505   : > { %v3895_v13 = vpack.c.bf16 %v1305_v61, %v1295_v9  ;;  %v1310_v14 = vpop.permute.xlu1 %1309  ;;  %v3896_v1 = vpack.c.bf16 %v1306_v11, %v1296_v10  ;;  %v3515_v10 = vld [vmem:[%s4544_s13 + $0xd8] sm:$0xff] }
 0x506   : > { %v1311_v22 = vsel %vm624_vm3, %v1308_v12, %v1310_v14  ;;  %v1312_v23 = vsel %vm624_vm3, %v1310_v14, %v1308_v12 }
 0x507   : > { %1505 = vmatprep.subr.bf16.mxu1 %v3896_v1  ;;  %v1315_v16 = vmul.f32 %v4679_v35, %v1312_v23  ;;  %v1316_v26 = vmul.f32 %v4651_v24, %v1311_v22 }
 0x508   : > { %v1318_v25 = vpop.permute.xlu0 %1317  ;;  %1506 = vmatpush1.bf16.msra.mxu1 %v3895_v13 }
 0x509   : > { %v1320_v19 = vpop.permute.xlu1 %1319 }
 0x50a   : > { %v1321_v18 = vsel %vm636_vm4, %v1318_v25, %v1320_v19  ;;  %v1322_v15 = vsel %vm636_vm4, %v1320_v19, %v1318_v25  ;;  %v3516_v19 = vld [vmem:[%s4544_s13 + $0xe0] sm:$0xff] }
 0x50b   : > { %v1325_v27 = vmul.f32 %v4664_v29, %v1322_v15  ;;  %v1326_v28 = vmul.f32 %v4633_v17, %v1321_v18  ;;  %v1330_v29 = vmul.f32 %v4690_v44, %v1278_v54  ;;  %v3517_v15 = vld [vmem:[%s4544_s13 + $0xe8] sm:$0xff] }
 0x50c   : > { %v1332_v30 = vpop.permute.xlu0 %1331 }
 0x50d   : > { %v3897_v31 = vpack.c.bf16 %v1325_v27, %v1315_v16  ;;  %v1334_v32 = vpop.permute.xlu1 %1333  ;;  %v3898_v33 = vpack.c.bf16 %v1326_v28, %v1316_v26  ;;  %v3518_v16 = vld [vmem:[%s4544_s13 + $0xf0] sm:$0xff]  ;;  %v3519_v27 = vld [vmem:[%s4544_s13 + $0xf8] sm:$0xff] }
 0x50e   : > { %v1335_v36 = vsel %vm653_vm6, %v1332_v30, %v1334_v32  ;;  %v1336_v37 = vsel %vm653_vm6, %v1334_v32, %v1332_v30 }
 0x50f   : > { %v1339_v35 = vmul.f32 %v4695_v45, %v1335_v36  ;;  %v1340_v24 = vmul.f32 %v4674_v34, %v1336_v37  ;;  %1507 = vmatprep.subr.bf16.mxu1 %v3898_v33 }
 0x510   : > { %v1342_v17 = vpop.permute.xlu0 %1341  ;;  %1508 = vmatpush1.bf16.msra.mxu1 %v3897_v31 }
 0x511   : > { %v3899_v39 = vpack.c.bf16 %v1339_v35, %v1329_v38  ;;  %v1344_v40 = vpop.permute.xlu1 %1343  ;;  %v3900_v41 = vpack.c.bf16 %v1340_v24, %v1330_v29 }
 0x512   : > { %v1345_v42 = vsel %vm665_vm7, %v1342_v17, %v1344_v40  ;;  %v1346_v43 = vsel %vm665_vm7, %v1344_v40, %v1342_v17 }
 0x513   : > { %1509 = vmatprep.subr.bf16.mxu1 %v3900_v41  ;;  %v1349_v46 = vmul.f32 %v4713_v56, %v1345_v42  ;;  %v1350_v4 = vmul.f32 %v4719_v60, %v1346_v43 }
 0x514   : > { %v1352_v53 = vpop.permute.xlu0 %1351  ;;  %1510 = vmatpush1.bf16.msra.mxu1 %v3899_v39 }
 0x515   : > { %v1354_v45 = vpop.permute.xlu1 %1353 }
 0x516   : > { %v1355_v34 = vsel %vm677_vm8, %v1352_v53, %v1354_v45  ;;  %v1356_v44 = vsel %vm677_vm8, %v1354_v45, %v1352_v53 }
 0x517   : > { %v1359_v49 = vmul.f32 %v4728_v63, %v1355_v34  ;;  %v1360_v51 = vmul.f32 %v4733_v2, %v1356_v44 }
 0x518   : > { %v1362_v5 = vpop.permute.xlu0 %1361 }
 0x519   : > { %v3901_v50 = vpack.c.bf16 %v1359_v49, %v1349_v46  ;;  %v1364_v52 = vpop.permute.xlu1 %1363  ;;  %v3902_v54 = vpack.c.bf16 %v1360_v51, %v1350_v4 }
 0x51a   : > { %v1365_v58 = vsel %vm689_vm9, %v1362_v5, %v1364_v52  ;;  %v1366_v55 = vsel %vm689_vm9, %v1364_v52, %v1362_v5 }
 0x51b   : > { %v1369_v57 = vmul.f32 %v4749_v20, %v1365_v58  ;;  %v1370_v56 = vmul.f32 %v4754_v21, %v1366_v55  ;;  %1511 = vmatprep.subr.bf16.mxu1 %v3902_v54  ;;  %v4967_v20 = vld [vmem:[%s5600_s1 + $0x8] sm:$0xff]   ;;  %v3512_v21 = vld [vmem:[%s4544_s13 + $0xc0] sm:$0xff] }
 0x51c   : > { %1512 = vmatpush1.bf16.msra.mxu1 %v3901_v50 }
 0x51d   : > { %v3903_v60 = vpack.c.bf16 %v1369_v57, %v1369_v57  ;;  %v3904_v63 = vpack.c.bf16 %v1370_v56, %v1370_v56 }
 0x51f   : > { %3530 = vmatprep.subr.msk.bf16.mxu1 %vm471_vm0, %v3904_v63  ;;  %v1500_v2 = vsel %vm471_vm0, %v3903_v60, 0 }
 0x520   : > { %1514 = vmatpush1.bf16.msra.mxu1 %v1500_v2 }
 0x523   : > { %3531 = vmatmul.mubr.msk.bf16.vlgmr.msra.gmra.mrb[8].mxu1 %vm464_vm1, %v4959_v62 }
 0x524   : > { %1547 = vmatprep.mubr.bf16.mxu1 %v4301_v0 }
 0x52b   : > { %3532 = vmatmul.mubr.msk.bf16.gmra.mrb[12].mxu1 %vm464_vm1, %v4967_v20 }
 0x52c   : > { %2211 = vmatprep.mubr.bf16.mxu1 %v4301_v0 }
 0x5f6   : > { %v1539_v6 = vpop.f32.mrb[8].mxu1 }
 0x5f7   : > { %v1558_v59 = vadd.f32 %v3512_v21, %v1539_v6  ;;  %v1541_v9 = vpop.f32.mrb[9].mxu1 }
 0x5f8   : > { %v1559_v61 = vadd.f32 %v3513_v3, %v1541_v9  ;;  %v1543_v11 = vpop.f32.mrb[10].mxu1 }
 0x5f9   : > { %v3533_v12 = vmul.f32 -1.442695, %v1558_v59  ;;  %v1560_v13 = vadd.f32 %v3514_v7, %v1543_v11  ;;  %v1545_v14 = vpop.f32.mrb[11].mxu1  ;;  %v4254_v11 = vld [vmem:[%s5601_s2] sm:$0xff] }
 0x5fa   : > { %v3534_v1 = vmul.f32 -1.442695, %v1559_v61  ;;  %v1561_v22 = vadd.f32 %v3515_v10, %v1545_v14 }
 0x5fb   : > { %4092 = vpow2.f32 %v3533_v12  ;;  %v3535_v23 = vmul.f32 -1.442695, %v1560_v13  ;;  %v4255_v13 = vld [vmem:[%s5601_s2 + $0x8] sm:$0xff] }
 0x5fc   : > { %4094 = vpow2.f32 %v3534_v1  ;;  %v3536_v25 = vmul.f32 -1.442695, %v1561_v22  ;;  %v4256_v1 = vld [vmem:[%s5601_s2 + $0x10] sm:$0xff] }
 0x5fd   : > { %4096 = vpow2.f32 %v3535_v23  ;;  %v4257_v23 = vld [vmem:[%s5601_s2 + $0x18] sm:$0xff] }
 0x5fe   : > { %4098 = vpow2.f32 %v3536_v25  ;;  %v1549_v18 = vpop.f32.mrb[12].mxu1 }
 0x5ff   : > { %v1551_v26 = vpop.f32.mrb[13].mxu1  ;;  %v1562_v28 = vadd.f32 %v3516_v19, %v1549_v18 }
 0x600   : > { %v1553_v30 = vpop.f32.mrb[14].mxu1  ;;  %v1563_v31 = vadd.f32 %v3517_v15, %v1551_v26  ;;  %v5055_v26 = vld [vmem:[%s5601_s2 + $0x20] sm:$0xff] }
 0x601   : > { %v1564_v32 = vadd.f32 %v3518_v16, %v1553_v30  ;;  %v1555_v33 = vpop.f32.mrb[15].mxu1  ;;  %4100 = vtanh.f32 %v1562_v28 }
 0x602   : > { %v1565_v36 = vadd.f32 %v3519_v27, %v1555_v33  ;;  %4102 = vtanh.f32 %v1563_v31  ;;  %v5060_v27 = vld [vmem:[%s5601_s2 + $0x28] sm:$0xff]  ;;  %v5074_v33 = vld [vmem:[%s5601_s2 + $0x38] sm:$0xff] }
 0x603   : > { %v3537_v37 = vmul.f32 -1.442695, %v1564_v32  ;;  %v5069_v32 = vld [vmem:[%s5601_s2 + $0x30] sm:$0xff] }
 0x604   : > { %v3538_v38 = vmul.f32 -1.442695, %v1565_v36 }
 0x605   : > { %v4093_v35 = vpop.eup %4092  ;;  %4104 = vpow2.f32 %v3537_v37 }
 0x606   : > { %v4095_v24 = vpop.eup %4094  ;;  %v1584_v29 = vadd.f32 1.0, %v4093_v35  ;;  %4106 = vpow2.f32 %v3538_v38 }
 0x607   : > { %v4097_v17 = vpop.eup %4096  ;;  %v1585_v39 = vadd.f32 1.0, %v4095_v24 }
 0x608   : > { %v4099_v40 = vpop.eup %4098  ;;  %4108 = vrcp.f32 %v1584_v29  ;;  %v1586_v41 = vadd.f32 1.0, %v4097_v17 }
 0x609   : > { %4110 = vrcp.f32 %v1585_v39  ;;  %v1587_v42 = vadd.f32 1.0, %v4099_v40  ;;  %v5087_v40 = vld [vmem:[%s5601_s2 + $0x50] sm:$0xff] }
 0x60a   : > { %4112 = vrcp.f32 %v1586_v41  ;;  %v5092_v41 = vld [vmem:[%s5601_s2 + $0x58] sm:$0xff] }
 0x60b   : > { %4114 = vrcp.f32 %v1587_v42  ;;  %v4101_v43 = vpop.eup %4100  ;;  %v5097_v42 = vld [vmem:[%s5601_s2 + $0x48] sm:$0xff] }
 0x60c   : > { %v4103_v53 = vpop.eup %4102 }
 0x60f   : > { %v4105_v45 = vpop.eup %4104 }
 0x610   : > { %v4107_v34 = vpop.eup %4106  ;;  %v1588_v49 = vadd.f32 1.0, %v4105_v45 }
 0x611   : > { %v1589_v50 = vadd.f32 1.0, %v4107_v34 }
 0x612   : > { %v4109_v44 = vpop.eup %4108  ;;  %4116 = vrcp.f32 %v1588_v49 }
 0x613   : > { %v4111_v46 = vpop.eup %4110  ;;  %v1608_v4 = vmul.f32 %v4109_v44, %v4101_v43  ;;  %4118 = vrcp.f32 %v1589_v50 }
 0x614   : > { %v4113_v51 = vpop.eup %4112  ;;  %v1609_v5 = vmul.f32 %v4111_v46, %v4103_v53  ;;  %v4258_v46 = vld [vmem:[%s5601_s2 + $0x40] sm:$0xff] }
 0x615   : > { %v4115_v52 = vpop.eup %4114  ;;  %v1606_v54 = vmul.f32 %v4113_v51, %v4876_v47 }
 0x616   : > { %v1607_v58 = vmul.f32 %v4115_v52, %v4878_v48 }
 0x617   : > { %v4982_v55 = vadd.f32 %v1608_v4, %v1606_v54 }
 0x618   : > { %v4984_v57 = vadd.f32 %v1609_v5, %v1607_v58 }
 0x619   : > { %4120 = vtanh.f32 %v4982_v55  ;;  %3541 = vst [vmem:[%s4561_s21 + $0x30] sm:$0xff] %v4982_v55 }
 0x61a   : > { %4122 = vtanh.f32 %v4984_v57  ;;  %3542 = vst [vmem:[%s4561_s21 + $0x38] sm:$0xff] %v4984_v57 }
 0x61c   : > { %v4117_v56 = vpop.eup %4116 }
 0x61d   : > { %v4119_v47 = vpop.eup %4118 }
 0x623   : > { %v4121_v60 = vpop.eup %4120 }
 0x624   : > { %v4123_v63 = vpop.eup %4122  ;;  %v4992_v48 = vmul.f32 %v4121_v60, %v4117_v56  ;;  %v5114_v56 = vld [vmem:[%s5601_s2 + $0x60] sm:$0xff] }
 0x625   : > { %v4994_v2 = vmul.f32 %v4123_v63, %v4119_v47  ;;  %v5119_v47 = vld [vmem:[%s5601_s2 + $0x68] sm:$0xff] }
 0x626   : > { %3539 = vst [vmem:[%s4572_s15 + $0x30] sm:$0xff] %v4992_v48  ;;  %1624 = vrot.lane.b32.xlu0 %v4992_v48, %s4303_s23  ;;  %v1666_v4 = vmul.f32 %v4258_v46, %v4992_v48 }
 0x627   : > { %3540 = vst [vmem:[%s4572_s15 + $0x38] sm:$0xff] %v4994_v2  ;;  %1626 = vrot.lane.b32.xlu1 %v4994_v2, %s4303_s23  ;;  %v1667_v5 = vmul.f32 %v5097_v42, %v4994_v2 }
 0x62a   : > { %1634 = vrot.lane.b32.xlu0 %v4992_v48, %s4302_s22 }
 0x62b   : > { %1636 = vrot.lane.b32.xlu1 %v4994_v2, %s4302_s22 }
 0x62e   : > { %1644 = vrot.lane.b32.xlu0 %v4992_v48, %s4304_s26 }
 0x62f   : > { %1646 = vrot.lane.b32.xlu1 %v4994_v2, %s4304_s26 }
 0x632   : > { %1654 = vrot.lane.b32.xlu0 %v4992_v48, %s4305_s27 }
 0x633   : > { %1656 = vrot.lane.b32.xlu1 %v4994_v2, %s4305_s27 }
 0x636   : > { %1668 = vrot.lane.b32.xlu0 %v4992_v48, %s4306_s28 }
 0x637   : > { %1670 = vrot.lane.b32.xlu1 %v4994_v2, %s4306_s28 }
 0x63a   : > { %1678 = vrot.lane.b32.xlu0 %v4992_v48, %s4307_s29 }
 0x63b   : > { %1680 = vrot.lane.b32.xlu1 %v4994_v2, %s4307_s29 }
 0x63e   : > { %1688 = vrot.lane.b32.xlu0 %v4992_v48, %s4308_s30 }
 0x63f   : > { %1690 = vrot.lane.b32.xlu1 %v4994_v2, %s4308_s30 }
 0x642   : > { %1698 = vrot.lane.b32.xlu0 %v4992_v48, %s4309_s5 }
 0x643   : > { %1700 = vrot.lane.b32.xlu1 %v4994_v2, %s4309_s5  ;;  %v5128_v2 = vld [vmem:[%s5601_s2 + $0x70] sm:$0xff] }
 0x698   : > { %v1625_v21 = vpop.permute.xlu0 %1624 }
 0x699   : > { %v1627_v3 = vpop.permute.xlu1 %1626 }
 0x69a   : > { %v1628_v6 = vsel %vm601_vm5, %v1625_v21, %v1627_v3  ;;  %v1629_v7 = vsel %vm601_vm5, %v1627_v3, %v1625_v21  ;;  %v5133_v21 = vld [vmem:[%s5601_s2 + $0x78] sm:$0xff] }
 0x69b   : > { %v1632_v12 = vmul.f32 %v4254_v11, %v1629_v7  ;;  %v1633_v14 = vmul.f32 %v4255_v13, %v1628_v6  ;;  %v5151_v13 = vld [vmem:[%s5601_s2 + $0x88] sm:$0xff] }
 0x69c   : > { %v1635_v59 = vpop.permute.xlu0 %1634 }
 0x69d   : > { %v1637_v9 = vpop.permute.xlu1 %1636 }
 0x69e   : > { %v1638_v10 = vsel %vm612_vm2, %v1635_v59, %v1637_v9  ;;  %v1639_v61 = vsel %vm612_vm2, %v1637_v9, %v1635_v59 }
 0x69f   : > { %v1642_v22 = vmul.f32 %v4256_v1, %v1639_v61  ;;  %v1643_v25 = vmul.f32 %v4257_v23, %v1638_v10 }
 0x6a0   : > { %v1645_v19 = vpop.permute.xlu0 %1644 }
 0x6a1   : > { %v3905_v18 = vpack.c.bf16 %v1642_v22, %v1632_v12  ;;  %v1647_v15 = vpop.permute.xlu1 %1646  ;;  %v3906_v16 = vpack.c.bf16 %v1643_v25, %v1633_v14  ;;  %v5146_v12 = vld [vmem:[%s5601_s2 + $0x80] sm:$0xff] }
 0x6a2   : > { %v1648_v28 = vsel %vm624_vm3, %v1645_v19, %v1647_v15  ;;  %v1649_v30 = vsel %vm624_vm3, %v1647_v15, %v1645_v19 }
 0x6a3   : > { %1842 = vmatprep.subr.bf16.mxu0 %v3906_v16  ;;  %v1652_v35 = vmul.f32 %v5055_v26, %v1649_v30  ;;  %v1653_v24 = vmul.f32 %v5060_v27, %v1648_v28  ;;  %v3568_v30 = vld [vmem:[%s4544_s13 + $0x100] sm:$0xff] }
 0x6a4   : > { %v1655_v31 = vpop.permute.xlu0 %1654  ;;  %1843 = vmatpush1.bf16.msra.mxu0 %v3905_v18 }
 0x6a5   : > { %v1657_v36 = vpop.permute.xlu1 %1656 }
 0x6a6   : > { %v1658_v37 = vsel %vm636_vm4, %v1655_v31, %v1657_v36  ;;  %v1659_v38 = vsel %vm636_vm4, %v1657_v36, %v1655_v31  ;;  %v3569_v31 = vld [vmem:[%s4544_s13 + $0x108] sm:$0xff] }
 0x6a7   : > { %v1662_v29 = vmul.f32 %v5069_v32, %v1659_v38  ;;  %v1663_v17 = vmul.f32 %v5074_v33, %v1658_v37  ;;  %v3570_v37 = vld [vmem:[%s4544_s13 + $0x110] sm:$0xff] }
 0x6a8   : > { %v1669_v39 = vpop.permute.xlu0 %1668 }
 0x6a9   : > { %v3907_v43 = vpack.c.bf16 %v1662_v29, %v1652_v35  ;;  %v1671_v53 = vpop.permute.xlu1 %1670  ;;  %v3908_v45 = vpack.c.bf16 %v1663_v17, %v1653_v24  ;;  %v3571_v24 = vld [vmem:[%s4544_s13 + $0x118] sm:$0xff] }
 0x6aa   : > { %v1672_v34 = vsel %vm653_vm6, %v1669_v39, %v1671_v53  ;;  %v1673_v44 = vsel %vm653_vm6, %v1671_v53, %v1669_v39 }
 0x6ab   : > { %v1676_v49 = vmul.f32 %v5087_v40, %v1672_v34  ;;  %v1677_v51 = vmul.f32 %v5092_v41, %v1673_v44  ;;  %1844 = vmatprep.subr.bf16.mxu0 %v3908_v45 }
 0x6ac   : > { %v1679_v50 = vpop.permute.xlu0 %1678  ;;  %1845 = vmatpush1.bf16.msra.mxu0 %v3907_v43 }
 0x6ad   : > { %v3909_v52 = vpack.c.bf16 %v1676_v49, %v1666_v4  ;;  %v1681_v54 = vpop.permute.xlu1 %1680  ;;  %v3910_v58 = vpack.c.bf16 %v1677_v51, %v1667_v5  ;;  %v3572_v4 = vld [vmem:[%s4544_s13 + $0x120] sm:$0xff]  ;;  %v3573_v51 = vld [vmem:[%s4544_s13 + $0x128] sm:$0xff]  ;;  %v3574_v5 = vld [vmem:[%s4544_s13 + $0x130] sm:$0xff] }
 0x6ae   : > { %v1682_v60 = vsel %vm665_vm7, %v1679_v50, %v1681_v54  ;;  %v1683_v63 = vsel %vm665_vm7, %v1681_v54, %v1679_v50 }
 0x6af   : > { %1846 = vmatprep.subr.bf16.mxu0 %v3910_v58  ;;  %v1686_v59 = vmul.f32 %v5114_v56, %v1682_v60  ;;  %v1687_v9 = vmul.f32 %v5119_v47, %v1683_v63 }
 0x6b0   : > { %v1689_v48 = vpop.permute.xlu0 %1688  ;;  %1847 = vmatpush1.bf16.msra.mxu0 %v3909_v52  ;;  %v3575_v52 = vld [vmem:[%s4544_s13 + $0x138] sm:$0xff] }
 0x6b1   : > { %v1691_v3 = vpop.permute.xlu1 %1690 }
 0x6b2   : > { %v1692_v6 = vsel %vm677_vm8, %v1689_v48, %v1691_v3  ;;  %v1693_v7 = vsel %vm677_vm8, %v1691_v3, %v1689_v48 }
 0x6b3   : > { %v1696_v10 = vmul.f32 %v5128_v2, %v1692_v6  ;;  %v1697_v61 = vmul.f32 %v5133_v21, %v1693_v7 }
 0x6b4   : > { %v1699_v11 = vpop.permute.xlu0 %1698 }
 0x6b5   : > { %v3911_v14 = vpack.c.bf16 %v1696_v10, %v1686_v59  ;;  %v1701_v1 = vpop.permute.xlu1 %1700  ;;  %v3912_v22 = vpack.c.bf16 %v1697_v61, %v1687_v9 }
 0x6b6   : > { %v1702_v23 = vsel %vm689_vm9, %v1699_v11, %v1701_v1  ;;  %v1703_v25 = vsel %vm689_vm9, %v1701_v1, %v1699_v11 }
 0x6b7   : > { %v1706_v19 = vmul.f32 %v5146_v12, %v1702_v23  ;;  %v1707_v18 = vmul.f32 %v5151_v13, %v1703_v25  ;;  %1848 = vmatprep.subr.bf16.mxu0 %v3912_v22 }
 0x6b8   : > { %1849 = vmatpush1.bf16.msra.mxu0 %v3911_v14 }
 0x6b9   : > { %v3913_v15 = vpack.c.bf16 %v1706_v19, %v1706_v19  ;;  %v3914_v16 = vpack.c.bf16 %v1707_v18, %v1707_v18 }
 0x6bb   : > { %3586 = vmatprep.subr.msk.bf16.mxu0 %vm471_vm0, %v3914_v16  ;;  %v1837_v28 = vsel %vm471_vm0, %v3913_v15, 0 }
 0x6bc   : > { %1851 = vmatpush1.bf16.msra.mxu0 %v1837_v28 }
 0x6bf   : > { %3587 = vmatmul.mubr.msk.bf16.vlgmr.msra.gmra.mrb[16].mxu0 %vm464_vm1, %v4959_v62 }
 0x6c0   : > { %1884 = vmatprep.mubr.bf16.mxu0 %v4301_v0 }
 0x6c7   : > { %3588 = vmatmul.mubr.msk.bf16.gmra.mrb[20].mxu0 %vm464_vm1, %v4967_v20 }
 0x6c8   : > { %2548 = vmatprep.mubr.bf16.mxu0 %v4301_v0 }
 0x792   : > { %v1876_v36 = vpop.f32.mrb[16].mxu0 }
 0x793   : > { %v1895_v38 = vadd.f32 %v3568_v30, %v1876_v36  ;;  %v1878_v35 = vpop.f32.mrb[17].mxu0 }
 0x794   : > { %v1896_v29 = vadd.f32 %v3569_v31, %v1878_v35  ;;  %v1880_v17 = vpop.f32.mrb[18].mxu0 }
 0x795   : > { %v3589_v39 = vmul.f32 -1.442695, %v1895_v38  ;;  %v1897_v43 = vadd.f32 %v3570_v37, %v1880_v17  ;;  %v1882_v53 = vpop.f32.mrb[19].mxu0 }
 0x796   : > { %v3590_v45 = vmul.f32 -1.442695, %v1896_v29  ;;  %v1898_v34 = vadd.f32 %v3571_v24, %v1882_v53 }
 0x797   : > { %4124 = vpow2.f32 %v3589_v39  ;;  %v3591_v44 = vmul.f32 -1.442695, %v1897_v43 }
 0x798   : > { %4126 = vpow2.f32 %v3590_v45  ;;  %v3592_v46 = vmul.f32 -1.442695, %v1898_v34 }
 0x799   : > { %4128 = vpow2.f32 %v3591_v44 }
 0x79a   : > { %4130 = vpow2.f32 %v3592_v46  ;;  %v1886_v49 = vpop.f32.mrb[20].mxu0  ;;  %v5208_v46 = vld [vmem:[%s5601_s2] sm:$0xff] }
 0x79b   : > { %v1888_v50 = vpop.f32.mrb[21].mxu0  ;;  %v1899_v54 = vadd.f32 %v3572_v4, %v1886_v49  ;;  %v5213_v4 = vld [vmem:[%s5601_s2 + $0x8] sm:$0xff] }
 0x79c   : > { %v1890_v58 = vpop.f32.mrb[22].mxu0  ;;  %v1900_v60 = vadd.f32 %v3573_v51, %v1888_v50  ;;  %v5222_v50 = vld [vmem:[%s5601_s2 + $0x10] sm:$0xff] }
 0x79d   : > { %v1901_v63 = vadd.f32 %v3574_v5, %v1890_v58  ;;  %v1892_v48 = vpop.f32.mrb[23].mxu0  ;;  %4132 = vtanh.f32 %v1899_v54 }
 0x79e   : > { %v1902_v3 = vadd.f32 %v3575_v52, %v1892_v48  ;;  %4134 = vtanh.f32 %v1900_v60  ;;  %v5227_v52 = vld [vmem:[%s5601_s2 + $0x18] sm:$0xff] }
 0x79f   : > { %v3593_v6 = vmul.f32 -1.442695, %v1901_v63 }
 0x7a0   : > { %v3594_v7 = vmul.f32 -1.442695, %v1902_v3 }
 0x7a1   : > { %v4125_v59 = vpop.eup %4124  ;;  %4136 = vpow2.f32 %v3593_v6 }
 0x7a2   : > { %v4127_v9 = vpop.eup %4126  ;;  %v1921_v10 = vadd.f32 1.0, %v4125_v59  ;;  %4138 = vpow2.f32 %v3594_v7 }
 0x7a3   : > { %v4129_v61 = vpop.eup %4128  ;;  %v1922_v11 = vadd.f32 1.0, %v4127_v9 }
 0x7a4   : > { %v4131_v14 = vpop.eup %4130  ;;  %4140 = vrcp.f32 %v1921_v10  ;;  %v1923_v1 = vadd.f32 1.0, %v4129_v61 }
 0x7a5   : > { %4142 = vrcp.f32 %v1922_v11  ;;  %v1924_v22 = vadd.f32 1.0, %v4131_v14 }
 0x7a6   : > { %4144 = vrcp.f32 %v1923_v1 }
 0x7a7   : > { %4146 = vrcp.f32 %v1924_v22  ;;  %v4133_v23 = vpop.eup %4132 }
 0x7a8   : > { %v4135_v25 = vpop.eup %4134 }
 0x7ab   : > { %v4137_v19 = vpop.eup %4136 }
 0x7ac   : > { %v4139_v18 = vpop.eup %4138  ;;  %v1925_v30 = vadd.f32 1.0, %v4137_v19 }
 0x7ad   : > { %v1926_v37 = vadd.f32 1.0, %v4139_v18 }
 0x7ae   : > { %v4141_v15 = vpop.eup %4140  ;;  %4148 = vrcp.f32 %v1925_v30 }
 0x7af   : > { %v4143_v16 = vpop.eup %4142  ;;  %v1945_v28 = vmul.f32 %v4141_v15, %v4133_v23  ;;  %4150 = vrcp.f32 %v1926_v37 }
 0x7b0   : > { %v4145_v31 = vpop.eup %4144  ;;  %v1946_v36 = vmul.f32 %v4143_v16, %v4135_v25 }
 0x7b1   : > { %v4147_v38 = vpop.eup %4146  ;;  %v1943_v35 = vmul.f32 %v4145_v31, %v4982_v55 }
 0x7b2   : > { %v1944_v24 = vmul.f32 %v4147_v38, %v4984_v57 }
 0x7b3   : > { %v5177_v29 = vadd.f32 %v1945_v28, %v1943_v35  ;;  %v5252_v28 = vld [vmem:[%s5601_s2 + $0x40] sm:$0xff] }
 0x7b4   : > { %v5179_v17 = vadd.f32 %v1946_v36, %v1944_v24 }
 0x7b5   : > { %4152 = vtanh.f32 %v5177_v29  ;;  %3597 = vst [vmem:[%s4561_s21 + $0x40] sm:$0xff] %v5177_v29 }
 0x7b6   : > { %4154 = vtanh.f32 %v5179_v17  ;;  %3598 = vst [vmem:[%s4561_s21 + $0x48] sm:$0xff] %v5179_v17 }
 0x7b8   : > { %v4149_v39 = vpop.eup %4148 }
 0x7b9   : > { %v4151_v55 = vpop.eup %4150 }
 0x7bf   : > { %v4153_v43 = vpop.eup %4152 }
 0x7c0   : > { %v4155_v53 = vpop.eup %4154  ;;  %v1951_v57 = vmul.f32 %v4153_v43, %v4149_v39 }
 0x7c1   : > { %v1952_v45 = vmul.f32 %v4155_v53, %v4151_v55 }
 0x7c2   : > { %3595 = vst [vmem:[%s4572_s15 + $0x40] sm:$0xff] %v1951_v57  ;;  %1961 = vrot.lane.b32.xlu0 %v1951_v57, %s4303_s23  ;;  %v2003_v35 = vmul.f32 %v5252_v28, %v1951_v57 }
 0x7c3   : > { %3596 = vst [vmem:[%s4572_s15 + $0x48] sm:$0xff] %v1952_v45  ;;  %1963 = vrot.lane.b32.xlu1 %v1952_v45, %s4303_s23  ;;  %v2004_v55 = vmul.f32 %v5097_v42, %v1952_v45 }
 0x7c6   : > { %1971 = vrot.lane.b32.xlu0 %v1951_v57, %s4302_s22 }
 0x7c7   : > { %1973 = vrot.lane.b32.xlu1 %v1952_v45, %s4302_s22 }
 0x7ca   : > { %1981 = vrot.lane.b32.xlu0 %v1951_v57, %s4304_s26 }
 0x7cb   : > { %1983 = vrot.lane.b32.xlu1 %v1952_v45, %s4304_s26 }
 0x7ce   : > { %1991 = vrot.lane.b32.xlu0 %v1951_v57, %s4305_s27 }
 0x7cf   : > { %1993 = vrot.lane.b32.xlu1 %v1952_v45, %s4305_s27 }
 0x7d2   : > { %2005 = vrot.lane.b32.xlu0 %v1951_v57, %s4306_s28 }
 0x7d3   : > { %2007 = vrot.lane.b32.xlu1 %v1952_v45, %s4306_s28 }
 0x7d6   : > { %2015 = vrot.lane.b32.xlu0 %v1951_v57, %s4307_s29 }
 0x7d7   : > { %2017 = vrot.lane.b32.xlu1 %v1952_v45, %s4307_s29 }
 0x7da   : > { %2025 = vrot.lane.b32.xlu0 %v1951_v57, %s4308_s30 }
 0x7db   : > { %2027 = vrot.lane.b32.xlu1 %v1952_v45, %s4308_s30 }
 0x7de   : > { %2035 = vrot.lane.b32.xlu0 %v1951_v57, %s4309_s5 }
 0x7df   : > { %2037 = vrot.lane.b32.xlu1 %v1952_v45, %s4309_s5 }
 0x834   : > { %v1962_v34 = vpop.permute.xlu0 %1961 }
 0x835   : > { %v1964_v44 = vpop.permute.xlu1 %1963 }
 0x836   : > { %v1965_v49 = vsel %vm601_vm5, %v1962_v34, %v1964_v44  ;;  %v1966_v51 = vsel %vm601_vm5, %v1964_v44, %v1962_v34 }
 0x837   : > { %v1969_v63 = vmul.f32 %v5208_v46, %v1966_v51  ;;  %v1970_v48 = vmul.f32 %v5213_v4, %v1965_v49 }
 0x838   : > { %v1972_v5 = vpop.permute.xlu0 %1971 }
 0x839   : > { %v1974_v54 = vpop.permute.xlu1 %1973 }
 0x83a   : > { %v1975_v58 = vsel %vm612_vm2, %v1972_v5, %v1974_v54  ;;  %v1976_v60 = vsel %vm612_vm2, %v1974_v54, %v1972_v5 }
 0x83b   : > { %v1979_v3 = vmul.f32 %v5222_v50, %v1976_v60  ;;  %v1980_v6 = vmul.f32 %v5227_v52, %v1975_v58 }
 0x83c   : > { %v1982_v7 = vpop.permute.xlu0 %1981 }
 0x83d   : > { %v3915_v59 = vpack.c.bf16 %v1979_v3, %v1969_v63  ;;  %v1984_v9 = vpop.permute.xlu1 %1983  ;;  %v3916_v10 = vpack.c.bf16 %v1980_v6, %v1970_v48 }
 0x83e   : > { %v1985_v61 = vsel %vm624_vm3, %v1982_v7, %v1984_v9  ;;  %v1986_v11 = vsel %vm624_vm3, %v1984_v9, %v1982_v7 }
 0x83f   : > { %2179 = vmatprep.subr.bf16.mxu1 %v3916_v10  ;;  %v1989_v25 = vmul.f32 %v5055_v26, %v1986_v11  ;;  %v1990_v19 = vmul.f32 %v5060_v27, %v1985_v61 }
 0x840   : > { %v1992_v14 = vpop.permute.xlu0 %1991  ;;  %2180 = vmatpush1.bf16.msra.mxu1 %v3915_v59 }
 0x841   : > { %v1994_v1 = vpop.permute.xlu1 %1993 }
 0x842   : > { %v1995_v22 = vsel %vm636_vm4, %v1992_v14, %v1994_v1  ;;  %v1996_v23 = vsel %vm636_vm4, %v1994_v1, %v1992_v14 }
 0x843   : > { %v1999_v18 = vmul.f32 %v5069_v32, %v1996_v23  ;;  %v2000_v15 = vmul.f32 %v5074_v33, %v1995_v22  ;;  %v3624_v23 = vld [vmem:[%s4544_s13 + $0x140] sm:$0xff] }
 0x844   : > { %v2006_v16 = vpop.permute.xlu0 %2005 }
 0x845   : > { %v3917_v30 = vpack.c.bf16 %v1999_v18, %v1989_v25  ;;  %v2008_v31 = vpop.permute.xlu1 %2007  ;;  %v3918_v36 = vpack.c.bf16 %v2000_v15, %v1990_v19  ;;  %v3625_v25 = vld [vmem:[%s4544_s13 + $0x148] sm:$0xff]  ;;  %v3626_v18 = vld [vmem:[%s4544_s13 + $0x150] sm:$0xff] }
 0x846   : > { %v2009_v37 = vsel %vm653_vm6, %v2006_v16, %v2008_v31  ;;  %v2010_v38 = vsel %vm653_vm6, %v2008_v31, %v2006_v16 }
 0x847   : > { %v2013_v24 = vmul.f32 %v5087_v40, %v2009_v37  ;;  %v2014_v39 = vmul.f32 %v5092_v41, %v2010_v38  ;;  %2181 = vmatprep.subr.bf16.mxu1 %v3918_v36 }
 0x848   : > { %v2016_v43 = vpop.permute.xlu0 %2015  ;;  %2182 = vmatpush1.bf16.msra.mxu1 %v3917_v30  ;;  %v3627_v30 = vld [vmem:[%s4544_s13 + $0x158] sm:$0xff] }
 0x849   : > { %v3919_v53 = vpack.c.bf16 %v2013_v24, %v2003_v35  ;;  %v2018_v34 = vpop.permute.xlu1 %2017  ;;  %v3920_v44 = vpack.c.bf16 %v2014_v39, %v2004_v55  ;;  %v3628_v55 = vld [vmem:[%s4544_s13 + $0x160] sm:$0xff] }
 0x84a   : > { %v2019_v49 = vsel %vm665_vm7, %v2016_v43, %v2018_v34  ;;  %v2020_v51 = vsel %vm665_vm7, %v2018_v34, %v2016_v43  ;;  %v3630_v34 = vld [vmem:[%s4544_s13 + $0x170] sm:$0xff] }
 0x84b   : > { %2183 = vmatprep.subr.bf16.mxu1 %v3920_v44  ;;  %v2023_v58 = vmul.f32 %v5114_v56, %v2019_v49  ;;  %v2024_v60 = vmul.f32 %v5119_v47, %v2020_v51  ;;  %v3631_v49 = vld [vmem:[%s4544_s13 + $0x178] sm:$0xff] }
 0x84c   : > { %v2026_v57 = vpop.permute.xlu0 %2025  ;;  %2184 = vmatpush1.bf16.msra.mxu1 %v3919_v53  ;;  %v3629_v53 = vld [vmem:[%s4544_s13 + $0x168] sm:$0xff] }
 0x84d   : > { %v2028_v5 = vpop.permute.xlu1 %2027 }
 0x84e   : > { %v2029_v54 = vsel %vm677_vm8, %v2026_v57, %v2028_v5  ;;  %v2030_v45 = vsel %vm677_vm8, %v2028_v5, %v2026_v57 }
 0x84f   : > { %v2033_v63 = vmul.f32 %v5128_v2, %v2029_v54  ;;  %v2034_v48 = vmul.f32 %v5133_v21, %v2030_v45 }
 0x850   : > { %v2036_v3 = vpop.permute.xlu0 %2035 }
 0x851   : > { %v3921_v6 = vpack.c.bf16 %v2033_v63, %v2023_v58  ;;  %v2038_v7 = vpop.permute.xlu1 %2037  ;;  %v3922_v59 = vpack.c.bf16 %v2034_v48, %v2024_v60 }
 0x852   : > { %v2039_v9 = vsel %vm689_vm9, %v2036_v3, %v2038_v7  ;;  %v2040_v10 = vsel %vm689_vm9, %v2038_v7, %v2036_v3 }
 0x853   : > { %v2043_v61 = vmul.f32 %v5146_v12, %v2039_v9  ;;  %v2044_v11 = vmul.f32 %v5151_v13, %v2040_v10  ;;  %2185 = vmatprep.subr.bf16.mxu1 %v3922_v59 }
 0x854   : > { %2186 = vmatpush1.bf16.msra.mxu1 %v3921_v6 }
 0x855   : > { %v3923_v14 = vpack.c.bf16 %v2043_v61, %v2043_v61  ;;  %v3924_v1 = vpack.c.bf16 %v2044_v11, %v2044_v11 }
 0x857   : > { %3642 = vmatprep.subr.msk.bf16.mxu1 %vm471_vm0, %v3924_v1  ;;  %v2174_v22 = vsel %vm471_vm0, %v3923_v14, 0 }
 0x858   : > { %2188 = vmatpush1.bf16.msra.mxu1 %v2174_v22 }
 0x85b   : > { %3643 = vmatmul.mubr.msk.bf16.vlgmr.msra.gmra.mrb[16].mxu1 %vm464_vm1, %v4959_v62 }
 0x85c   : > { %2221 = vmatprep.mubr.bf16.mxu1 %v4301_v0 }
 0x863   : > { %3644 = vmatmul.mubr.msk.bf16.gmra.mrb[20].mxu1 %vm464_vm1, %v4967_v20 }
 0x864   : > { %2885 = vmatprep.mubr.bf16.mxu1 %v4301_v0 }
 0x92e   : > { %v2213_v19 = vpop.f32.mrb[16].mxu1 }
 0x92f   : > { %v2232_v15 = vadd.f32 %v3624_v23, %v2213_v19  ;;  %v2215_v16 = vpop.f32.mrb[17].mxu1 }
 0x930   : > { %v2233_v31 = vadd.f32 %v3625_v25, %v2215_v16  ;;  %v2217_v36 = vpop.f32.mrb[18].mxu1 }
 0x931   : > { %v3645_v62 = vmul.f32 -1.442695, %v2232_v15  ;;  %v2234_v37 = vadd.f32 %v3626_v18, %v2217_v36  ;;  %v2219_v38 = vpop.f32.mrb[19].mxu1 }
 0x932   : > { %v3646_v35 = vmul.f32 -1.442695, %v2233_v31  ;;  %v2235_v20 = vadd.f32 %v3627_v30, %v2219_v38 }
 0x933   : > { %4156 = vpow2.f32 %v3645_v62  ;;  %v3647_v24 = vmul.f32 -1.442695, %v2234_v37 }
 0x934   : > { %4158 = vpow2.f32 %v3646_v35  ;;  %v3648_v39 = vmul.f32 -1.442695, %v2235_v20 }
 0x935   : > { %4160 = vpow2.f32 %v3647_v24 }
 0x936   : > { %4162 = vpow2.f32 %v3648_v39  ;;  %v2223_v43 = vpop.f32.mrb[20].mxu1 }
 0x937   : > { %v2225_v44 = vpop.f32.mrb[21].mxu1  ;;  %v2236_v51 = vadd.f32 %v3628_v55, %v2223_v43 }
 0x938   : > { %v2227_v57 = vpop.f32.mrb[22].mxu1  ;;  %v2237_v5 = vadd.f32 %v3629_v53, %v2225_v44 }
 0x939   : > { %v2238_v54 = vadd.f32 %v3630_v34, %v2227_v57  ;;  %v2229_v45 = vpop.f32.mrb[23].mxu1  ;;  %4164 = vtanh.f32 %v2236_v51 }
 0x93a   : > { %v2239_v58 = vadd.f32 %v3631_v49, %v2229_v45  ;;  %4166 = vtanh.f32 %v2237_v5 }
 0x93b   : > { %v3649_v60 = vmul.f32 -1.442695, %v2238_v54 }
 0x93c   : > { %v3650_v63 = vmul.f32 -1.442695, %v2239_v58 }
 0x93d   : > { %v4157_v48 = vpop.eup %4156  ;;  %4168 = vpow2.f32 %v3649_v60 }
 0x93e   : > { %v4159_v3 = vpop.eup %4158  ;;  %v2258_v6 = vadd.f32 1.0, %v4157_v48  ;;  %4170 = vpow2.f32 %v3650_v63 }
 0x93f   : > { %v4161_v7 = vpop.eup %4160  ;;  %v2259_v59 = vadd.f32 1.0, %v4159_v3 }
 0x940   : > { %v4163_v9 = vpop.eup %4162  ;;  %4172 = vrcp.f32 %v2258_v6  ;;  %v2260_v10 = vadd.f32 1.0, %v4161_v7 }
 0x941   : > { %4174 = vrcp.f32 %v2259_v59  ;;  %v2261_v61 = vadd.f32 1.0, %v4163_v9 }
 0x942   : > { %4176 = vrcp.f32 %v2260_v10 }
 0x943   : > { %4178 = vrcp.f32 %v2261_v61  ;;  %v4165_v11 = vpop.eup %4164 }
 0x944   : > { %v4167_v14 = vpop.eup %4166 }
 0x947   : > { %v4169_v1 = vpop.eup %4168 }
 0x948   : > { %v4171_v22 = vpop.eup %4170  ;;  %v2262_v18 = vadd.f32 1.0, %v4169_v1 }
 0x949   : > { %v2263_v30 = vadd.f32 1.0, %v4171_v22 }
 0x94a   : > { %v4173_v23 = vpop.eup %4172  ;;  %4180 = vrcp.f32 %v2262_v18 }
 0x94b   : > { %v4175_v25 = vpop.eup %4174  ;;  %v2282_v19 = vmul.f32 %v4173_v23, %v4165_v11  ;;  %4182 = vrcp.f32 %v2263_v30 }
 0x94c   : > { %v4177_v15 = vpop.eup %4176  ;;  %v2283_v16 = vmul.f32 %v4175_v25, %v4167_v14 }
 0x94d   : > { %v4179_v31 = vpop.eup %4178  ;;  %v2280_v36 = vmul.f32 %v4177_v15, %v5177_v29 }
 0x94e   : > { %v2281_v62 = vmul.f32 %v4179_v31, %v5179_v17 }
 0x94f   : > { %v5298_v37 = vadd.f32 %v2282_v19, %v2280_v36 }
 0x950   : > { %v5300_v38 = vadd.f32 %v2283_v16, %v2281_v62 }
 0x951   : > { %4184 = vtanh.f32 %v5298_v37  ;;  %3653 = vst [vmem:[%s4561_s21 + $0x50] sm:$0xff] %v5298_v37 }
 0x952   : > { %4186 = vtanh.f32 %v5300_v38  ;;  %3654 = vst [vmem:[%s4561_s21 + $0x58] sm:$0xff] %v5300_v38 }
 0x954   : > { %v4181_v35 = vpop.eup %4180 }
 0x955   : > { %v4183_v29 = vpop.eup %4182 }
 0x95b   : > { %v4185_v20 = vpop.eup %4184 }
 0x95c   : > { %v4187_v24 = vpop.eup %4186  ;;  %v2288_v17 = vmul.f32 %v4185_v20, %v4181_v35 }
 0x95d   : > { %v2289_v39 = vmul.f32 %v4187_v24, %v4183_v29 }
 0x95e   : > { %3651 = vst [vmem:[%s4572_s15 + $0x50] sm:$0xff] %v2288_v17  ;;  %2298 = vrot.lane.b32.xlu0 %v2288_v17, %s4303_s23  ;;  %v2340_v30 = vmul.f32 %v5252_v28, %v2288_v17 }
 0x95f   : > { %3652 = vst [vmem:[%s4572_s15 + $0x58] sm:$0xff] %v2289_v39  ;;  %2300 = vrot.lane.b32.xlu1 %v2289_v39, %s4303_s23 }
 0x962   : > { %2308 = vrot.lane.b32.xlu0 %v2288_v17, %s4302_s22 }
 0x963   : > { %2310 = vrot.lane.b32.xlu1 %v2289_v39, %s4302_s22 }
 0x966   : > { %2318 = vrot.lane.b32.xlu0 %v2288_v17, %s4304_s26 }
 0x967   : > { %2320 = vrot.lane.b32.xlu1 %v2289_v39, %s4304_s26 }
 0x96a   : > { %2328 = vrot.lane.b32.xlu0 %v2288_v17, %s4305_s27 }
 0x96b   : > { %2330 = vrot.lane.b32.xlu1 %v2289_v39, %s4305_s27 }
 0x96e   : > { %2342 = vrot.lane.b32.xlu0 %v2288_v17, %s4306_s28 }
 0x96f   : > { %2344 = vrot.lane.b32.xlu1 %v2289_v39, %s4306_s28 }
 0x972   : > { %2352 = vrot.lane.b32.xlu0 %v2288_v17, %s4307_s29 }
 0x973   : > { %2354 = vrot.lane.b32.xlu1 %v2289_v39, %s4307_s29 }
 0x976   : > { %2362 = vrot.lane.b32.xlu0 %v2288_v17, %s4308_s30 }
 0x977   : > { %2364 = vrot.lane.b32.xlu1 %v2289_v39, %s4308_s30 }
 0x97a   : > { %2372 = vrot.lane.b32.xlu0 %v2288_v17, %s4309_s5 }
 0x97b   : > { %2374 = vrot.lane.b32.xlu1 %v2289_v39, %s4309_s5 }
 0x9d0   : > { %v2299_v55 = vpop.permute.xlu0 %2298 }
 0x9d1   : > { %v2301_v43 = vpop.permute.xlu1 %2300 }
 0x9d2   : > { %v2302_v53 = vsel %vm601_vm5, %v2299_v55, %v2301_v43  ;;  %v2303_v34 = vsel %vm601_vm5, %v2301_v43, %v2299_v55 }
 0x9d3   : > { %v2306_v5 = vmul.f32 %v2303_v34, %v5208_v46  ;;  %v2307_v54 = vmul.f32 %v2302_v53, %v5213_v4 }
 0x9d4   : > { %v2309_v44 = vpop.permute.xlu0 %2308 }
 0x9d5   : > { %v2311_v49 = vpop.permute.xlu1 %2310 }
 0x9d6   : > { %v2312_v51 = vsel %vm612_vm2, %v2309_v44, %v2311_v49  ;;  %v2313_v57 = vsel %vm612_vm2, %v2311_v49, %v2309_v44 }
 0x9d7   : > { %v2316_v45 = vmul.f32 %v5222_v50, %v2313_v57  ;;  %v2317_v58 = vmul.f32 %v5227_v52, %v2312_v51 }
 0x9d8   : > { %v2319_v60 = vpop.permute.xlu0 %2318 }
 0x9d9   : > { %v3925_v63 = vpack.c.bf16 %v2316_v45, %v2306_v5  ;;  %v2321_v48 = vpop.permute.xlu1 %2320  ;;  %v3926_v3 = vpack.c.bf16 %v2317_v58, %v2307_v54  ;;  %v5381_v5 = vld [vmem:[%s5600_s1] sm:$0xff]   ;;  %v3681_v54 = vld [vmem:[%s4544_s13 + $0x188] sm:$0xff]  ;;  %v3682_v58 = vld [vmem:[%s4544_s13 + $0x190] sm:$0xff] }
 0x9da   : > { %v2322_v6 = vsel %vm624_vm3, %v2319_v60, %v2321_v48  ;;  %v2323_v7 = vsel %vm624_vm3, %v2321_v48, %v2319_v60  ;;  %v3683_v48 = vld [vmem:[%s4544_s13 + $0x198] sm:$0xff] }
 0x9db   : > { %2516 = vmatprep.subr.bf16.mxu0 %v3926_v3  ;;  %v2326_v11 = vmul.f32 %v5055_v26, %v2323_v7  ;;  %v2327_v14 = vmul.f32 %v5060_v27, %v2322_v6 }
 0x9dc   : > { %v2329_v59 = vpop.permute.xlu0 %2328  ;;  %2517 = vmatpush1.bf16.msra.mxu0 %v3925_v63 }
 0x9dd   : > { %v2331_v9 = vpop.permute.xlu1 %2330 }
 0x9de   : > { %v2332_v10 = vsel %vm636_vm4, %v2329_v59, %v2331_v9  ;;  %v2333_v61 = vsel %vm636_vm4, %v2331_v9, %v2329_v59 }
 0x9df   : > { %v2336_v1 = vmul.f32 %v5069_v32, %v2333_v61  ;;  %v2337_v22 = vmul.f32 %v5074_v33, %v2332_v10  ;;  %v2341_v32 = vmul.f32 %v5097_v42, %v2289_v39 }
 0x9e0   : > { %v2343_v23 = vpop.permute.xlu0 %2342 }
 0x9e1   : > { %v3927_v25 = vpack.c.bf16 %v2336_v1, %v2326_v11  ;;  %v2345_v19 = vpop.permute.xlu1 %2344  ;;  %v3928_v18 = vpack.c.bf16 %v2337_v22, %v2327_v14  ;;  %v3684_v1 = vld [vmem:[%s4544_s13 + $0x1a0] sm:$0xff] }
 0x9e2   : > { %v2346_v15 = vsel %vm653_vm6, %v2343_v23, %v2345_v19  ;;  %v2347_v16 = vsel %vm653_vm6, %v2345_v19, %v2343_v23  ;;  %v3685_v23 = vld [vmem:[%s4544_s13 + $0x1a8] sm:$0xff] }
 0x9e3   : > { %v2350_v26 = vmul.f32 %v5087_v40, %v2346_v15  ;;  %v2351_v27 = vmul.f32 %v5092_v41, %v2347_v16  ;;  %2518 = vmatprep.subr.bf16.mxu0 %v3928_v18  ;;  %v3687_v18 = vld [vmem:[%s4544_s13 + $0x1b8] sm:$0xff] }
 0x9e4   : > { %v2353_v33 = vpop.permute.xlu0 %2352  ;;  %2519 = vmatpush1.bf16.msra.mxu0 %v3927_v25  ;;  %v3686_v25 = vld [vmem:[%s4544_s13 + $0x1b0] sm:$0xff] }
 0x9e5   : > { %v3929_v31 = vpack.c.bf16 %v2350_v26, %v2340_v30  ;;  %v2355_v36 = vpop.permute.xlu1 %2354  ;;  %v3930_v62 = vpack.c.bf16 %v2351_v27, %v2341_v32 }
 0x9e6   : > { %v2356_v35 = vsel %vm665_vm7, %v2353_v33, %v2355_v36  ;;  %v2357_v29 = vsel %vm665_vm7, %v2355_v36, %v2353_v33 }
 0x9e7   : > { %2520 = vmatprep.subr.bf16.mxu0 %v3930_v62  ;;  %v2360_v24 = vmul.f32 %v5114_v56, %v2356_v35  ;;  %v2361_v17 = vmul.f32 %v5119_v47, %v2357_v29 }
 0x9e8   : > { %v2363_v20 = vpop.permute.xlu0 %2362  ;;  %2521 = vmatpush1.bf16.msra.mxu0 %v3929_v31 }
 0x9e9   : > { %v2365_v40 = vpop.permute.xlu1 %2364 }
 0x9ea   : > { %v2366_v41 = vsel %vm677_vm8, %v2363_v20, %v2365_v40  ;;  %v2367_v42 = vsel %vm677_vm8, %v2365_v40, %v2363_v20 }
 0x9eb   : > { %v2370_v39 = vmul.f32 %v5128_v2, %v2366_v41  ;;  %v2371_v55 = vmul.f32 %v5133_v21, %v2367_v42 }
 0x9ec   : > { %v2373_v43 = vpop.permute.xlu0 %2372 }
 0x9ed   : > { %v3931_v53 = vpack.c.bf16 %v2370_v39, %v2360_v24  ;;  %v2375_v34 = vpop.permute.xlu1 %2374  ;;  %v3932_v44 = vpack.c.bf16 %v2371_v55, %v2361_v17 }
 0x9ee   : > { %v2376_v49 = vsel %vm689_vm9, %v2373_v43, %v2375_v34  ;;  %v2377_v51 = vsel %vm689_vm9, %v2375_v34, %v2373_v43 }
 0x9ef   : > { %v2380_v56 = vmul.f32 %v5146_v12, %v2376_v49  ;;  %v2381_v47 = vmul.f32 %v5151_v13, %v2377_v51  ;;  %2522 = vmatprep.subr.bf16.mxu0 %v3932_v44  ;;  %v5389_v12 = vld [vmem:[%s5600_s1 + $0x8] sm:$0xff]   ;;  %v3680_v13 = vld [vmem:[%s4544_s13 + $0x180] sm:$0xff] }
 0x9f0   : > { %2523 = vmatpush1.bf16.msra.mxu0 %v3931_v53 }
 0x9f1   : > { %v3933_v2 = vpack.c.bf16 %v2380_v56, %v2380_v56  ;;  %v3934_v21 = vpack.c.bf16 %v2381_v47, %v2381_v47 }
 0x9f3   : > { %3698 = vmatprep.subr.msk.bf16.mxu0 %vm471_vm0, %v3934_v21  ;;  %v2511_v57 = vsel %vm471_vm0, %v3933_v2, 0 }
 0x9f4   : > { %2525 = vmatpush1.bf16.msra.mxu0 %v2511_v57 }
 0x9f7   : > { %3699 = vmatmul.mubr.msk.bf16.vlgmr.msra.gmra.mrb[24].mxu0 %vm464_vm1, %v5381_v5 }
 0x9f8   : > { %2558 = vmatprep.mubr.bf16.mxu0 %v4301_v0 }
 0x9ff   : > { %3700 = vmatmul.mubr.msk.bf16.gmra.mrb[28].mxu0 %vm464_vm1, %v5389_v12 }
 0xaca   : > { %v2550_v45 = vpop.f32.mrb[24].mxu0 }
 0xacb   : > { %v2569_v60 = vadd.f32 %v3680_v13, %v2550_v45  ;;  %v2552_v63 = vpop.f32.mrb[25].mxu0 }
 0xacc   : > { %v2570_v3 = vadd.f32 %v3681_v54, %v2552_v63  ;;  %v2554_v6 = vpop.f32.mrb[26].mxu0 }
 0xacd   : > { %v3701_v7 = vmul.f32 -1.442695, %v2569_v60  ;;  %v2571_v59 = vadd.f32 %v3682_v58, %v2554_v6  ;;  %v2556_v9 = vpop.f32.mrb[27].mxu0 }
 0xace   : > { %v3702_v10 = vmul.f32 -1.442695, %v2570_v3  ;;  %v2572_v61 = vadd.f32 %v3683_v48, %v2556_v9 }
 0xacf   : > { %4188 = vpow2.f32 %v3701_v7  ;;  %v3703_v11 = vmul.f32 -1.442695, %v2571_v59 }
 0xad0   : > { %4190 = vpow2.f32 %v3702_v10  ;;  %v3704_v14 = vmul.f32 -1.442695, %v2572_v61 }
 0xad1   : > { %4192 = vpow2.f32 %v3703_v11 }
 0xad2   : > { %4194 = vpow2.f32 %v3704_v14  ;;  %v2560_v22 = vpop.f32.mrb[28].mxu0 }
 0xad3   : > { %v2562_v19 = vpop.f32.mrb[29].mxu0  ;;  %v2573_v15 = vadd.f32 %v3684_v1, %v2560_v22 }
 0xad4   : > { %v2564_v16 = vpop.f32.mrb[30].mxu0  ;;  %v2574_v30 = vadd.f32 %v3685_v23, %v2562_v19 }
 0xad5   : > { %v2575_v26 = vadd.f32 %v3686_v25, %v2564_v16  ;;  %v2566_v27 = vpop.f32.mrb[31].mxu0  ;;  %4196 = vtanh.f32 %v2573_v15  ;;  %v3714_v15 = vld [vmem:[%s5601_s2 + $0x28] sm:$0xff]  ;;  %v3716_v16 = vld [vmem:[%s5601_s2 + $0x38] sm:$0xff] }
 0xad6   : > { %v2576_v32 = vadd.f32 %v3687_v18, %v2566_v27  ;;  %4198 = vtanh.f32 %v2574_v30  ;;  %v3713_v18 = vld [vmem:[%s5601_s2 + $0x20] sm:$0xff] }
 0xad7   : > { %v3705_v33 = vmul.f32 -1.442695, %v2575_v26 }
 0xad8   : > { %v3706_v31 = vmul.f32 -1.442695, %v2576_v32 }
 0xad9   : > { %v4189_v36 = vpop.eup %4188  ;;  %4200 = vpow2.f32 %v3705_v33 }
 0xada   : > { %v4191_v62 = vpop.eup %4190  ;;  %v2595_v35 = vadd.f32 1.0, %v4189_v36  ;;  %4202 = vpow2.f32 %v3706_v31 }
 0xadb   : > { %v4193_v29 = vpop.eup %4192  ;;  %v2596_v20 = vadd.f32 1.0, %v4191_v62 }
 0xadc   : > { %v4195_v40 = vpop.eup %4194  ;;  %4204 = vrcp.f32 %v2595_v35  ;;  %v2597_v41 = vadd.f32 1.0, %v4193_v29  ;;  %v3719_v35 = vld [vmem:[%s5601_s2 + $0x50] sm:$0xff]  ;;  %v3720_v29 = vld [vmem:[%s5601_s2 + $0x58] sm:$0xff] }
 0xadd   : > { %4206 = vrcp.f32 %v2596_v20  ;;  %v2598_v42 = vadd.f32 1.0, %v4195_v40  ;;  %v3718_v20 = vld [vmem:[%s5601_s2 + $0x48] sm:$0xff] }
 0xade   : > { %4208 = vrcp.f32 %v2597_v41 }
 0xadf   : > { %4210 = vrcp.f32 %v2598_v42  ;;  %v4197_v24 = vpop.eup %4196 }
 0xae0   : > { %v4199_v17 = vpop.eup %4198 }
 0xae3   : > { %v4201_v39 = vpop.eup %4200 }
 0xae4   : > { %v4203_v55 = vpop.eup %4202  ;;  %v2599_v44 = vadd.f32 1.0, %v4201_v39 }
 0xae5   : > { %v2600_v56 = vadd.f32 1.0, %v4203_v55 }
 0xae6   : > { %v4205_v43 = vpop.eup %4204  ;;  %4212 = vrcp.f32 %v2599_v44 }
 0xae7   : > { %v4207_v53 = vpop.eup %4206  ;;  %v2619_v34 = vmul.f32 %v4205_v43, %v4197_v24  ;;  %4214 = vrcp.f32 %v2600_v56  ;;  %v3721_v56 = vld [vmem:[%s5601_s2 + $0x60] sm:$0xff] }
 0xae8   : > { %v4209_v49 = vpop.eup %4208  ;;  %v2620_v51 = vmul.f32 %v4207_v53, %v4199_v17 }
 0xae9   : > { %v4211_v47 = vpop.eup %4210  ;;  %v2617_v2 = vmul.f32 %v4209_v49, %v5298_v37 }
 0xaea   : > { %v2618_v21 = vmul.f32 %v4211_v47, %v5300_v38  ;;  %v3722_v47 = vld [vmem:[%s5601_s2 + $0x68] sm:$0xff] }
 0xaeb   : > { %v5403_v57 = vadd.f32 %v2619_v34, %v2617_v2 }
 0xaec   : > { %v5405_v13 = vadd.f32 %v2620_v51, %v2618_v21 }
 0xaed   : > { %4216 = vtanh.f32 %v5403_v57  ;;  %3709 = vst [vmem:[%s4561_s21 + $0x60] sm:$0xff] %v5403_v57 }
 0xaee   : > { %4218 = vtanh.f32 %v5405_v13  ;;  %3710 = vst [vmem:[%s4561_s21 + $0x68] sm:$0xff] %v5405_v13 }
 0xaf0   : > { %v4213_v54 = vpop.eup %4212 }
 0xaf1   : > { %v4215_v37 = vpop.eup %4214 }
 0xaf7   : > { %v4217_v45 = vpop.eup %4216 }
 0xaf8   : > { %v4219_v58 = vpop.eup %4218  ;;  %v2625_v38 = vmul.f32 %v4217_v45, %v4213_v54  ;;  %v3723_v54 = vld [vmem:[%s5601_s2 + $0x70] sm:$0xff] }
 0xaf9   : > { %v5413_v60 = vmul.f32 %v4219_v58, %v4215_v37  ;;  %v3724_v37 = vld [vmem:[%s5601_s2 + $0x78] sm:$0xff] }
 0xafa   : > { %3707 = vst [vmem:[%s4572_s15 + $0x60] sm:$0xff] %v2625_v38  ;;  %2635 = vrot.lane.b32.xlu0 %v2625_v38, %s4303_s23  ;;  %v2677_v39 = vmul.f32 %v5252_v28, %v2625_v38 }
 0xafb   : > { %3708 = vst [vmem:[%s4572_s15 + $0x68] sm:$0xff] %v5413_v60  ;;  %2637 = vrot.lane.b32.xlu1 %v5413_v60, %s4303_s23  ;;  %v2678_v53 = vmul.f32 %v3718_v20, %v5413_v60  ;;  %v3743_v20 = vld [vmem:[%s4544_s13 + $0x1f8] sm:$0xff] }
 0xafe   : > { %2645 = vrot.lane.b32.xlu0 %v2625_v38, %s4302_s22 }
 0xaff   : > { %2647 = vrot.lane.b32.xlu1 %v5413_v60, %s4302_s22 }
 0xb02   : > { %2655 = vrot.lane.b32.xlu0 %v2625_v38, %s4304_s26 }
 0xb03   : > { %2657 = vrot.lane.b32.xlu1 %v5413_v60, %s4304_s26 }
 0xb06   : > { %2665 = vrot.lane.b32.xlu0 %v2625_v38, %s4305_s27 }
 0xb07   : > { %2667 = vrot.lane.b32.xlu1 %v5413_v60, %s4305_s27 }
 0xb0a   : > { %2679 = vrot.lane.b32.xlu0 %v2625_v38, %s4306_s28 }
 0xb0b   : > { %2681 = vrot.lane.b32.xlu1 %v5413_v60, %s4306_s28 }
 0xb0e   : > { %2689 = vrot.lane.b32.xlu0 %v2625_v38, %s4307_s29 }
 0xb0f   : > { %2691 = vrot.lane.b32.xlu1 %v5413_v60, %s4307_s29 }
 0xb12   : > { %2699 = vrot.lane.b32.xlu0 %v2625_v38, %s4308_s30 }
 0xb13   : > { %2701 = vrot.lane.b32.xlu1 %v5413_v60, %s4308_s30 }
 0xb16   : > { %2709 = vrot.lane.b32.xlu0 %v2625_v38, %s4309_s5 }
 0xb17   : > { %2711 = vrot.lane.b32.xlu1 %v5413_v60, %s4309_s5 }
 0xb6c   : > { %v2636_v63 = vpop.permute.xlu0 %2635 }
 0xb6d   : > { %v2638_v48 = vpop.permute.xlu1 %2637 }
 0xb6e   : > { %v2639_v3 = vsel %vm601_vm5, %v2636_v63, %v2638_v48  ;;  %v2640_v6 = vsel %vm601_vm5, %v2638_v48, %v2636_v63 }
 0xb6f   : > { %v2643_v61 = vmul.f32 %v2640_v6, %v5208_v46  ;;  %v2644_v11 = vmul.f32 %v2639_v3, %v5213_v4 }
 0xb70   : > { %v2646_v7 = vpop.permute.xlu0 %2645 }
 0xb71   : > { %v2648_v59 = vpop.permute.xlu1 %2647 }
 0xb72   : > { %v2649_v9 = vsel %vm612_vm2, %v2646_v7, %v2648_v59  ;;  %v2650_v10 = vsel %vm612_vm2, %v2648_v59, %v2646_v7  ;;  %v3725_v7 = vld [vmem:[%s5601_s2 + $0x80] sm:$0xff]  ;;  %v3726_v59 = vld [vmem:[%s5601_s2 + $0x88] sm:$0xff] }
 0xb73   : > { %v2653_v14 = vmul.f32 %v5222_v50, %v2650_v10  ;;  %v2654_v1 = vmul.f32 %v5227_v52, %v2649_v9  ;;  %v3715_v52 = vld [vmem:[%s5601_s2 + $0x30] sm:$0xff] }
 0xb74   : > { %v2656_v22 = vpop.permute.xlu0 %2655 }
 0xb75   : > { %v3935_v23 = vpack.c.bf16 %v2653_v14, %v2643_v61  ;;  %v2658_v25 = vpop.permute.xlu1 %2657  ;;  %v3936_v19 = vpack.c.bf16 %v2654_v1, %v2644_v11 }
 0xb76   : > { %v2659_v46 = vsel %vm624_vm3, %v2656_v22, %v2658_v25  ;;  %v2660_v4 = vsel %vm624_vm3, %v2658_v25, %v2656_v22 }
 0xb77   : > { %2853 = vmatprep.subr.bf16.mxu1 %v3936_v19  ;;  %v2663_v32 = vmul.f32 %v3713_v18, %v2660_v4  ;;  %v2664_v33 = vmul.f32 %v3714_v15, %v2659_v46  ;;  %v3737_v18 = vld [vmem:[%s4544_s13 + $0x1c8] sm:$0xff]  ;;  %v3738_v46 = vld [vmem:[%s4544_s13 + $0x1d0] sm:$0xff] }
 0xb78   : > { %v2666_v50 = vpop.permute.xlu0 %2665  ;;  %2854 = vmatpush1.bf16.msra.mxu1 %v3935_v23 }
 0xb79   : > { %v2668_v30 = vpop.permute.xlu1 %2667 }
 0xb7a   : > { %v2669_v26 = vsel %vm636_vm4, %v2666_v50, %v2668_v30  ;;  %v2670_v27 = vsel %vm636_vm4, %v2668_v30, %v2666_v50 }
 0xb7b   : > { %v2673_v31 = vmul.f32 %v3715_v52, %v2670_v27  ;;  %v2674_v36 = vmul.f32 %v3716_v16, %v2669_v26  ;;  %v3739_v52 = vld [vmem:[%s4544_s13 + $0x1d8] sm:$0xff] }
 0xb7c   : > { %v2680_v62 = vpop.permute.xlu0 %2679 }
 0xb7d   : > { %v3937_v40 = vpack.c.bf16 %v2673_v31, %v2663_v32  ;;  %v2682_v41 = vpop.permute.xlu1 %2681  ;;  %v3938_v42 = vpack.c.bf16 %v2674_v36, %v2664_v33  ;;  %v3740_v31 = vld [vmem:[%s4544_s13 + $0x1e0] sm:$0xff] }
 0xb7e   : > { %v2683_v24 = vsel %vm653_vm6, %v2680_v62, %v2682_v41  ;;  %v2684_v17 = vsel %vm653_vm6, %v2682_v41, %v2680_v62  ;;  %v3741_v62 = vld [vmem:[%s4544_s13 + $0x1e8] sm:$0xff] }
 0xb7f   : > { %v2687_v55 = vmul.f32 %v3719_v35, %v2683_v24  ;;  %v2688_v43 = vmul.f32 %v3720_v29, %v2684_v17  ;;  %2855 = vmatprep.subr.bf16.mxu1 %v3938_v42  ;;  %v3742_v35 = vld [vmem:[%s4544_s13 + $0x1f0] sm:$0xff]  ;;  %s3873_s13 = sshll.u32 (%p4370_p6), %s4291_s17, 4 }
 0xb80   : > { %v2690_v34 = vpop.permute.xlu0 %2689  ;;  %2856 = vmatpush1.bf16.msra.mxu1 %v3937_v40  ;;  %s3137_s12 = scalar_lea.vmem (%p4370_p6), %s5602_s3, %s3873_s13 }
 0xb81   : > { %v3939_v44 = vpack.c.bf16 %v2687_v55, %v2677_v39  ;;  %v2692_v49 = vpop.permute.xlu1 %2691  ;;  %v3940_v51 = vpack.c.bf16 %v2688_v43, %v2678_v53 }
 0xb82   : > { %v2693_v28 = vsel %vm665_vm7, %v2690_v34, %v2692_v49  ;;  %v2694_v2 = vsel %vm665_vm7, %v2692_v49, %v2690_v34 }
 0xb83   : > { %2857 = vmatprep.subr.bf16.mxu1 %v3940_v51  ;;  %v2697_v60 = vmul.f32 %v3721_v56, %v2693_v28  ;;  %v2698_v63 = vmul.f32 %v3722_v47, %v2694_v2 }
 0xb84   : > { %v2700_v21 = vpop.permute.xlu0 %2699  ;;  %2858 = vmatpush1.bf16.msra.mxu1 %v3939_v44 }
 0xb85   : > { %v2702_v45 = vpop.permute.xlu1 %2701 }
 0xb86   : > { %v2703_v58 = vsel %vm677_vm8, %v2700_v21, %v2702_v45  ;;  %v2704_v38 = vsel %vm677_vm8, %v2702_v45, %v2700_v21 }
 0xb87   : > { %v2707_v48 = vmul.f32 %v3723_v54, %v2703_v58  ;;  %v2708_v3 = vmul.f32 %v3724_v37, %v2704_v38 }
 0xb88   : > { %v2710_v6 = vpop.permute.xlu0 %2709 }
 0xb89   : > { %v3941_v9 = vpack.c.bf16 %v2707_v48, %v2697_v60  ;;  %v2712_v10 = vpop.permute.xlu1 %2711  ;;  %v3942_v61 = vpack.c.bf16 %v2708_v3, %v2698_v63 }
 0xb8a   : > { %v2713_v11 = vsel %vm689_vm9, %v2710_v6, %v2712_v10  ;;  %v2714_v14 = vsel %vm689_vm9, %v2712_v10, %v2710_v6 }
 0xb8b   : > { %v2717_v1 = vmul.f32 %v3725_v7, %v2713_v11  ;;  %v2718_v22 = vmul.f32 %v3726_v59, %v2714_v14  ;;  %2859 = vmatprep.subr.bf16.mxu1 %v3942_v61 }
 0xb8c   : > { %2860 = vmatpush1.bf16.msra.mxu1 %v3941_v9 }
 0xb8d   : > { %v3943_v23 = vpack.c.bf16 %v2717_v1, %v2717_v1  ;;  %v3944_v25 = vpack.c.bf16 %v2718_v22, %v2718_v22 }
 0xb8f   : > { %3754 = vmatprep.subr.msk.bf16.mxu1 %vm471_vm0, %v3944_v25  ;;  %v2848_v19 = vsel %vm471_vm0, %v3943_v23, 0  ;;  %v3154_v25 = vld [vmem:[%s4572_s15 + $0x10] sm:$0xff] (%p4370_p6) }
 0xb90   : > { %2862 = vmatpush1.bf16.msra.mxu1 %v2848_v19  ;;  %v3156_v19 = vld [vmem:[%s4572_s15 + $0x18] sm:$0xff] (%p4370_p6)  ;;  %3155 = vst [vmem:[%s3137_s12 + $0x20] sm:$0xff] (%p4370_p6), %v3154_v25 }
 0xb91   : > { %3157 = vst [vmem:[%s3137_s12 + $0x28] sm:$0xff] (%p4370_p6), %v3156_v19 }
 0xb93   : > { %3755 = vmatmul.mubr.msk.bf16.vlgmr.msra.gmra.mrb[24].mxu1 %vm464_vm1, %v5381_v5 }
 0xb94   : > { %2895 = vmatprep.mubr.bf16.mxu1 %v4301_v0 }
 0xb9b   : > { %3756 = vmatmul.mubr.msk.bf16.gmra.mrb[28].mxu1 %vm464_vm1, %v5389_v12 }
 0xc66   : > { %v2887_v15 = vpop.f32.mrb[24].mxu1 }
 0xc67   : > { %v2906_v4 = vadd.f32 %v3736_v8, %v2887_v15  ;;  %v2889_v50 = vpop.f32.mrb[25].mxu1  ;;  %v3158_v8 = vld [vmem:[%s4572_s15 + $0x20] sm:$0xff] (%p4370_p6)  ;;  %v3162_v15 = vld [vmem:[%s4572_s15 + $0x30] sm:$0xff] (%p4370_p6) }
 0xc68   : > { %v2907_v16 = vadd.f32 %v3737_v18, %v2889_v50  ;;  %v2891_v30 = vpop.f32.mrb[26].mxu1  ;;  %v3160_v18 = vld [vmem:[%s4572_s15 + $0x28] sm:$0xff] (%p4370_p6)  ;;  %3159 = vst [vmem:[%s3137_s12 + $0x40] sm:$0xff] (%p4370_p6), %v3158_v8  ;;  %3163 = vst [vmem:[%s3137_s12 + $0x60] sm:$0xff] (%p4370_p6), %v3162_v15 }
 0xc69   : > { %v3757_v26 = vmul.f32 -1.442695, %v2906_v4  ;;  %v2908_v5 = vadd.f32 %v3738_v46, %v2891_v30  ;;  %v2893_v27 = vpop.f32.mrb[27].mxu1  ;;  %3161 = vst [vmem:[%s3137_s12 + $0x48] sm:$0xff] (%p4370_p6), %v3160_v18  ;;  %v3164_v46 = vld [vmem:[%s4572_s15 + $0x38] sm:$0xff] (%p4370_p6)  ;;  %v3166_v4 = vld [vmem:[%s4572_s15 + $0x40] sm:$0xff] (%p4370_p6) }
 0xc6a   : > { %v3758_v0 = vmul.f32 -1.442695, %v2907_v16  ;;  %v2909_v32 = vadd.f32 %v3739_v52, %v2893_v27  ;;  %3165 = vst [vmem:[%s3137_s12 + $0x68] sm:$0xff] (%p4370_p6), %v3164_v46  ;;  %3167 = vst [vmem:[%s3137_s12 + $0x80] sm:$0xff] (%p4370_p6), %v3166_v4  ;;  %v3168_v50 = vld [vmem:[%s4572_s15 + $0x48] sm:$0xff] (%p4370_p6)  ;;  %v3170_v52 = vld [vmem:[%s4572_s15 + $0x50] sm:$0xff] (%p4370_p6) }
 0xc6b   : > { %4220 = vpow2.f32 %v3757_v26  ;;  %v3759_v12 = vmul.f32 -1.442695, %v2908_v5  ;;  %v3172_v16 = vld [vmem:[%s4572_s15 + $0x58] sm:$0xff] (%p4370_p6)  ;;  %3169 = vst [vmem:[%s3137_s12 + $0x88] sm:$0xff] (%p4370_p6), %v3168_v50  ;;  %3171 = vst [vmem:[%s3137_s12 + $0xa0] sm:$0xff] (%p4370_p6), %v3170_v52  ;;  %v3174_v30 = vld [vmem:[%s4572_s15 + $0x60] sm:$0xff] (%p4370_p6) }
 0xc6c   : > { %4222 = vpow2.f32 %v3758_v0  ;;  %v3760_v33 = vmul.f32 -1.442695, %v2909_v32  ;;  %3173 = vst [vmem:[%s3137_s12 + $0xa8] sm:$0xff] (%p4370_p6), %v3172_v16  ;;  %v3176_v26 = vld [vmem:[%s4572_s15 + $0x68] sm:$0xff] (%p4370_p6)  ;;  %3175 = vst [vmem:[%s3137_s12 + $0xc0] sm:$0xff] (%p4370_p6), %v3174_v30 }
 0xc6d   : > { %4224 = vpow2.f32 %v3759_v12  ;;  %3177 = vst [vmem:[%s3137_s12 + $0xc8] sm:$0xff] (%p4370_p6), %v3176_v26 }
 0xc6e   : > { %4226 = vpow2.f32 %v3760_v33  ;;  %v2897_v36 = vpop.f32.mrb[28].mxu1 }
 0xc6f   : > { %v2899_v29 = vpop.f32.mrb[29].mxu1  ;;  %v2910_v40 = vadd.f32 %v3740_v31, %v2897_v36 }
 0xc70   : > { %v2901_v41 = vpop.f32.mrb[30].mxu1  ;;  %v2911_v42 = vadd.f32 %v3741_v62, %v2899_v29 }
 0xc71   : > { %v2912_v24 = vadd.f32 %v3742_v35, %v2901_v41  ;;  %v2903_v17 = vpop.f32.mrb[31].mxu1  ;;  %4228 = vtanh.f32 %v2910_v40 }
 0xc72   : > { %v2913_v39 = vadd.f32 %v3743_v20, %v2903_v17  ;;  %4230 = vtanh.f32 %v2911_v42 }
 0xc73   : > { %v3761_v55 = vmul.f32 -1.442695, %v2912_v24 }
 0xc74   : > { %v3762_v43 = vmul.f32 -1.442695, %v2913_v39 }
 0xc75   : > { %v4221_v53 = vpop.eup %4220  ;;  %4232 = vpow2.f32 %v3761_v55 }
 0xc76   : > { %v4223_v34 = vpop.eup %4222  ;;  %v2932_v44 = vadd.f32 1.0, %v4221_v53  ;;  %4234 = vpow2.f32 %v3762_v43 }
 0xc77   : > { %v4225_v49 = vpop.eup %4224  ;;  %v2933_v51 = vadd.f32 1.0, %v4223_v34 }
 0xc78   : > { %v4227_v56 = vpop.eup %4226  ;;  %4236 = vrcp.f32 %v2932_v44  ;;  %v2934_v47 = vadd.f32 1.0, %v4225_v49 }
 0xc79   : > { %4238 = vrcp.f32 %v2933_v51  ;;  %v2935_v28 = vadd.f32 1.0, %v4227_v56 }
 0xc7a   : > { %4240 = vrcp.f32 %v2934_v47 }
 0xc7b   : > { %4242 = vrcp.f32 %v2935_v28  ;;  %v4229_v2 = vpop.eup %4228 }
 0xc7c   : > { %v4231_v21 = vpop.eup %4230 }
 0xc7f   : > { %v4233_v54 = vpop.eup %4232 }
 0xc80   : > { %v4235_v37 = vpop.eup %4234  ;;  %v2936_v60 = vadd.f32 1.0, %v4233_v54 }
 0xc81   : > { %v2937_v3 = vadd.f32 1.0, %v4235_v37 }
 0xc82   : > { %v4237_v45 = vpop.eup %4236  ;;  %4244 = vrcp.f32 %v2936_v60 }
 0xc83   : > { %v4239_v58 = vpop.eup %4238  ;;  %v2956_v38 = vmul.f32 %v4237_v45, %v4229_v2  ;;  %4246 = vrcp.f32 %v2937_v3 }
 0xc84   : > { %v4241_v63 = vpop.eup %4240  ;;  %v2957_v48 = vmul.f32 %v4239_v58, %v4231_v21 }
 0xc85   : > { %v4243_v6 = vpop.eup %4242  ;;  %v2954_v7 = vmul.f32 %v4241_v63, %v5403_v57  ;;  %v3150_v57 = vld [vmem:[%s4572_s15] sm:$0xff] (%p4370_p6) }
 0xc86   : > { %v2955_v59 = vmul.f32 %v4243_v6, %v5405_v13  ;;  %v3152_v13 = vld [vmem:[%s4572_s15 + $0x8] sm:$0xff] (%p4370_p6)  ;;  %3151 = vst [vmem:[%s3137_s12] sm:$0xff] (%p4370_p6), %v3150_v57 }
 0xc87   : > { %v2958_v9 = vadd.f32 %v2956_v38, %v2954_v7  ;;  %3153 = vst [vmem:[%s3137_s12 + $0x8] sm:$0xff] (%p4370_p6), %v3152_v13 }
 0xc88   : > { %v2959_v10 = vadd.f32 %v2957_v48, %v2955_v59 }
 0xc89   : > { %4248 = vtanh.f32 %v2958_v9  ;;  %3765 = vst [vmem:[%s4561_s21 + $0x70] sm:$0xff] %v2958_v9 }
 0xc8a   : > { %4250 = vtanh.f32 %v2959_v10  ;;  %3766 = vst [vmem:[%s4561_s21 + $0x78] sm:$0xff] %v2959_v10 }
 0xc8c   : > { %v4245_v61 = vpop.eup %4244 }
 0xc8d   : > { %v4247_v11 = vpop.eup %4246 }
 0xc91   : > { %3131 = sbr.rel (!%p4370_p6) target bundleno = 3232 (0xca0), region = 63 }
 0xc93   : > { %v4249_v14 = vpop.eup %4248 }
 0xc94   : > { %v4251_v1 = vpop.eup %4250  ;;  %v2962_v22 = vmul.f32 %v4249_v14, %v4245_v61 }
 0xc95   : > { %v2963_v23 = vmul.f32 %v4251_v1, %v4247_v11 }
 0xc96   : > { %3763 = vst [vmem:[%s4572_s15 + $0x70] sm:$0xff] %v2962_v22 }
 0xc97   : > { %3764 = vst [vmem:[%s4572_s15 + $0x78] sm:$0xff] %v2963_v23 }
 0xc9d   : > { %v3178_v5 = vld [vmem:[%s4572_s15 + $0x70] sm:$0xff] }
 0xc9e   : > { %3179 = vst [vmem:[%s3137_s12 + $0xe0] sm:$0xff] %v3178_v5  ;;  %v3180_v27 = vld [vmem:[%s4572_s15 + $0x78] sm:$0xff] }
 0xc9f   : > { %3181 = vst [vmem:[%s3137_s12 + $0xe8] sm:$0xff] %v3180_v27 }
 0xca0 PF: > { %3187 = sbr.rel (!%p4370_p6) target bundleno = 3242 (0xcaa), region = 86  ;;  %s3874_s14 = sshll.u32 (%p4370_p6), %s4291_s17, 4  ;;  %v3206_v0 = vld [vmem:[%s4561_s21] sm:$0xff] (%p4370_p6)  ;;  %v3208_v32 = vld [vmem:[%s4561_s21 + $0x8] sm:$0xff] (%p4370_p6)  ;;  %v3210_v12 = vld [vmem:[%s4561_s21 + $0x10] sm:$0xff] (%p4370_p6) }
 0xca1   : > { %s3193_s7 = scalar_lea.vmem (%p4370_p6), %s5603_s4, %s3874_s14  ;;  %v3212_v33 = vld [vmem:[%s4561_s21 + $0x18] sm:$0xff] (%p4370_p6)  ;;  %v3214_v31 = vld [vmem:[%s4561_s21 + $0x20] sm:$0xff] (%p4370_p6)  ;;  %v3216_v36 = vld [vmem:[%s4561_s21 + $0x28] sm:$0xff] (%p4370_p6) }
 0xca2   : > { %3207 = vst [vmem:[%s3193_s7] sm:$0xff] (%p4370_p6), %v3206_v0  ;;  %3209 = vst [vmem:[%s3193_s7 + $0x8] sm:$0xff] (%p4370_p6), %v3208_v32  ;;  %v3218_v62 = vld [vmem:[%s4561_s21 + $0x30] sm:$0xff] (%p4370_p6)  ;;  %v3220_v35 = vld [vmem:[%s4561_s21 + $0x38] sm:$0xff] (%p4370_p6) }
 0xca3   : > { %3211 = vst [vmem:[%s3193_s7 + $0x20] sm:$0xff] (%p4370_p6), %v3210_v12  ;;  %3213 = vst [vmem:[%s3193_s7 + $0x28] sm:$0xff] (%p4370_p6), %v3212_v33  ;;  %v3222_v29 = vld [vmem:[%s4561_s21 + $0x40] sm:$0xff] (%p4370_p6)  ;;  %v3224_v20 = vld [vmem:[%s4561_s21 + $0x48] sm:$0xff] (%p4370_p6) }
 0xca4   : > { %3215 = vst [vmem:[%s3193_s7 + $0x40] sm:$0xff] (%p4370_p6), %v3214_v31  ;;  %3217 = vst [vmem:[%s3193_s7 + $0x48] sm:$0xff] (%p4370_p6), %v3216_v36  ;;  %v3226_v40 = vld [vmem:[%s4561_s21 + $0x50] sm:$0xff] (%p4370_p6)  ;;  %v3228_v41 = vld [vmem:[%s4561_s21 + $0x58] sm:$0xff] (%p4370_p6) }
 0xca5   : > { %3219 = vst [vmem:[%s3193_s7 + $0x60] sm:$0xff] (%p4370_p6), %v3218_v62  ;;  %3221 = vst [vmem:[%s3193_s7 + $0x68] sm:$0xff] (%p4370_p6), %v3220_v35  ;;  %v3230_v42 = vld [vmem:[%s4561_s21 + $0x60] sm:$0xff] (%p4370_p6)  ;;  %v3232_v24 = vld [vmem:[%s4561_s21 + $0x68] sm:$0xff] (%p4370_p6) }
 0xca6   : > { %3223 = vst [vmem:[%s3193_s7 + $0x80] sm:$0xff] (%p4370_p6), %v3222_v29  ;;  %3225 = vst [vmem:[%s3193_s7 + $0x88] sm:$0xff] (%p4370_p6), %v3224_v20  ;;  %v3234_v17 = vld [vmem:[%s4561_s21 + $0x70] sm:$0xff] (%p4370_p6)  ;;  %v3236_v39 = vld [vmem:[%s4561_s21 + $0x78] sm:$0xff] (%p4370_p6) }
 0xca7   : > { %3227 = vst [vmem:[%s3193_s7 + $0xa0] sm:$0xff] %v3226_v40  ;;  %3229 = vst [vmem:[%s3193_s7 + $0xa8] sm:$0xff] %v3228_v41 }
 0xca8   : > { %3231 = vst [vmem:[%s3193_s7 + $0xc0] sm:$0xff] %v3230_v42  ;;  %3233 = vst [vmem:[%s3193_s7 + $0xc8] sm:$0xff] %v3232_v24 }
 0xca9   : > { %3235 = vst [vmem:[%s3193_s7 + $0xe0] sm:$0xff] %v3234_v17  ;;  %3237 = vst [vmem:[%s3193_s7 + $0xe8] sm:$0xff] %v3236_v39 }
 0xcaa PF: > { %s15_s19 = sadd.s32 1, %s4299_s19   ;;  %s5605_s15 = smov %s4287_s16 }
 0xcab   : > { %p12_p11 = scmp.ge.s32.totalorder %s15_s19, 4   ;;  %s5606_s16 = smov %s4375_s25 }
 0xcac   : > { %s5607_s17 = smov %s4295_s18  ;;  %s5608_s18 = smov %s5610_s20 }
 0xcad   :  { %14 = sbr.rel (!%p12_p11) target bundleno = 3 (0x3), region = 181 }

</bundles_post_ra>
